<compile_context>
chip_gen: v6e
topology: v6e:2x2x1
jax: 0.10.0
libtpu: 0.0.40
codegen_flags: <defaults>
</compile_context>

<pallas_src>
import functools

import jax
import jax.numpy as jnp
import numpy as np
from jax import lax
from jax.experimental import pallas as pl
from jax.experimental.pallas import tpu as pltpu

_K = 5          # conv kernel size
_PAD = 2        # conv padding
_FC_OUT = 200
_FC_PAD = 256   # FC output columns padded to a lane-dense multiple of 128


# --------------------------------------------------------------------------- #
# Fused kernel: one grid step == NB images; everything lives in VMEM.
# --------------------------------------------------------------------------- #

def _alice_fused_kernel(x_ref, s1_ref, s2_ref, s3_ref,
                        m1_ref, m2_ref, m3_ref, m4_ref,
                        b1_ref, b2_ref, b3_ref, b4_ref,
                        wfc_ref, bfc_ref, out_ref):
    nb = x_ref.shape[0]

    def sigmoid(z):
        # One EUP transcendental; the mul/adds go to otherwise idle VALU slots.
        return 0.5 * jnp.tanh(0.5 * z) + 0.5

    def conv(a, s_b, m_ref, b_ref, ho):
        # a    : [nb, H_in, Win*Cin] bf16 activations, (w, c)-packed lanes.
        # s_b  : [nb, 5*ho, H_in]    bf16 0/1 row-selector (kh + row stride +
        #                            row zero-padding of im2col), batched.
        # m_ref: [5, Win*Cin, Wo*Cout] bf16 folded weights (kw, width stride
        #                            and width zero-padding folded in).
        # b_ref: [1, Wo*Cout] f32 bias tiled over w.
        kdim = m_ref.shape[1]
        n_out = m_ref.shape[2]

        # Batched row selection on the MXU (bf16 inputs -> single-pass MXU).
        g = lax.dot_general(
            s_b, a,
            dimension_numbers=(((2,), (1,)), ((0,), (0,))),
            preferred_element_type=jnp.float32)          # [nb, 5*ho, kdim]
        g = g.astype(jnp.bfloat16)                        # exact (0/1 selector)

        # 5 row-tap GEMMs with the batch stacked along M (sublanes).
        acc = jnp.zeros((nb * ho, n_out), jnp.float32)
        for kh in range(_K):                              # static unroll
            rows = g[:, kh * ho:(kh + 1) * ho, :].reshape(nb * ho, kdim)
            acc = acc + jnp.dot(rows, m_ref[kh],
                                preferred_element_type=jnp.float32)

        act = sigmoid(acc + b_ref[...])
        return act.astype(jnp.bfloat16).reshape(nb, ho, n_out)

    # Broadcast the shared selectors over the batch once (hoisted; s3 reused).
    s1 = jnp.broadcast_to(s1_ref[...], (nb,) + tuple(s1_ref.shape))
    s2 = jnp.broadcast_to(s2_ref[...], (nb,) + tuple(s2_ref.shape))
    s3 = jnp.broadcast_to(s3_ref[...], (nb,) + tuple(s3_ref.shape))

    a = x_ref[...]                               # [nb, 32, 96] bf16
    a = conv(a, s1, m1_ref, b1_ref, 16)          # conv1 s=2 -> [nb, 16, 192]
    a = conv(a, s2, m2_ref, b2_ref, 8)           # conv2 s=2 -> [nb, 8, 96]
    a = conv(a, s3, m3_ref, b3_ref, 8)           # conv3 s=1 -> [nb, 8, 96]
    a = conv(a, s3, m4_ref, b4_ref, 8)           # conv4 s=1 -> [nb, 8, 96]

    # FC 768 -> 200 (padded to 256), contraction split over the 8 rows of `a`;
    # each GEMM has M = nb (sublane-dense).  wfc rows are pre-reordered so the
    # kernel's (h, w, c) layout matches torch's (c, h, w) flatten.
    y = bfc_ref[...]                             # [1, 256] f32
    for h in range(8):                           # static unroll
        y = y + jnp.dot(a[:, h, :], wfc_ref[h],
                        preferred_element_type=jnp.float32)
    out_ref[...] = y.astype(out_ref.dtype)       # [nb, 256]


# --------------------------------------------------------------------------- #
# One-time parameter preparation (all layout work hoisted out of forward)
# --------------------------------------------------------------------------- #

def _make_row_selector(h_in, ho, stride):
    """[5*ho, h_in] 0/1 bf16 matrix; row kh*ho+o picks input row
    stride*o + kh - 2 (all-zero row where that position is zero padding)."""
    s = np.zeros((_K * ho, h_in), np.float32)
    for kh in range(_K):
        for o in range(ho):
            r = stride * o + kh - _PAD
            if 0 <= r < h_in:
                s[kh * ho + o, r] = 1.0
    return jnp.asarray(s, dtype=jnp.bfloat16)


def _fold_conv_weight(w, w_in, wo, stride):
    """[Cout, Cin, 5, 5] -> [5, W_in*Cin, Wo*Cout] bf16 with the kw loop, the
    width stride and the width zero-padding folded into a banded matrix."""
    w = np.asarray(w, np.float32)
    cout, cin, k, _ = w.shape
    m = np.zeros((k, w_in * cin, wo * cout), np.float32)
    for kh in range(k):
        for o in range(wo):
            for kw in range(k):
                wpos = stride * o + kw - _PAD
                if 0 <= wpos < w_in:
                    m[kh, wpos * cin:(wpos + 1) * cin,
                      o * cout:(o + 1) * cout] = w[:, :, kh, kw].T
    return jnp.asarray(m, dtype=jnp.bfloat16)


def _tile_bias(b, wo):
    return jnp.asarray(np.tile(np.asarray(b, np.float32), wo)[None, :])


def pack_params(p):
    packed = {
        "s1": _make_row_selector(32, 16, 2),
        "s2": _make_row_selector(16, 8, 2),
        "s3": _make_row_selector(8, 8, 1),          # shared by conv3 & conv4
        "m1": _fold_conv_weight(p["conv1_w"], 32, 16, 2),
        "m2": _fold_conv_weight(p["conv2_w"], 16, 8, 2),
        "m3": _fold_conv_weight(p["conv3_w"], 8, 8, 1),
        "m4": _fold_conv_weight(p["conv4_w"], 8, 8, 1),
        "b1": _tile_bias(p["conv1_b"], 16),
        "b2": _tile_bias(p["conv2_b"], 8),
        "b3": _tile_bias(p["conv3_b"], 8),
        "b4": _tile_bias(p["conv4_b"], 8),
    }
    # torch flattens (c, h, w); kernel activations are (h, (w, c))-packed.
    # Reorder to [h, w*12+c, out] and pad output columns 200 -> 256.
    fc_w = np.asarray(p["fc_w"], np.float32).reshape(200, 12, 8, 8)
    wfc = fc_w.transpose(2, 3, 1, 0).reshape(8, 96, 200)
    wfc_pad = np.zeros((8, 96, _FC_PAD), np.float32)
    wfc_pad[:, :, :_FC_OUT] = wfc
    packed["wfc"] = jnp.asarray(wfc_pad, dtype=jnp.bfloat16)
    bfc = np.zeros((1, _FC_PAD), np.float32)
    bfc[0, :_FC_OUT] = np.asarray(p["fc_b"], np.float32)
    packed["bfc"] = jnp.asarray(bfc)
    return packed


# --------------------------------------------------------------------------- #
# Forward pass
# --------------------------------------------------------------------------- #

@functools.partial(jax.jit, static_argnames=("nb",))
def alice_net2_forward(packed, x, nb=8):
    """x: [B, 3, 32, 32] NCHW (PyTorch convention)."""
    B, C, H, W = x.shape
    assert (C, H, W) == (3, 32, 32), (C, H, W)
    # Host-side glue: NCHW -> [B, H, W*C] bf16, pad batch to a multiple of nb.
    xr = jnp.transpose(x, (0, 2, 3, 1)).reshape(B, H, W * C).astype(jnp.bfloat16)
    b_pad = pl.cdiv(B, nb) * nb
    if b_pad != B:
        xr = jnp.pad(xr, ((0, b_pad - B), (0, 0), (0, 0)))

    out = pl.pallas_call(
        _alice_fused_kernel,
        out_shape=jax.ShapeDtypeStruct((b_pad, _FC_PAD), jnp.float32),
        grid=(b_pad // nb,),
        in_specs=[
            pl.BlockSpec((nb, 32, 96), lambda b: (b, 0, 0)),      # x (nb imgs)
            pl.BlockSpec((80, 32), lambda b: (0, 0)),             # s1
            pl.BlockSpec((40, 16), lambda b: (0, 0)),             # s2
            pl.BlockSpec((40, 8), lambda b: (0, 0)),              # s3
            pl.BlockSpec((5, 96, 192), lambda b: (0, 0, 0)),      # m1
            pl.BlockSpec((5, 192, 96), lambda b: (0, 0, 0)),      # m2
            pl.BlockSpec((5, 96, 96), lambda b: (0, 0, 0)),       # m3
            pl.BlockSpec((5, 96, 96), lambda b: (0, 0, 0)),       # m4
            pl.BlockSpec((1, 192), lambda b: (0, 0)),             # b1
            pl.BlockSpec((1, 96), lambda b: (0, 0)),              # b2
            pl.BlockSpec((1, 96), lambda b: (0, 0)),              # b3
            pl.BlockSpec((1, 96), lambda b: (0, 0)),              # b4
            pl.BlockSpec((8, 96, _FC_PAD), lambda b: (0, 0, 0)),  # wfc
            pl.BlockSpec((1, _FC_PAD), lambda b: (0, 0)),         # bfc
        ],
        out_specs=pl.BlockSpec((nb, _FC_PAD), lambda b: (b, 0)),
        compiler_params=pltpu.CompilerParams(
            dimension_semantics=("parallel",)),
    )(xr, packed["s1"], packed["s2"], packed["s3"],
      packed["m1"], packed["m2"], packed["m3"], packed["m4"],
      packed["b1"], packed["b2"], packed["b3"], packed["b4"],
      packed["wfc"], packed["bfc"])
    return out[:B, :_FC_OUT]


# --------------------------------------------------------------------------- #
# Parameters (torch-style init) and pure-JAX reference
# --------------------------------------------------------------------------- #

def _conv_init(key, cout, cin, k):
    k1, k2 = jax.random.split(key)
    bound = 1.0 / ((cin * k * k) ** 0.5)
    w = jax.random.uniform(k1, (cout, cin, k, k), jnp.float32, -bound, bound)
    b = jax.random.uniform(k2, (cout,), jnp.float32, -bound, bound)
    return w, b


def _linear_init(key, out_f, in_f):
    k1, k2 = jax.random.split(key)
    bound = 1.0 / (in_f ** 0.5)
    w = jax.random.uniform(k1, (out_f, in_f), jnp.float32, -bound, bound)
    b = jax.random.uniform(k2, (out_f,), jnp.float32, -bound, bound)
    return w, b


def init_params(key):
    ks = jax.random.split(key, 5)
    p = {}
    p["conv1_w"], p["conv1_b"] = _conv_init(ks[0], 12, 3, 5)
    p["conv2_w"], p["conv2_b"] = _conv_init(ks[1], 12, 12, 5)
    p["conv3_w"], p["conv3_b"] = _conv_init(ks[2], 12, 12, 5)
    p["conv4_w"], p["conv4_b"] = _conv_init(ks[3], 12, 12, 5)
    p["fc_w"], p["fc_b"] = _linear_init(ks[4], 200, 768)
    return p


def _reference_forward(params, x):
    def conv(x, w, b, stride):
        y = jax.lax.conv_general_dilated(
            x, w, window_strides=(stride, stride), padding=[(2, 2), (2, 2)],
            dimension_numbers=("NCHW", "OIHW", "NCHW"))
        return jax.nn.sigmoid(y + b[None, :, None, None])

    x = conv(x, params["conv1_w"], params["conv1_b"], 2)
    x = conv(x, params["conv2_w"], params["conv2_b"], 2)
    x = conv(x, params["conv3_w"], params["conv3_b"], 1)
    x = conv(x, params["conv4_w"], params["conv4_b"], 1)
    x = x.reshape(x.shape[0], -1)
    return x @ params["fc_w"].T + params["fc_b"]


# --------------------------------------------------------------------------- #

if __name__ == "__main__":
    key = jax.random.PRNGKey(0)
    k_param, k_x = jax.random.split(key)
    params = init_params(k_param)
    packed = pack_params(params)                 # one-time weight folding

    x = jax.random.normal(k_x, (2, 3, 32, 32), jnp.float32)

    out = jax.block_until_ready(alice_net2_forward(packed, x, nb=8))
    assert out.shape == (2, 200), out.shape

    ref = jax.block_until_ready(_reference_forward(params, x))
    max_err = float(jnp.max(jnp.abs(out - ref)))
    # bf16 folded weights / bf16 activations -> ~1e-3 typical deviation.
    assert jnp.allclose(out, ref, rtol=2e-2, atol=2e-2), max_err

    print("KERNEL_OK")
</pallas_src>

<mosaic_0001>
module attributes {stable_mosaic.version = 11 : i64} {
  func.func @_alice_fused_kernel(%arg0: i32, %arg1: memref<8x32x96xbf16, #tpu.memory_space<vmem>>, %arg2: memref<80x32xbf16, #tpu.memory_space<vmem>>, %arg3: memref<40x16xbf16, #tpu.memory_space<vmem>>, %arg4: memref<40x8xbf16, #tpu.memory_space<vmem>>, %arg5: memref<5x96x192xbf16, #tpu.memory_space<vmem>>, %arg6: memref<5x192x96xbf16, #tpu.memory_space<vmem>>, %arg7: memref<5x96x96xbf16, #tpu.memory_space<vmem>>, %arg8: memref<5x96x96xbf16, #tpu.memory_space<vmem>>, %arg9: memref<1x192xf32, #tpu.memory_space<vmem>>, %arg10: memref<1x96xf32, #tpu.memory_space<vmem>>, %arg11: memref<1x96xf32, #tpu.memory_space<vmem>>, %arg12: memref<1x96xf32, #tpu.memory_space<vmem>>, %arg13: memref<8x96x256xbf16, #tpu.memory_space<vmem>>, %arg14: memref<1x256xf32, #tpu.memory_space<vmem>>, %arg15: memref<8x256xf32, #tpu.memory_space<vmem>>) attributes {dimension_semantics = [#tpu.dimension_semantics<parallel>], iteration_bounds = array<i64: 1>, scalar_prefetch = 0 : i64, scratch_operands = 0 : i64, tpu.core_type = #tpu.core_type<tc>, window_params = [{transform_indices = @transform_0, window_bounds = array<i64: 8, 32, 96>}, {pipeline_mode = #tpu.pipeline_mode<synchronous>, transform_indices = @transform_1, window_bounds = array<i64: 80, 32>}, {pipeline_mode = #tpu.pipeline_mode<synchronous>, transform_indices = @transform_2, window_bounds = array<i64: 40, 16>}, {pipeline_mode = #tpu.pipeline_mode<synchronous>, transform_indices = @transform_3, window_bounds = array<i64: 40, 8>}, {pipeline_mode = #tpu.pipeline_mode<synchronous>, transform_indices = @transform_4, window_bounds = array<i64: 5, 96, 192>}, {pipeline_mode = #tpu.pipeline_mode<synchronous>, transform_indices = @transform_5, window_bounds = array<i64: 5, 192, 96>}, {pipeline_mode = #tpu.pipeline_mode<synchronous>, transform_indices = @transform_6, window_bounds = array<i64: 5, 96, 96>}, {pipeline_mode = #tpu.pipeline_mode<synchronous>, transform_indices = @transform_7, window_bounds = array<i64: 5, 96, 96>}, {pipeline_mode = #tpu.pipeline_mode<synchronous>, transform_indices = @transform_8, window_bounds = array<i64: 1, 192>}, {pipeline_mode = #tpu.pipeline_mode<synchronous>, transform_indices = @transform_9, window_bounds = array<i64: 1, 96>}, {pipeline_mode = #tpu.pipeline_mode<synchronous>, transform_indices = @transform_10, window_bounds = array<i64: 1, 96>}, {pipeline_mode = #tpu.pipeline_mode<synchronous>, transform_indices = @transform_11, window_bounds = array<i64: 1, 96>}, {pipeline_mode = #tpu.pipeline_mode<synchronous>, transform_indices = @transform_12, window_bounds = array<i64: 8, 96, 256>}, {pipeline_mode = #tpu.pipeline_mode<synchronous>, transform_indices = @transform_13, window_bounds = array<i64: 1, 256>}, {transform_indices = @transform_14, window_bounds = array<i64: 8, 256>}]} {
    %c0 = arith.constant 0 : index
    %c0_0 = arith.constant 0 : index
    %0 = vector.load %arg2[%c0, %c0_0] : memref<80x32xbf16, #tpu.memory_space<vmem>>, vector<80x32xbf16>
    %1 = vector.shape_cast %0 : vector<80x32xbf16> to vector<1x80x32xbf16>
    %2 = vector.broadcast %1 : vector<1x80x32xbf16> to vector<8x80x32xbf16>
    %c0_1 = arith.constant 0 : index
    %c0_2 = arith.constant 0 : index
    %3 = vector.load %arg3[%c0_1, %c0_2] : memref<40x16xbf16, #tpu.memory_space<vmem>>, vector<40x16xbf16>
    %4 = vector.shape_cast %3 : vector<40x16xbf16> to vector<1x40x16xbf16>
    %5 = vector.broadcast %4 : vector<1x40x16xbf16> to vector<8x40x16xbf16>
    %c0_3 = arith.constant 0 : index
    %c0_4 = arith.constant 0 : index
    %6 = vector.load %arg4[%c0_3, %c0_4] : memref<40x8xbf16, #tpu.memory_space<vmem>>, vector<40x8xbf16>
    %7 = vector.shape_cast %6 : vector<40x8xbf16> to vector<1x40x8xbf16>
    %8 = vector.broadcast %7 : vector<1x40x8xbf16> to vector<8x40x8xbf16>
    %c0_5 = arith.constant 0 : index
    %c0_6 = arith.constant 0 : index
    %c0_7 = arith.constant 0 : index
    %9 = vector.load %arg1[%c0_5, %c0_6, %c0_7] : memref<8x32x96xbf16, #tpu.memory_space<vmem>>, vector<8x32x96xbf16>
    %cst = arith.constant dense<0.000000e+00> : vector<8x80x96xf32>
    %10 = tpu.matmul %2, %9, %cst {dimension_numbers = #tpu.dot_dimension_numbers<[2], [1], [1], [2], [0, 0, 0, 1, 1, 2], [0], [0]>} : vector<8x80x32xbf16>, vector<8x32x96xbf16>, vector<8x80x96xf32> -> vector<8x80x96xf32>
    %11 = arith.truncf %10 : vector<8x80x96xf32> to vector<8x80x96xbf16>
    %cst_8 = arith.constant 0.000000e+00 : f32
    %12 = vector.broadcast %cst_8 : f32 to vector<128x192xf32>
    %13 = vector.extract_strided_slice %11 {offsets = [0, 0, 0], sizes = [8, 16, 96], strides = [1, 1, 1]} : vector<8x80x96xbf16> to vector<8x16x96xbf16>
    %14 = vector.shape_cast %13 : vector<8x16x96xbf16> to vector<128x96xbf16>
    %c0_9 = arith.constant 0 : index
    %c0_10 = arith.constant 0 : index
    %c0_11 = arith.constant 0 : index
    %15 = vector.load %arg5[%c0_9, %c0_10, %c0_11] : memref<5x96x192xbf16, #tpu.memory_space<vmem>>, vector<1x96x192xbf16>
    %16 = vector.shape_cast %15 : vector<1x96x192xbf16> to vector<96x192xbf16>
    %cst_12 = arith.constant dense<0.000000e+00> : vector<128x192xf32>
    %17 = tpu.matmul %14, %16, %cst_12 {dimension_numbers = #tpu.dot_dimension_numbers<[1], [0], [0], [1], [0, 0, 1, 1], [], []>} : vector<128x96xbf16>, vector<96x192xbf16>, vector<128x192xf32> -> vector<128x192xf32>
    %18 = arith.addf %12, %17 : vector<128x192xf32>
    %19 = vector.extract_strided_slice %11 {offsets = [0, 16, 0], sizes = [8, 16, 96], strides = [1, 1, 1]} : vector<8x80x96xbf16> to vector<8x16x96xbf16>
    %20 = vector.shape_cast %19 : vector<8x16x96xbf16> to vector<128x96xbf16>
    %c1 = arith.constant 1 : index
    %c0_13 = arith.constant 0 : index
    %c0_14 = arith.constant 0 : index
    %21 = vector.load %arg5[%c1, %c0_13, %c0_14] : memref<5x96x192xbf16, #tpu.memory_space<vmem>>, vector<1x96x192xbf16>
    %22 = vector.shape_cast %21 : vector<1x96x192xbf16> to vector<96x192xbf16>
    %cst_15 = arith.constant dense<0.000000e+00> : vector<128x192xf32>
    %23 = tpu.matmul %20, %22, %cst_15 {dimension_numbers = #tpu.dot_dimension_numbers<[1], [0], [0], [1], [0, 0, 1, 1], [], []>} : vector<128x96xbf16>, vector<96x192xbf16>, vector<128x192xf32> -> vector<128x192xf32>
    %24 = arith.addf %18, %23 : vector<128x192xf32>
    %25 = vector.extract_strided_slice %11 {offsets = [0, 32, 0], sizes = [8, 16, 96], strides = [1, 1, 1]} : vector<8x80x96xbf16> to vector<8x16x96xbf16>
    %26 = vector.shape_cast %25 : vector<8x16x96xbf16> to vector<128x96xbf16>
    %c2 = arith.constant 2 : index
    %c0_16 = arith.constant 0 : index
    %c0_17 = arith.constant 0 : index
    %27 = vector.load %arg5[%c2, %c0_16, %c0_17] : memref<5x96x192xbf16, #tpu.memory_space<vmem>>, vector<1x96x192xbf16>
    %28 = vector.shape_cast %27 : vector<1x96x192xbf16> to vector<96x192xbf16>
    %cst_18 = arith.constant dense<0.000000e+00> : vector<128x192xf32>
    %29 = tpu.matmul %26, %28, %cst_18 {dimension_numbers = #tpu.dot_dimension_numbers<[1], [0], [0], [1], [0, 0, 1, 1], [], []>} : vector<128x96xbf16>, vector<96x192xbf16>, vector<128x192xf32> -> vector<128x192xf32>
    %30 = arith.addf %24, %29 : vector<128x192xf32>
    %31 = vector.extract_strided_slice %11 {offsets = [0, 48, 0], sizes = [8, 16, 96], strides = [1, 1, 1]} : vector<8x80x96xbf16> to vector<8x16x96xbf16>
    %32 = vector.shape_cast %31 : vector<8x16x96xbf16> to vector<128x96xbf16>
    %c3 = arith.constant 3 : index
    %c0_19 = arith.constant 0 : index
    %c0_20 = arith.constant 0 : index
    %33 = vector.load %arg5[%c3, %c0_19, %c0_20] : memref<5x96x192xbf16, #tpu.memory_space<vmem>>, vector<1x96x192xbf16>
    %34 = vector.shape_cast %33 : vector<1x96x192xbf16> to vector<96x192xbf16>
    %cst_21 = arith.constant dense<0.000000e+00> : vector<128x192xf32>
    %35 = tpu.matmul %32, %34, %cst_21 {dimension_numbers = #tpu.dot_dimension_numbers<[1], [0], [0], [1], [0, 0, 1, 1], [], []>} : vector<128x96xbf16>, vector<96x192xbf16>, vector<128x192xf32> -> vector<128x192xf32>
    %36 = arith.addf %30, %35 : vector<128x192xf32>
    %37 = vector.extract_strided_slice %11 {offsets = [0, 64, 0], sizes = [8, 16, 96], strides = [1, 1, 1]} : vector<8x80x96xbf16> to vector<8x16x96xbf16>
    %38 = vector.shape_cast %37 : vector<8x16x96xbf16> to vector<128x96xbf16>
    %c4 = arith.constant 4 : index
    %c0_22 = arith.constant 0 : index
    %c0_23 = arith.constant 0 : index
    %39 = vector.load %arg5[%c4, %c0_22, %c0_23] : memref<5x96x192xbf16, #tpu.memory_space<vmem>>, vector<1x96x192xbf16>
    %40 = vector.shape_cast %39 : vector<1x96x192xbf16> to vector<96x192xbf16>
    %cst_24 = arith.constant dense<0.000000e+00> : vector<128x192xf32>
    %41 = tpu.matmul %38, %40, %cst_24 {dimension_numbers = #tpu.dot_dimension_numbers<[1], [0], [0], [1], [0, 0, 1, 1], [], []>} : vector<128x96xbf16>, vector<96x192xbf16>, vector<128x192xf32> -> vector<128x192xf32>
    %42 = arith.addf %36, %41 : vector<128x192xf32>
    %c0_25 = arith.constant 0 : index
    %c0_26 = arith.constant 0 : index
    %43 = vector.load %arg9[%c0_25, %c0_26] : memref<1x192xf32, #tpu.memory_space<vmem>>, vector<1x192xf32>
    %44 = vector.broadcast %43 : vector<1x192xf32> to vector<128x192xf32>
    %45 = arith.addf %42, %44 : vector<128x192xf32>
    %cst_27 = arith.constant 5.000000e-01 : f32
    %46 = vector.broadcast %cst_27 : f32 to vector<128x192xf32>
    %47 = arith.mulf %46, %45 : vector<128x192xf32>
    %48 = math.tanh %47 : vector<128x192xf32>
    %cst_28 = arith.constant 5.000000e-01 : f32
    %49 = vector.broadcast %cst_28 : f32 to vector<128x192xf32>
    %50 = arith.mulf %49, %48 : vector<128x192xf32>
    %cst_29 = arith.constant 5.000000e-01 : f32
    %51 = vector.broadcast %cst_29 : f32 to vector<128x192xf32>
    %52 = arith.addf %50, %51 : vector<128x192xf32>
    %53 = arith.truncf %52 : vector<128x192xf32> to vector<128x192xbf16>
    %54 = vector.shape_cast %53 : vector<128x192xbf16> to vector<8x16x192xbf16>
    %cst_30 = arith.constant dense<0.000000e+00> : vector<8x40x192xf32>
    %55 = tpu.matmul %5, %54, %cst_30 {dimension_numbers = #tpu.dot_dimension_numbers<[2], [1], [1], [2], [0, 0, 0, 1, 1, 2], [0], [0]>} : vector<8x40x16xbf16>, vector<8x16x192xbf16>, vector<8x40x192xf32> -> vector<8x40x192xf32>
    %56 = arith.truncf %55 : vector<8x40x192xf32> to vector<8x40x192xbf16>
    %cst_31 = arith.constant 0.000000e+00 : f32
    %57 = vector.broadcast %cst_31 : f32 to vector<64x96xf32>
    %58 = vector.extract_strided_slice %56 {offsets = [0, 0, 0], sizes = [8, 8, 192], strides = [1, 1, 1]} : vector<8x40x192xbf16> to vector<8x8x192xbf16>
    %59 = vector.shape_cast %58 : vector<8x8x192xbf16> to vector<64x192xbf16>
    %c0_32 = arith.constant 0 : index
    %c0_33 = arith.constant 0 : index
    %c0_34 = arith.constant 0 : index
    %60 = vector.load %arg6[%c0_32, %c0_33, %c0_34] : memref<5x192x96xbf16, #tpu.memory_space<vmem>>, vector<1x192x96xbf16>
    %61 = vector.shape_cast %60 : vector<1x192x96xbf16> to vector<192x96xbf16>
    %cst_35 = arith.constant dense<0.000000e+00> : vector<64x96xf32>
    %62 = tpu.matmul %59, %61, %cst_35 {dimension_numbers = #tpu.dot_dimension_numbers<[1], [0], [0], [1], [0, 0, 1, 1], [], []>} : vector<64x192xbf16>, vector<192x96xbf16>, vector<64x96xf32> -> vector<64x96xf32>
    %63 = arith.addf %57, %62 : vector<64x96xf32>
    %64 = vector.extract_strided_slice %56 {offsets = [0, 8, 0], sizes = [8, 8, 192], strides = [1, 1, 1]} : vector<8x40x192xbf16> to vector<8x8x192xbf16>
    %65 = vector.shape_cast %64 : vector<8x8x192xbf16> to vector<64x192xbf16>
    %c1_36 = arith.constant 1 : index
    %c0_37 = arith.constant 0 : index
    %c0_38 = arith.constant 0 : index
    %66 = vector.load %arg6[%c1_36, %c0_37, %c0_38] : memref<5x192x96xbf16, #tpu.memory_space<vmem>>, vector<1x192x96xbf16>
    %67 = vector.shape_cast %66 : vector<1x192x96xbf16> to vector<192x96xbf16>
    %cst_39 = arith.constant dense<0.000000e+00> : vector<64x96xf32>
    %68 = tpu.matmul %65, %67, %cst_39 {dimension_numbers = #tpu.dot_dimension_numbers<[1], [0], [0], [1], [0, 0, 1, 1], [], []>} : vector<64x192xbf16>, vector<192x96xbf16>, vector<64x96xf32> -> vector<64x96xf32>
    %69 = arith.addf %63, %68 : vector<64x96xf32>
    %70 = vector.extract_strided_slice %56 {offsets = [0, 16, 0], sizes = [8, 8, 192], strides = [1, 1, 1]} : vector<8x40x192xbf16> to vector<8x8x192xbf16>
    %71 = vector.shape_cast %70 : vector<8x8x192xbf16> to vector<64x192xbf16>
    %c2_40 = arith.constant 2 : index
    %c0_41 = arith.constant 0 : index
    %c0_42 = arith.constant 0 : index
    %72 = vector.load %arg6[%c2_40, %c0_41, %c0_42] : memref<5x192x96xbf16, #tpu.memory_space<vmem>>, vector<1x192x96xbf16>
    %73 = vector.shape_cast %72 : vector<1x192x96xbf16> to vector<192x96xbf16>
    %cst_43 = arith.constant dense<0.000000e+00> : vector<64x96xf32>
    %74 = tpu.matmul %71, %73, %cst_43 {dimension_numbers = #tpu.dot_dimension_numbers<[1], [0], [0], [1], [0, 0, 1, 1], [], []>} : vector<64x192xbf16>, vector<192x96xbf16>, vector<64x96xf32> -> vector<64x96xf32>
    %75 = arith.addf %69, %74 : vector<64x96xf32>
    %76 = vector.extract_strided_slice %56 {offsets = [0, 24, 0], sizes = [8, 8, 192], strides = [1, 1, 1]} : vector<8x40x192xbf16> to vector<8x8x192xbf16>
    %77 = vector.shape_cast %76 : vector<8x8x192xbf16> to vector<64x192xbf16>
    %c3_44 = arith.constant 3 : index
    %c0_45 = arith.constant 0 : index
    %c0_46 = arith.constant 0 : index
    %78 = vector.load %arg6[%c3_44, %c0_45, %c0_46] : memref<5x192x96xbf16, #tpu.memory_space<vmem>>, vector<1x192x96xbf16>
    %79 = vector.shape_cast %78 : vector<1x192x96xbf16> to vector<192x96xbf16>
    %cst_47 = arith.constant dense<0.000000e+00> : vector<64x96xf32>
    %80 = tpu.matmul %77, %79, %cst_47 {dimension_numbers = #tpu.dot_dimension_numbers<[1], [0], [0], [1], [0, 0, 1, 1], [], []>} : vector<64x192xbf16>, vector<192x96xbf16>, vector<64x96xf32> -> vector<64x96xf32>
    %81 = arith.addf %75, %80 : vector<64x96xf32>
    %82 = vector.extract_strided_slice %56 {offsets = [0, 32, 0], sizes = [8, 8, 192], strides = [1, 1, 1]} : vector<8x40x192xbf16> to vector<8x8x192xbf16>
    %83 = vector.shape_cast %82 : vector<8x8x192xbf16> to vector<64x192xbf16>
    %c4_48 = arith.constant 4 : index
    %c0_49 = arith.constant 0 : index
    %c0_50 = arith.constant 0 : index
    %84 = vector.load %arg6[%c4_48, %c0_49, %c0_50] : memref<5x192x96xbf16, #tpu.memory_space<vmem>>, vector<1x192x96xbf16>
    %85 = vector.shape_cast %84 : vector<1x192x96xbf16> to vector<192x96xbf16>
    %cst_51 = arith.constant dense<0.000000e+00> : vector<64x96xf32>
    %86 = tpu.matmul %83, %85, %cst_51 {dimension_numbers = #tpu.dot_dimension_numbers<[1], [0], [0], [1], [0, 0, 1, 1], [], []>} : vector<64x192xbf16>, vector<192x96xbf16>, vector<64x96xf32> -> vector<64x96xf32>
    %87 = arith.addf %81, %86 : vector<64x96xf32>
    %c0_52 = arith.constant 0 : index
    %c0_53 = arith.constant 0 : index
    %88 = vector.load %arg10[%c0_52, %c0_53] : memref<1x96xf32, #tpu.memory_space<vmem>>, vector<1x96xf32>
    %89 = vector.broadcast %88 : vector<1x96xf32> to vector<64x96xf32>
    %90 = arith.addf %87, %89 : vector<64x96xf32>
    %cst_54 = arith.constant 5.000000e-01 : f32
    %91 = vector.broadcast %cst_54 : f32 to vector<64x96xf32>
    %92 = arith.mulf %91, %90 : vector<64x96xf32>
    %93 = math.tanh %92 : vector<64x96xf32>
    %cst_55 = arith.constant 5.000000e-01 : f32
    %94 = vector.broadcast %cst_55 : f32 to vector<64x96xf32>
    %95 = arith.mulf %94, %93 : vector<64x96xf32>
    %cst_56 = arith.constant 5.000000e-01 : f32
    %96 = vector.broadcast %cst_56 : f32 to vector<64x96xf32>
    %97 = arith.addf %95, %96 : vector<64x96xf32>
    %98 = arith.truncf %97 : vector<64x96xf32> to vector<64x96xbf16>
    %99 = vector.shape_cast %98 : vector<64x96xbf16> to vector<8x8x96xbf16>
    %cst_57 = arith.constant dense<0.000000e+00> : vector<8x40x96xf32>
    %100 = tpu.matmul %8, %99, %cst_57 {dimension_numbers = #tpu.dot_dimension_numbers<[2], [1], [1], [2], [0, 0, 0, 1, 1, 2], [0], [0]>} : vector<8x40x8xbf16>, vector<8x8x96xbf16>, vector<8x40x96xf32> -> vector<8x40x96xf32>
    %101 = arith.truncf %100 : vector<8x40x96xf32> to vector<8x40x96xbf16>
    %cst_58 = arith.constant 0.000000e+00 : f32
    %102 = vector.broadcast %cst_58 : f32 to vector<64x96xf32>
    %103 = vector.extract_strided_slice %101 {offsets = [0, 0, 0], sizes = [8, 8, 96], strides = [1, 1, 1]} : vector<8x40x96xbf16> to vector<8x8x96xbf16>
    %104 = vector.shape_cast %103 : vector<8x8x96xbf16> to vector<64x96xbf16>
    %c0_59 = arith.constant 0 : index
    %c0_60 = arith.constant 0 : index
    %c0_61 = arith.constant 0 : index
    %105 = vector.load %arg7[%c0_59, %c0_60, %c0_61] : memref<5x96x96xbf16, #tpu.memory_space<vmem>>, vector<1x96x96xbf16>
    %106 = vector.shape_cast %105 : vector<1x96x96xbf16> to vector<96x96xbf16>
    %cst_62 = arith.constant dense<0.000000e+00> : vector<64x96xf32>
    %107 = tpu.matmul %104, %106, %cst_62 {dimension_numbers = #tpu.dot_dimension_numbers<[1], [0], [0], [1], [0, 0, 1, 1], [], []>} : vector<64x96xbf16>, vector<96x96xbf16>, vector<64x96xf32> -> vector<64x96xf32>
    %108 = arith.addf %102, %107 : vector<64x96xf32>
    %109 = vector.extract_strided_slice %101 {offsets = [0, 8, 0], sizes = [8, 8, 96], strides = [1, 1, 1]} : vector<8x40x96xbf16> to vector<8x8x96xbf16>
    %110 = vector.shape_cast %109 : vector<8x8x96xbf16> to vector<64x96xbf16>
    %c1_63 = arith.constant 1 : index
    %c0_64 = arith.constant 0 : index
    %c0_65 = arith.constant 0 : index
    %111 = vector.load %arg7[%c1_63, %c0_64, %c0_65] : memref<5x96x96xbf16, #tpu.memory_space<vmem>>, vector<1x96x96xbf16>
    %112 = vector.shape_cast %111 : vector<1x96x96xbf16> to vector<96x96xbf16>
    %cst_66 = arith.constant dense<0.000000e+00> : vector<64x96xf32>
    %113 = tpu.matmul %110, %112, %cst_66 {dimension_numbers = #tpu.dot_dimension_numbers<[1], [0], [0], [1], [0, 0, 1, 1], [], []>} : vector<64x96xbf16>, vector<96x96xbf16>, vector<64x96xf32> -> vector<64x96xf32>
    %114 = arith.addf %108, %113 : vector<64x96xf32>
    %115 = vector.extract_strided_slice %101 {offsets = [0, 16, 0], sizes = [8, 8, 96], strides = [1, 1, 1]} : vector<8x40x96xbf16> to vector<8x8x96xbf16>
    %116 = vector.shape_cast %115 : vector<8x8x96xbf16> to vector<64x96xbf16>
    %c2_67 = arith.constant 2 : index
    %c0_68 = arith.constant 0 : index
    %c0_69 = arith.constant 0 : index
    %117 = vector.load %arg7[%c2_67, %c0_68, %c0_69] : memref<5x96x96xbf16, #tpu.memory_space<vmem>>, vector<1x96x96xbf16>
    %118 = vector.shape_cast %117 : vector<1x96x96xbf16> to vector<96x96xbf16>
    %cst_70 = arith.constant dense<0.000000e+00> : vector<64x96xf32>
    %119 = tpu.matmul %116, %118, %cst_70 {dimension_numbers = #tpu.dot_dimension_numbers<[1], [0], [0], [1], [0, 0, 1, 1], [], []>} : vector<64x96xbf16>, vector<96x96xbf16>, vector<64x96xf32> -> vector<64x96xf32>
    %120 = arith.addf %114, %119 : vector<64x96xf32>
    %121 = vector.extract_strided_slice %101 {offsets = [0, 24, 0], sizes = [8, 8, 96], strides = [1, 1, 1]} : vector<8x40x96xbf16> to vector<8x8x96xbf16>
    %122 = vector.shape_cast %121 : vector<8x8x96xbf16> to vector<64x96xbf16>
    %c3_71 = arith.constant 3 : index
    %c0_72 = arith.constant 0 : index
    %c0_73 = arith.constant 0 : index
    %123 = vector.load %arg7[%c3_71, %c0_72, %c0_73] : memref<5x96x96xbf16, #tpu.memory_space<vmem>>, vector<1x96x96xbf16>
    %124 = vector.shape_cast %123 : vector<1x96x96xbf16> to vector<96x96xbf16>
    %cst_74 = arith.constant dense<0.000000e+00> : vector<64x96xf32>
    %125 = tpu.matmul %122, %124, %cst_74 {dimension_numbers = #tpu.dot_dimension_numbers<[1], [0], [0], [1], [0, 0, 1, 1], [], []>} : vector<64x96xbf16>, vector<96x96xbf16>, vector<64x96xf32> -> vector<64x96xf32>
    %126 = arith.addf %120, %125 : vector<64x96xf32>
    %127 = vector.extract_strided_slice %101 {offsets = [0, 32, 0], sizes = [8, 8, 96], strides = [1, 1, 1]} : vector<8x40x96xbf16> to vector<8x8x96xbf16>
    %128 = vector.shape_cast %127 : vector<8x8x96xbf16> to vector<64x96xbf16>
    %c4_75 = arith.constant 4 : index
    %c0_76 = arith.constant 0 : index
    %c0_77 = arith.constant 0 : index
    %129 = vector.load %arg7[%c4_75, %c0_76, %c0_77] : memref<5x96x96xbf16, #tpu.memory_space<vmem>>, vector<1x96x96xbf16>
    %130 = vector.shape_cast %129 : vector<1x96x96xbf16> to vector<96x96xbf16>
    %cst_78 = arith.constant dense<0.000000e+00> : vector<64x96xf32>
    %131 = tpu.matmul %128, %130, %cst_78 {dimension_numbers = #tpu.dot_dimension_numbers<[1], [0], [0], [1], [0, 0, 1, 1], [], []>} : vector<64x96xbf16>, vector<96x96xbf16>, vector<64x96xf32> -> vector<64x96xf32>
    %132 = arith.addf %126, %131 : vector<64x96xf32>
    %c0_79 = arith.constant 0 : index
    %c0_80 = arith.constant 0 : index
    %133 = vector.load %arg11[%c0_79, %c0_80] : memref<1x96xf32, #tpu.memory_space<vmem>>, vector<1x96xf32>
    %134 = vector.broadcast %133 : vector<1x96xf32> to vector<64x96xf32>
    %135 = arith.addf %132, %134 : vector<64x96xf32>
    %cst_81 = arith.constant 5.000000e-01 : f32
    %136 = vector.broadcast %cst_81 : f32 to vector<64x96xf32>
    %137 = arith.mulf %136, %135 : vector<64x96xf32>
    %138 = math.tanh %137 : vector<64x96xf32>
    %cst_82 = arith.constant 5.000000e-01 : f32
    %139 = vector.broadcast %cst_82 : f32 to vector<64x96xf32>
    %140 = arith.mulf %139, %138 : vector<64x96xf32>
    %cst_83 = arith.constant 5.000000e-01 : f32
    %141 = vector.broadcast %cst_83 : f32 to vector<64x96xf32>
    %142 = arith.addf %140, %141 : vector<64x96xf32>
    %143 = arith.truncf %142 : vector<64x96xf32> to vector<64x96xbf16>
    %144 = vector.shape_cast %143 : vector<64x96xbf16> to vector<8x8x96xbf16>
    %cst_84 = arith.constant dense<0.000000e+00> : vector<8x40x96xf32>
    %145 = tpu.matmul %8, %144, %cst_84 {dimension_numbers = #tpu.dot_dimension_numbers<[2], [1], [1], [2], [0, 0, 0, 1, 1, 2], [0], [0]>} : vector<8x40x8xbf16>, vector<8x8x96xbf16>, vector<8x40x96xf32> -> vector<8x40x96xf32>
    %146 = arith.truncf %145 : vector<8x40x96xf32> to vector<8x40x96xbf16>
    %cst_85 = arith.constant 0.000000e+00 : f32
    %147 = vector.broadcast %cst_85 : f32 to vector<64x96xf32>
    %148 = vector.extract_strided_slice %146 {offsets = [0, 0, 0], sizes = [8, 8, 96], strides = [1, 1, 1]} : vector<8x40x96xbf16> to vector<8x8x96xbf16>
    %149 = vector.shape_cast %148 : vector<8x8x96xbf16> to vector<64x96xbf16>
    %c0_86 = arith.constant 0 : index
    %c0_87 = arith.constant 0 : index
    %c0_88 = arith.constant 0 : index
    %150 = vector.load %arg8[%c0_86, %c0_87, %c0_88] : memref<5x96x96xbf16, #tpu.memory_space<vmem>>, vector<1x96x96xbf16>
    %151 = vector.shape_cast %150 : vector<1x96x96xbf16> to vector<96x96xbf16>
    %cst_89 = arith.constant dense<0.000000e+00> : vector<64x96xf32>
    %152 = tpu.matmul %149, %151, %cst_89 {dimension_numbers = #tpu.dot_dimension_numbers<[1], [0], [0], [1], [0, 0, 1, 1], [], []>} : vector<64x96xbf16>, vector<96x96xbf16>, vector<64x96xf32> -> vector<64x96xf32>
    %153 = arith.addf %147, %152 : vector<64x96xf32>
    %154 = vector.extract_strided_slice %146 {offsets = [0, 8, 0], sizes = [8, 8, 96], strides = [1, 1, 1]} : vector<8x40x96xbf16> to vector<8x8x96xbf16>
    %155 = vector.shape_cast %154 : vector<8x8x96xbf16> to vector<64x96xbf16>
    %c1_90 = arith.constant 1 : index
    %c0_91 = arith.constant 0 : index
    %c0_92 = arith.constant 0 : index
    %156 = vector.load %arg8[%c1_90, %c0_91, %c0_92] : memref<5x96x96xbf16, #tpu.memory_space<vmem>>, vector<1x96x96xbf16>
    %157 = vector.shape_cast %156 : vector<1x96x96xbf16> to vector<96x96xbf16>
    %cst_93 = arith.constant dense<0.000000e+00> : vector<64x96xf32>
    %158 = tpu.matmul %155, %157, %cst_93 {dimension_numbers = #tpu.dot_dimension_numbers<[1], [0], [0], [1], [0, 0, 1, 1], [], []>} : vector<64x96xbf16>, vector<96x96xbf16>, vector<64x96xf32> -> vector<64x96xf32>
    %159 = arith.addf %153, %158 : vector<64x96xf32>
    %160 = vector.extract_strided_slice %146 {offsets = [0, 16, 0], sizes = [8, 8, 96], strides = [1, 1, 1]} : vector<8x40x96xbf16> to vector<8x8x96xbf16>
    %161 = vector.shape_cast %160 : vector<8x8x96xbf16> to vector<64x96xbf16>
    %c2_94 = arith.constant 2 : index
    %c0_95 = arith.constant 0 : index
    %c0_96 = arith.constant 0 : index
    %162 = vector.load %arg8[%c2_94, %c0_95, %c0_96] : memref<5x96x96xbf16, #tpu.memory_space<vmem>>, vector<1x96x96xbf16>
    %163 = vector.shape_cast %162 : vector<1x96x96xbf16> to vector<96x96xbf16>
    %cst_97 = arith.constant dense<0.000000e+00> : vector<64x96xf32>
    %164 = tpu.matmul %161, %163, %cst_97 {dimension_numbers = #tpu.dot_dimension_numbers<[1], [0], [0], [1], [0, 0, 1, 1], [], []>} : vector<64x96xbf16>, vector<96x96xbf16>, vector<64x96xf32> -> vector<64x96xf32>
    %165 = arith.addf %159, %164 : vector<64x96xf32>
    %166 = vector.extract_strided_slice %146 {offsets = [0, 24, 0], sizes = [8, 8, 96], strides = [1, 1, 1]} : vector<8x40x96xbf16> to vector<8x8x96xbf16>
    %167 = vector.shape_cast %166 : vector<8x8x96xbf16> to vector<64x96xbf16>
    %c3_98 = arith.constant 3 : index
    %c0_99 = arith.constant 0 : index
    %c0_100 = arith.constant 0 : index
    %168 = vector.load %arg8[%c3_98, %c0_99, %c0_100] : memref<5x96x96xbf16, #tpu.memory_space<vmem>>, vector<1x96x96xbf16>
    %169 = vector.shape_cast %168 : vector<1x96x96xbf16> to vector<96x96xbf16>
    %cst_101 = arith.constant dense<0.000000e+00> : vector<64x96xf32>
    %170 = tpu.matmul %167, %169, %cst_101 {dimension_numbers = #tpu.dot_dimension_numbers<[1], [0], [0], [1], [0, 0, 1, 1], [], []>} : vector<64x96xbf16>, vector<96x96xbf16>, vector<64x96xf32> -> vector<64x96xf32>
    %171 = arith.addf %165, %170 : vector<64x96xf32>
    %172 = vector.extract_strided_slice %146 {offsets = [0, 32, 0], sizes = [8, 8, 96], strides = [1, 1, 1]} : vector<8x40x96xbf16> to vector<8x8x96xbf16>
    %173 = vector.shape_cast %172 : vector<8x8x96xbf16> to vector<64x96xbf16>
    %c4_102 = arith.constant 4 : index
    %c0_103 = arith.constant 0 : index
    %c0_104 = arith.constant 0 : index
    %174 = vector.load %arg8[%c4_102, %c0_103, %c0_104] : memref<5x96x96xbf16, #tpu.memory_space<vmem>>, vector<1x96x96xbf16>
    %175 = vector.shape_cast %174 : vector<1x96x96xbf16> to vector<96x96xbf16>
    %cst_105 = arith.constant dense<0.000000e+00> : vector<64x96xf32>
    %176 = tpu.matmul %173, %175, %cst_105 {dimension_numbers = #tpu.dot_dimension_numbers<[1], [0], [0], [1], [0, 0, 1, 1], [], []>} : vector<64x96xbf16>, vector<96x96xbf16>, vector<64x96xf32> -> vector<64x96xf32>
    %177 = arith.addf %171, %176 : vector<64x96xf32>
    %c0_106 = arith.constant 0 : index
    %c0_107 = arith.constant 0 : index
    %178 = vector.load %arg12[%c0_106, %c0_107] : memref<1x96xf32, #tpu.memory_space<vmem>>, vector<1x96xf32>
    %179 = vector.broadcast %178 : vector<1x96xf32> to vector<64x96xf32>
    %180 = arith.addf %177, %179 : vector<64x96xf32>
    %cst_108 = arith.constant 5.000000e-01 : f32
    %181 = vector.broadcast %cst_108 : f32 to vector<64x96xf32>
    %182 = arith.mulf %181, %180 : vector<64x96xf32>
    %183 = math.tanh %182 : vector<64x96xf32>
    %cst_109 = arith.constant 5.000000e-01 : f32
    %184 = vector.broadcast %cst_109 : f32 to vector<64x96xf32>
    %185 = arith.mulf %184, %183 : vector<64x96xf32>
    %cst_110 = arith.constant 5.000000e-01 : f32
    %186 = vector.broadcast %cst_110 : f32 to vector<64x96xf32>
    %187 = arith.addf %185, %186 : vector<64x96xf32>
    %188 = arith.truncf %187 : vector<64x96xf32> to vector<64x96xbf16>
    %189 = vector.shape_cast %188 : vector<64x96xbf16> to vector<8x8x96xbf16>
    %c0_111 = arith.constant 0 : index
    %c0_112 = arith.constant 0 : index
    %190 = vector.load %arg14[%c0_111, %c0_112] : memref<1x256xf32, #tpu.memory_space<vmem>>, vector<1x256xf32>
    %191 = vector.extract_strided_slice %189 {offsets = [0, 0, 0], sizes = [8, 1, 96], strides = [1, 1, 1]} : vector<8x8x96xbf16> to vector<8x1x96xbf16>
    %192 = vector.shape_cast %191 : vector<8x1x96xbf16> to vector<8x96xbf16>
    %c0_113 = arith.constant 0 : index
    %c0_114 = arith.constant 0 : index
    %c0_115 = arith.constant 0 : index
    %193 = vector.load %arg13[%c0_113, %c0_114, %c0_115] : memref<8x96x256xbf16, #tpu.memory_space<vmem>>, vector<1x96x256xbf16>
    %194 = vector.shape_cast %193 : vector<1x96x256xbf16> to vector<96x256xbf16>
    %cst_116 = arith.constant dense<0.000000e+00> : vector<8x256xf32>
    %195 = tpu.matmul %192, %194, %cst_116 {dimension_numbers = #tpu.dot_dimension_numbers<[1], [0], [0], [1], [0, 0, 1, 1], [], []>} : vector<8x96xbf16>, vector<96x256xbf16>, vector<8x256xf32> -> vector<8x256xf32>
    %196 = vector.broadcast %190 : vector<1x256xf32> to vector<8x256xf32>
    %197 = arith.addf %196, %195 : vector<8x256xf32>
    %198 = vector.extract_strided_slice %189 {offsets = [0, 1, 0], sizes = [8, 1, 96], strides = [1, 1, 1]} : vector<8x8x96xbf16> to vector<8x1x96xbf16>
    %199 = vector.shape_cast %198 : vector<8x1x96xbf16> to vector<8x96xbf16>
    %c1_117 = arith.constant 1 : index
    %c0_118 = arith.constant 0 : index
    %c0_119 = arith.constant 0 : index
    %200 = vector.load %arg13[%c1_117, %c0_118, %c0_119] : memref<8x96x256xbf16, #tpu.memory_space<vmem>>, vector<1x96x256xbf16>
    %201 = vector.shape_cast %200 : vector<1x96x256xbf16> to vector<96x256xbf16>
    %cst_120 = arith.constant dense<0.000000e+00> : vector<8x256xf32>
    %202 = tpu.matmul %199, %201, %cst_120 {dimension_numbers = #tpu.dot_dimension_numbers<[1], [0], [0], [1], [0, 0, 1, 1], [], []>} : vector<8x96xbf16>, vector<96x256xbf16>, vector<8x256xf32> -> vector<8x256xf32>
    %203 = arith.addf %197, %202 : vector<8x256xf32>
    %204 = vector.extract_strided_slice %189 {offsets = [0, 2, 0], sizes = [8, 1, 96], strides = [1, 1, 1]} : vector<8x8x96xbf16> to vector<8x1x96xbf16>
    %205 = vector.shape_cast %204 : vector<8x1x96xbf16> to vector<8x96xbf16>
    %c2_121 = arith.constant 2 : index
    %c0_122 = arith.constant 0 : index
    %c0_123 = arith.constant 0 : index
    %206 = vector.load %arg13[%c2_121, %c0_122, %c0_123] : memref<8x96x256xbf16, #tpu.memory_space<vmem>>, vector<1x96x256xbf16>
    %207 = vector.shape_cast %206 : vector<1x96x256xbf16> to vector<96x256xbf16>
    %cst_124 = arith.constant dense<0.000000e+00> : vector<8x256xf32>
    %208 = tpu.matmul %205, %207, %cst_124 {dimension_numbers = #tpu.dot_dimension_numbers<[1], [0], [0], [1], [0, 0, 1, 1], [], []>} : vector<8x96xbf16>, vector<96x256xbf16>, vector<8x256xf32> -> vector<8x256xf32>
    %209 = arith.addf %203, %208 : vector<8x256xf32>
    %210 = vector.extract_strided_slice %189 {offsets = [0, 3, 0], sizes = [8, 1, 96], strides = [1, 1, 1]} : vector<8x8x96xbf16> to vector<8x1x96xbf16>
    %211 = vector.shape_cast %210 : vector<8x1x96xbf16> to vector<8x96xbf16>
    %c3_125 = arith.constant 3 : index
    %c0_126 = arith.constant 0 : index
    %c0_127 = arith.constant 0 : index
    %212 = vector.load %arg13[%c3_125, %c0_126, %c0_127] : memref<8x96x256xbf16, #tpu.memory_space<vmem>>, vector<1x96x256xbf16>
    %213 = vector.shape_cast %212 : vector<1x96x256xbf16> to vector<96x256xbf16>
    %cst_128 = arith.constant dense<0.000000e+00> : vector<8x256xf32>
    %214 = tpu.matmul %211, %213, %cst_128 {dimension_numbers = #tpu.dot_dimension_numbers<[1], [0], [0], [1], [0, 0, 1, 1], [], []>} : vector<8x96xbf16>, vector<96x256xbf16>, vector<8x256xf32> -> vector<8x256xf32>
    %215 = arith.addf %209, %214 : vector<8x256xf32>
    %216 = vector.extract_strided_slice %189 {offsets = [0, 4, 0], sizes = [8, 1, 96], strides = [1, 1, 1]} : vector<8x8x96xbf16> to vector<8x1x96xbf16>
    %217 = vector.shape_cast %216 : vector<8x1x96xbf16> to vector<8x96xbf16>
    %c4_129 = arith.constant 4 : index
    %c0_130 = arith.constant 0 : index
    %c0_131 = arith.constant 0 : index
    %218 = vector.load %arg13[%c4_129, %c0_130, %c0_131] : memref<8x96x256xbf16, #tpu.memory_space<vmem>>, vector<1x96x256xbf16>
    %219 = vector.shape_cast %218 : vector<1x96x256xbf16> to vector<96x256xbf16>
    %cst_132 = arith.constant dense<0.000000e+00> : vector<8x256xf32>
    %220 = tpu.matmul %217, %219, %cst_132 {dimension_numbers = #tpu.dot_dimension_numbers<[1], [0], [0], [1], [0, 0, 1, 1], [], []>} : vector<8x96xbf16>, vector<96x256xbf16>, vector<8x256xf32> -> vector<8x256xf32>
    %221 = arith.addf %215, %220 : vector<8x256xf32>
    %222 = vector.extract_strided_slice %189 {offsets = [0, 5, 0], sizes = [8, 1, 96], strides = [1, 1, 1]} : vector<8x8x96xbf16> to vector<8x1x96xbf16>
    %223 = vector.shape_cast %222 : vector<8x1x96xbf16> to vector<8x96xbf16>
    %c5 = arith.constant 5 : index
    %c0_133 = arith.constant 0 : index
    %c0_134 = arith.constant 0 : index
    %224 = vector.load %arg13[%c5, %c0_133, %c0_134] : memref<8x96x256xbf16, #tpu.memory_space<vmem>>, vector<1x96x256xbf16>
    %225 = vector.shape_cast %224 : vector<1x96x256xbf16> to vector<96x256xbf16>
    %cst_135 = arith.constant dense<0.000000e+00> : vector<8x256xf32>
    %226 = tpu.matmul %223, %225, %cst_135 {dimension_numbers = #tpu.dot_dimension_numbers<[1], [0], [0], [1], [0, 0, 1, 1], [], []>} : vector<8x96xbf16>, vector<96x256xbf16>, vector<8x256xf32> -> vector<8x256xf32>
    %227 = arith.addf %221, %226 : vector<8x256xf32>
    %228 = vector.extract_strided_slice %189 {offsets = [0, 6, 0], sizes = [8, 1, 96], strides = [1, 1, 1]} : vector<8x8x96xbf16> to vector<8x1x96xbf16>
    %229 = vector.shape_cast %228 : vector<8x1x96xbf16> to vector<8x96xbf16>
    %c6 = arith.constant 6 : index
    %c0_136 = arith.constant 0 : index
    %c0_137 = arith.constant 0 : index
    %230 = vector.load %arg13[%c6, %c0_136, %c0_137] : memref<8x96x256xbf16, #tpu.memory_space<vmem>>, vector<1x96x256xbf16>
    %231 = vector.shape_cast %230 : vector<1x96x256xbf16> to vector<96x256xbf16>
    %cst_138 = arith.constant dense<0.000000e+00> : vector<8x256xf32>
    %232 = tpu.matmul %229, %231, %cst_138 {dimension_numbers = #tpu.dot_dimension_numbers<[1], [0], [0], [1], [0, 0, 1, 1], [], []>} : vector<8x96xbf16>, vector<96x256xbf16>, vector<8x256xf32> -> vector<8x256xf32>
    %233 = arith.addf %227, %232 : vector<8x256xf32>
    %234 = vector.extract_strided_slice %189 {offsets = [0, 7, 0], sizes = [8, 1, 96], strides = [1, 1, 1]} : vector<8x8x96xbf16> to vector<8x1x96xbf16>
    %235 = vector.shape_cast %234 : vector<8x1x96xbf16> to vector<8x96xbf16>
    %c7 = arith.constant 7 : index
    %c0_139 = arith.constant 0 : index
    %c0_140 = arith.constant 0 : index
    %236 = vector.load %arg13[%c7, %c0_139, %c0_140] : memref<8x96x256xbf16, #tpu.memory_space<vmem>>, vector<1x96x256xbf16>
    %237 = vector.shape_cast %236 : vector<1x96x256xbf16> to vector<96x256xbf16>
    %cst_141 = arith.constant dense<0.000000e+00> : vector<8x256xf32>
    %238 = tpu.matmul %235, %237, %cst_141 {dimension_numbers = #tpu.dot_dimension_numbers<[1], [0], [0], [1], [0, 0, 1, 1], [], []>} : vector<8x96xbf16>, vector<96x256xbf16>, vector<8x256xf32> -> vector<8x256xf32>
    %239 = arith.addf %233, %238 : vector<8x256xf32>
    %c0_142 = arith.constant 0 : index
    %c0_143 = arith.constant 0 : index
    %240 = vector.load %arg15[%c0_142, %c0_143] : memref<8x256xf32, #tpu.memory_space<vmem>>, vector<8x256xf32>
    tpu.vector_store %arg15[%c0_142, %c0_143], %239 {strides = array<i32>} : memref<8x256xf32, #tpu.memory_space<vmem>>, vector<8x256xf32>,
    return
  }
  func.func @transform_0(%arg0: i32) -> (i32, i32, i32) {
    %c0_i32 = arith.constant 0 : i32
    %c0_i32_0 = arith.constant 0 : i32
    %c0_i32_1 = arith.constant 0 : i32
    return %arg0, %c0_i32, %c0_i32_0 : i32, i32, i32
  }
  func.func @transform_1(%arg0: i32) -> (i32, i32) {
    %c0_i32 = arith.constant 0 : i32
    %c0_i32_0 = arith.constant 0 : i32
    %c0_i32_1 = arith.constant 0 : i32
    return %c0_i32, %c0_i32_0 : i32, i32
  }
  func.func @transform_2(%arg0: i32) -> (i32, i32) {
    %c0_i32 = arith.constant 0 : i32
    %c0_i32_0 = arith.constant 0 : i32
    %c0_i32_1 = arith.constant 0 : i32
    return %c0_i32, %c0_i32_0 : i32, i32
  }
  func.func @transform_3(%arg0: i32) -> (i32, i32) {
    %c0_i32 = arith.constant 0 : i32
    %c0_i32_0 = arith.constant 0 : i32
    %c0_i32_1 = arith.constant 0 : i32
    return %c0_i32, %c0_i32_0 : i32, i32
  }
  func.func @transform_4(%arg0: i32) -> (i32, i32, i32) {
    %c0_i32 = arith.constant 0 : i32
    %c0_i32_0 = arith.constant 0 : i32
    %c0_i32_1 = arith.constant 0 : i32
    %c0_i32_2 = arith.constant 0 : i32
    return %c0_i32, %c0_i32_0, %c0_i32_1 : i32, i32, i32
  }
  func.func @transform_5(%arg0: i32) -> (i32, i32, i32) {
    %c0_i32 = arith.constant 0 : i32
    %c0_i32_0 = arith.constant 0 : i32
    %c0_i32_1 = arith.constant 0 : i32
    %c0_i32_2 = arith.constant 0 : i32
    return %c0_i32, %c0_i32_0, %c0_i32_1 : i32, i32, i32
  }
  func.func @transform_6(%arg0: i32) -> (i32, i32, i32) {
    %c0_i32 = arith.constant 0 : i32
    %c0_i32_0 = arith.constant 0 : i32
    %c0_i32_1 = arith.constant 0 : i32
    %c0_i32_2 = arith.constant 0 : i32
    return %c0_i32, %c0_i32_0, %c0_i32_1 : i32, i32, i32
  }
  func.func @transform_7(%arg0: i32) -> (i32, i32, i32) {
    %c0_i32 = arith.constant 0 : i32
    %c0_i32_0 = arith.constant 0 : i32
    %c0_i32_1 = arith.constant 0 : i32
    %c0_i32_2 = arith.constant 0 : i32
    return %c0_i32, %c0_i32_0, %c0_i32_1 : i32, i32, i32
  }
  func.func @transform_8(%arg0: i32) -> (i32, i32) {
    %c0_i32 = arith.constant 0 : i32
    %c0_i32_0 = arith.constant 0 : i32
    %c0_i32_1 = arith.constant 0 : i32
    return %c0_i32, %c0_i32_0 : i32, i32
  }
  func.func @transform_9(%arg0: i32) -> (i32, i32) {
    %c0_i32 = arith.constant 0 : i32
    %c0_i32_0 = arith.constant 0 : i32
    %c0_i32_1 = arith.constant 0 : i32
    return %c0_i32, %c0_i32_0 : i32, i32
  }
  func.func @transform_10(%arg0: i32) -> (i32, i32) {
    %c0_i32 = arith.constant 0 : i32
    %c0_i32_0 = arith.constant 0 : i32
    %c0_i32_1 = arith.constant 0 : i32
    return %c0_i32, %c0_i32_0 : i32, i32
  }
  func.func @transform_11(%arg0: i32) -> (i32, i32) {
    %c0_i32 = arith.constant 0 : i32
    %c0_i32_0 = arith.constant 0 : i32
    %c0_i32_1 = arith.constant 0 : i32
    return %c0_i32, %c0_i32_0 : i32, i32
  }
  func.func @transform_12(%arg0: i32) -> (i32, i32, i32) {
    %c0_i32 = arith.constant 0 : i32
    %c0_i32_0 = arith.constant 0 : i32
    %c0_i32_1 = arith.constant 0 : i32
    %c0_i32_2 = arith.constant 0 : i32
    return %c0_i32, %c0_i32_0, %c0_i32_1 : i32, i32, i32
  }
  func.func @transform_13(%arg0: i32) -> (i32, i32) {
    %c0_i32 = arith.constant 0 : i32
    %c0_i32_0 = arith.constant 0 : i32
    %c0_i32_1 = arith.constant 0 : i32
    return %c0_i32, %c0_i32_0 : i32, i32
  }
  func.func @transform_14(%arg0: i32) -> (i32, i32) {
    %c0_i32 = arith.constant 0 : i32
    %c0_i32_0 = arith.constant 0 : i32
    return %arg0, %c0_i32 : i32, i32
  }
}

</mosaic_0001>

<bundles_post_ra>
// kernel: alice_net2_forward.1
= control target key start
LH: loop header
LB: loop body
LE: loop exit
PB: predicated region body
PF: predicated region fallthrough
CT: control target
= control target key end

     0   :  { %19 = vsyncpa [#allocation3], 0  ;;  %s12269_s0 = inlined_call_operand.vmem [shape: bf16[8,32,96], index: 0, kind: input, shape index: {}]   ;;  %s12270_s1 = inlined_call_operand.vmem [shape: bf16[80,32], index: 1, kind: input, shape index: {}]   ;;  %s12271_s2 = inlined_call_operand.vmem [shape: bf16[40,16], index: 2, kind: input, shape index: {}]   ;;  %s12272_s3 = inlined_call_operand.vmem [shape: bf16[40,8], index: 3, kind: input, shape index: {}]   ;;  %s12273_s4 = inlined_call_operand.hbm [shape: bf16[5,96,192], index: 4, kind: input, shape index: {}]   ;;  %s12274_s5 = inlined_call_operand.hbm [shape: bf16[5,192,96], index: 5, kind: input, shape index: {}]   ;;  %s12275_s6 = inlined_call_operand.hbm [shape: bf16[5,96,96], index: 6, kind: input, shape index: {}]   ;;  %s12276_s7 = inlined_call_operand.hbm [shape: bf16[5,96,96], index: 7, kind: input, shape index: {}]   ;;  %s12277_s8 = inlined_call_operand.vmem [shape: f32[1,192], index: 8, kind: input, shape index: {}]   ;;  %s12278_s9 = inlined_call_operand.vmem [shape: f32[1,96], index: 9, kind: input, shape index: {}]   ;;  %s12279_s10 = inlined_call_operand.vmem [shape: f32[1,96], index: 10, kind: input, shape index: {}]   ;;  %s12280_s11 = inlined_call_operand.vmem [shape: f32[1,96], index: 11, kind: input, shape index: {}]   ;;  %s12281_s12 = inlined_call_operand.vmem [shape: bf16[8,96,256], index: 12, kind: input, shape index: {}]   ;;  %s12282_s13 = inlined_call_operand.vmem [shape: f32[1,256], index: 13, kind: input, shape index: {}]   ;;  %s12283_s14 = inlined_call_operand.vmem [shape: f32[8,256], index: 14, kind: output, shape index: {}]  }
   0x1   :  { %20 = vsyncpa [#allocation5], 0 }
   0x2   :  { %21 = vsyncpa [#allocation8], 0  ;;  %s9954_s29 = smov [#allocation4]  }
   0x3   :  { %s47_s30 = sshll.u32 %s9954_s29, 4  ;;  %s48_s30 = int_to_ptr.vmem [resolvable:$true] %s47_s30 }
   0x4   :  { %s9876_s15 = scalar_lea.vmem %s48_s30, 7680  ;;  %p9881_p1 = scmp.lt.s32.totalorder %s48_s30, %s48_s30 }
   0x5   :  { %p9877_p0 = scmp.ne.s32.totalorder %s48_s30, %s9876_s15  ;;  %p9882_p2 = scmp.lt.s32.totalorder %s9876_s15, %s9876_s15 }
   0x7   :  { %p9883_p3 = por %p9882_p2, %p9881_p1 }
   0x9   :  { %p9884_p4 = pnand %p9883_p3, %p9877_p0 }
   0xb   :  { %9887 = shalt.err (!%p9884_p4)
}
   0xc   :  { %s9955_s16 = smov 64   ;;  %s9956_s17 = smov 4  }
   0xd   :  { %53 = dma.hbm_to_vmem [thread:$0]  %s12274_s5, 7680, %s48_s30, [#allocation5], %s9955_s16, %s9955_s16, %s9956_s17  }
   0xe   :  { %s9957_s20 = smov [#allocation2]  }
   0xf   :  { %s35_s21 = sshll.u32 %s9957_s20, 4  ;;  %s36_s21 = int_to_ptr.vmem [resolvable:$true] %s35_s21 }
  0x10   :  { %s9896_s22 = scalar_lea.vmem %s36_s21, 7680  ;;  %p9901_p6 = scmp.lt.s32.totalorder %s36_s21, %s36_s21 }
  0x11   :  { %p9897_p5 = scmp.ne.s32.totalorder %s36_s21, %s9896_s22  ;;  %p9902_p7 = scmp.lt.s32.totalorder %s9896_s22, %s9896_s22 }
  0x13   :  { %p9903_p8 = por %p9902_p7, %p9901_p6 }
  0x15   :  { %p9904_p9 = pnand %p9903_p8, %p9897_p5 }
  0x17   :  { %9907 = shalt.err (!%p9904_p9)
}
  0x18   :  { %s9958_s23 = smov 128   ;;  %s9959_s24 = smov 8  }
  0x19   :  { %41 = dma.hbm_to_vmem [thread:$0]  %s12273_s4, 7680, %s36_s21, [#allocation3], %s9958_s23, %s9958_s23, %s9959_s24  }
  0x1a   :  { %s9960_s27 = smov [#allocation6]   ;;  %s9961_s29 = smov [#allocation7]  }
  0x1b   :  { %s59_s28 = sshll.u32 %s9960_s27, 4  ;;  %s71_s5 = sshll.u32 %s9961_s29, 4  ;;  %s60_s28 = int_to_ptr.vmem [resolvable:$true] %s59_s28  ;;  %s72_s5 = int_to_ptr.vmem [resolvable:$true] %s71_s5 }
  0x1c   :  { %s9916_s30 = scalar_lea.vmem %s60_s28, 3840  ;;  %p9921_p11 = scmp.lt.s32.totalorder %s60_s28, %s60_s28 }
  0x1d   :  { %p9917_p10 = scmp.ne.s32.totalorder %s60_s28, %s9916_s30  ;;  %p9922_p12 = scmp.lt.s32.totalorder %s9916_s30, %s9916_s30 }
  0x1f   :  { %p9923_p13 = por %p9922_p12, %p9921_p11 }
  0x21   :  { %p9924_p0 = pnand %p9923_p13, %p9917_p10 }
  0x23   :  { %9927 = shalt.err (!%p9924_p0)
}
  0x24   :  { %65 = dma.hbm_to_vmem [thread:$0]  %s12275_s6, 3840, %s60_s28, [#allocation5], %s9955_s16, %s9955_s16, %s9956_s17  }
  0x25   :  { %s9936_s4 = scalar_lea.vmem %s72_s5, 3840  ;;  %p9941_p2 = scmp.lt.s32.totalorder %s72_s5, %s72_s5 }
  0x26   :  { %p9937_p1 = scmp.ne.s32.totalorder %s72_s5, %s9936_s4  ;;  %p9942_p3 = scmp.lt.s32.totalorder %s9936_s4, %s9936_s4 }
  0x28   :  { %p9943_p4 = por %p9942_p3, %p9941_p2 }
  0x2a   :  { %p9944_p5 = pnand %p9943_p4, %p9937_p1 }
  0x2c   :  { %9947 = shalt.err (!%p9944_p5)
}
  0x2d   :  { %77 = dma.hbm_to_vmem [thread:$0]  %s12276_s7, 3840, %s72_s5, [#allocation8], %s9955_s16, %s9955_s16, %s9956_s17  }
  0x2e   :  { %9948 = dma.done.wait [#allocation3], 7680  }
  0x2f   :  { %9949 = vsyncadd [#allocation3], 4294959616 }
  0x30   :  { %9950 = dma.done.wait [#allocation5], 11520  }
  0x31   :  { %9951 = vsyncadd [#allocation5], 4294955776 }
  0x32   :  { %9952 = dma.done.wait [#allocation8], 3840  }
  0x33   :  { %9953 = vsyncadd [#allocation8], 4294963456  ;;  %v12284_v0 = vmov 0.0   ;;  %vm9963_vm0 = vmmov 0   ;;  %v9370_v1 = vld [vmem:[%s12269_s0 + $0x8] sm:$0xff]   ;;  %v9371_v2 = vld [vmem:[%s12269_s0] sm:$0xff]  }
  0x34   :  { %8739 = vmatprep.subr.bf16.mxu0 %v12284_v0  ;;  %9355 = vmatprep.subr.bf16.mxu1 %v12284_v0  ;;  %v10078_v3 = vld [vmem:[%s12270_s1] sm:$0xff]   ;;  %vm192_vm1 = vcmask 261120   ;;  %v9374_v5 = vld [vmem:[%s12269_s0 + $0x18] sm:$0xff]   ;;  %v9379_v6 = vld [vmem:[%s12269_s0 + $0x28] sm:$0xff]   ;;  %v12286_v47 = vmov 0   ;;  %vm1001_vm2 = vcmask 785408  }
  0x35   :  { %8743 = vmatprep.mubr.msk.bf16.mxu0 %vm9963_vm0, %v12284_v0  ;;  %8759 = vmatprep.mubr.msk.bf16.mxu1 %vm9963_vm0, %v12284_v0  ;;  %v10083_v4 = vld [vmem:[%s12270_s1 + $0x20] sm:$0xff]   ;;  %v9375_v7 = vld [vmem:[%s12269_s0 + $0x10] sm:$0xff]   ;;  %v10111_v9 = vld [vmem:[%s12270_s1 + $0x8] sm:$0xff]   ;;  %vm2263_vm3 = vcmask 130048   ;;  %vm2990_vm4 = vcmask 523264   ;;  %vm3985_vm5 = vcmask 1043456  }
  0x36   :  { %8740 = vmatpush3.bf16.msra.mxu0 %v9370_v1  ;;  %9357 = vmatpush3.bf16.msra.mxu1 %v9370_v1  ;;  %v9380_v8 = vld [vmem:[%s12269_s0 + $0x20] sm:$0xff]   ;;  %v9381_v10 = vld [vmem:[%s12269_s0 + $0x38] sm:$0xff]   ;;  %v9382_v11 = vld [vmem:[%s12269_s0 + $0x30] sm:$0xff]   ;;  %vm3975_vm6 = vcmask 64512   ;;  %vm6616_vm7 = vcmask 1041409   ;;  %vm6619_vm8 = vcmask 1042434  }
  0x37   :  { %8741 = vmatprep.subr.bf16.mxu0 %v12284_v0  ;;  %9356 = vmatprep.subr.bf16.mxu1 %v12284_v0  ;;  %v10133_v12 = vld [vmem:[%s12270_s1 + $0x10] sm:$0xff]   ;;  %v10148_v13 = vld [vmem:[%s12270_s1 + $0x18] sm:$0xff]   ;;  %v9383_v14 = vld [vmem:[%s12269_s0 + $0x48] sm:$0xff]   ;;  %vm6622_vm9 = vcmask 1043459   ;;  %vm6625_vm10 = vcmask 1044484   ;;  %vm6628_vm11 = vcmask 1045509  }
  0x38   :  { %v9384_v15 = vld [vmem:[%s12269_s0 + $0x40] sm:$0xff]   ;;  %v9385_v16 = vld [vmem:[%s12269_s0 + $0x58] sm:$0xff]   ;;  %v9386_v17 = vld [vmem:[%s12269_s0 + $0x50] sm:$0xff]   ;;  %vm6631_vm12 = vcmask 1046534   ;;  %vm6634_vm13 = vcmask 1047559  }
  0x39   :  { %v9387_v18 = vld [vmem:[%s12269_s0 + $0x68] sm:$0xff]   ;;  %v9388_v19 = vld [vmem:[%s12269_s0 + $0x60] sm:$0xff]   ;;  %v9399_v20 = vld [vmem:[#allocation2 + $0xb4] ss:$8 sps:$4 sm:$0xff]  }
  0x3a   :  { %8742 = vmatpush3.bf16.msra.mxu0 %v9371_v2  ;;  %9358 = vmatpush3.bf16.msra.mxu1 %v9371_v2  ;;  %v9389_v21 = vld [vmem:[%s12269_s0 + $0x78] sm:$0xff]   ;;  %v9390_v22 = vld [vmem:[%s12269_s0 + $0x70] sm:$0xff]   ;;  %v9405_v25 = vld [vmem:[#allocation2 + $0xa4] ss:$8 sps:$4 sm:$0xff]  }
  0x3b   :  { %8763 = vmatprep.subr.bf16.mxu1 %v12284_v0  ;;  %8787 = vmatprep.subr.bf16.mxu0 %v12284_v0  ;;  %v9393_v23 = vld [vmem:[#allocation2 + $0x54] ss:$8 sps:$4 sm:$0xff]   ;;  %v9397_v24 = vld [vmem:[#allocation2 + $0xb0] ss:$8 sps:$4 sm:$0xff]   ;;  %v9403_v26 = vld [vmem:[#allocation2 + $0xa0] ss:$8 sps:$4 sm:$0xff]  }
  0x3c   :  { %v9411_v27 = vld [vmem:[#allocation2 + $0x94] ss:$8 sps:$4 sm:$0xff]   ;;  %v9409_v28 = vld [vmem:[#allocation2 + $0x90] ss:$8 sps:$4 sm:$0xff]   ;;  %v9417_v29 = vld [vmem:[#allocation2 + $0x84] ss:$8 sps:$4 sm:$0xff]  }
  0x3d   :  { %8744 = vmatmul.mubr.msk.bf16.vlgmr.msra.gmra.mxu0 %vm192_vm1, %v10078_v3  ;;  %8760 = vmatmul.mubr.msk.bf16.vlgmr.msra.gmra.mxu1 %vm192_vm1, %v10083_v4  ;;  %v9415_v30 = vld [vmem:[#allocation2 + $0x80] ss:$8 sps:$4 sm:$0xff]   ;;  %v9423_v31 = vld [vmem:[#allocation2 + $0x74] ss:$8 sps:$4 sm:$0xff]   ;;  %v9391_v32 = vld [vmem:[#allocation2 + $0x50] ss:$8 sps:$4 sm:$0xff]  }
  0x3e   :  { %8764 = vmatpush3.bf16.msra.mxu1 %v9374_v5  ;;  %8747 = vmatprep.mubr.msk.bf16.mxu0 %vm9963_vm0, %v12284_v0  ;;  %v9396_v33 = vld [vmem:[#allocation2 + $0x44] ss:$8 sps:$4 sm:$0xff]   ;;  %v9421_v34 = vld [vmem:[#allocation2 + $0x70] ss:$8 sps:$4 sm:$0xff]   ;;  %v9394_v36 = vld [vmem:[#allocation2 + $0x40] ss:$8 sps:$4 sm:$0xff]  }
  0x3f   :  { %8765 = vmatprep.subr.bf16.mxu1 %v12284_v0  ;;  %8767 = vmatprep.mubr.msk.bf16.mxu1 %vm9963_vm0, %v12284_v0  ;;  %v9426_v35 = vld [vmem:[#allocation2 + $0x64] ss:$8 sps:$4 sm:$0xff]   ;;  %v9402_v37 = vld [vmem:[#allocation2 + $0x34] ss:$8 sps:$4 sm:$0xff]   ;;  %v9424_v38 = vld [vmem:[#allocation2 + $0x60] ss:$8 sps:$4 sm:$0xff]  }
  0x40   :  { %8788 = vmatpush3.bf16.msra.mxu0 %v9379_v6  ;;  %v9400_v39 = vld [vmem:[#allocation2 + $0x30] ss:$8 sps:$4 sm:$0xff]   ;;  %v9408_v40 = vld [vmem:[#allocation2 + $0x24] ss:$8 sps:$4 sm:$0xff]   ;;  %v9406_v41 = vld [vmem:[#allocation2 + $0x20] ss:$8 sps:$4 sm:$0xff]  }
  0x41   :  { %8789 = vmatprep.subr.bf16.mxu0 %v12284_v0  ;;  %v9414_v42 = vld [vmem:[#allocation2 + $0x14] ss:$8 sps:$4 sm:$0xff]   ;;  %v9412_v43 = vld [vmem:[#allocation2 + $0x10] ss:$8 sps:$4 sm:$0xff]   ;;  %v9420_v44 = vld [vmem:[#allocation2 + $0x4] ss:$8 sps:$4 sm:$0xff]  }
  0x42   :  { %8766 = vmatpush3.bf16.msra.mxu1 %v9375_v7  ;;  %v9418_v45 = vld [vmem:[#allocation2] ss:$8 sps:$4 sm:$0xff]   ;;  %v9864_v48 = vld [vmem:[%s12270_s1 + $0x18] sm:$0xff]   ;;  %v9432_v60 = vld [vmem:[#allocation2 + $0x164] ss:$8 sps:$4 sm:$0xff]  }
  0x43   :  { %8811 = vmatprep.subr.bf16.mxu1 %v12284_v0  ;;  %v9863_v46 = vld [vmem:[%s12270_s1 + $0x20] sm:$0xff]   ;;  %v9429_v49 = vld [vmem:[#allocation2 + $0x174] ss:$8 sps:$4 sm:$0xff]   ;;  %v9427_v57 = vld [vmem:[#allocation2 + $0x170] ss:$8 sps:$4 sm:$0xff]  }
  0x44   :  { %8790 = vmatpush3.bf16.msra.mxu0 %v9380_v8  ;;  %v9435_v50 = vld [vmem:[#allocation2 + $0x114] ss:$8 sps:$4 sm:$0xff]   ;;  %v9430_v2 = vld [vmem:[#allocation2 + $0x160] ss:$8 sps:$4 sm:$0xff]  }
  0x45   :  { %8748 = vmatmul.mubr.msk.bf16.gmra.mxu0 %vm192_vm1, %v10111_v9  ;;  %8768 = vmatmul.mubr.msk.bf16.vlgmr.msra.gmra.mxu1 %vm192_vm1, %v10078_v3 }
  0x46   :  { %8751 = vmatprep.mubr.msk.bf16.mxu0 %vm9963_vm0, %v12284_v0  ;;  %8771 = vmatprep.mubr.msk.bf16.mxu1 %vm9963_vm0, %v12284_v0 }
  0x47   :  { %8812 = vmatpush3.bf16.msra.mxu1 %v9381_v10  ;;  %8835 = vmatprep.subr.bf16.mxu0 %v12284_v0  ;;  %v9433_v10 = vld [vmem:[#allocation2 + $0x110] ss:$8 sps:$4 sm:$0xff]  }
  0x48   :  { %8813 = vmatprep.subr.bf16.mxu1 %v12284_v0 }
  0x4b   :  { %8814 = vmatpush3.bf16.msra.mxu1 %v9382_v11  ;;  %v9436_v11 = vld [vmem:[#allocation2 + $0x150] ss:$8 sps:$4 sm:$0xff]  }
  0x4c   :  { %8859 = vmatprep.subr.bf16.mxu1 %v12284_v0 }
  0x4d   :  { %8752 = vmatmul.mubr.msk.bf16.gmra.mxu0 %vm192_vm1, %v10133_v12  ;;  %8772 = vmatmul.mubr.msk.bf16.gmra.mxu1 %vm192_vm1, %v10111_v9 }
  0x4e   :  { %8755 = vmatprep.mubr.msk.bf16.mxu0 %vm9963_vm0, %v12284_v0  ;;  %8775 = vmatprep.mubr.msk.bf16.mxu1 %vm9963_vm0, %v12284_v0 }
  0x55   :  { %8756 = vmatmul.mubr.msk.bf16.gmra.mxu0 %vm192_vm1, %v10148_v13  ;;  %8776 = vmatmul.mubr.msk.bf16.gmra.mxu1 %vm192_vm1, %v10133_v12 }
  0x56   :  { %8779 = vmatprep.mubr.msk.bf16.mxu1 %vm9963_vm0, %v12284_v0  ;;  %8791 = vmatprep.mubr.msk.bf16.mxu0 %vm9963_vm0, %v12284_v0 }
  0x5d   :  { %8780 = vmatmul.mubr.msk.bf16.gmra.mxu1 %vm192_vm1, %v10148_v13  ;;  %8792 = vmatmul.mubr.msk.bf16.vlgmr.msra.gmra.mxu0 %vm192_vm1, %v10078_v3 }
  0x5e   :  { %8783 = vmatprep.mubr.msk.bf16.mxu1 %vm9963_vm0, %v12284_v0  ;;  %8795 = vmatprep.mubr.msk.bf16.mxu0 %vm9963_vm0, %v12284_v0 }
  0x5f   :  { %8836 = vmatpush3.bf16.msra.mxu0 %v9383_v14  ;;  %v9441_v14 = vld [vmem:[#allocation2 + $0x104] ss:$8 sps:$4 sm:$0xff]  }
  0x60   :  { %8837 = vmatprep.subr.bf16.mxu0 %v12284_v0 }
  0x63   :  { %8838 = vmatpush3.bf16.msra.mxu0 %v9384_v15  ;;  %v9444_v15 = vld [vmem:[#allocation2 + $0x144] ss:$8 sps:$4 sm:$0xff]  }
  0x64   :  { %8883 = vmatprep.subr.bf16.mxu0 %v12284_v0 }
  0x65   :  { %8784 = vmatmul.mubr.msk.bf16.gmra.mxu1 %vm192_vm1, %v10083_v4  ;;  %8796 = vmatmul.mubr.msk.bf16.gmra.mxu0 %vm192_vm1, %v10111_v9 }
  0x66   :  { %8799 = vmatprep.mubr.msk.bf16.mxu0 %vm9963_vm0, %v12284_v0  ;;  %8815 = vmatprep.mubr.msk.bf16.mxu1 %vm9963_vm0, %v12284_v0 }
  0x6d   :  { %8800 = vmatmul.mubr.msk.bf16.gmra.mxu0 %vm192_vm1, %v10133_v12  ;;  %8816 = vmatmul.mubr.msk.bf16.vlgmr.msra.gmra.mxu1 %vm192_vm1, %v10078_v3 }
  0x6e   :  { %8803 = vmatprep.mubr.msk.bf16.mxu0 %vm9963_vm0, %v12284_v0  ;;  %8819 = vmatprep.mubr.msk.bf16.mxu1 %vm9963_vm0, %v12284_v0 }
  0x6f   :  { %8860 = vmatpush3.bf16.msra.mxu1 %v9385_v16 }
  0x70   :  { %8861 = vmatprep.subr.bf16.mxu1 %v12284_v0 }
  0x73   :  { %8862 = vmatpush3.bf16.msra.mxu1 %v9386_v17 }
  0x74   :  { %8907 = vmatprep.subr.bf16.mxu1 %v12284_v0 }
  0x75   :  { %8804 = vmatmul.mubr.msk.bf16.gmra.mxu0 %vm192_vm1, %v10148_v13  ;;  %8820 = vmatmul.mubr.msk.bf16.gmra.mxu1 %vm192_vm1, %v10111_v9 }
  0x76   :  { %8807 = vmatprep.mubr.msk.bf16.mxu0 %vm9963_vm0, %v12284_v0  ;;  %8823 = vmatprep.mubr.msk.bf16.mxu1 %vm9963_vm0, %v12284_v0 }
  0x7d   :  { %8808 = vmatmul.mubr.msk.bf16.gmra.mxu0 %vm192_vm1, %v10083_v4  ;;  %8824 = vmatmul.mubr.msk.bf16.gmra.mxu1 %vm192_vm1, %v10133_v12 }
  0x7e   :  { %8827 = vmatprep.mubr.msk.bf16.mxu1 %vm9963_vm0, %v12284_v0  ;;  %8839 = vmatprep.mubr.msk.bf16.mxu0 %vm9963_vm0, %v12284_v0 }
  0x85   :  { %8828 = vmatmul.mubr.msk.bf16.gmra.mxu1 %vm192_vm1, %v10148_v13  ;;  %8840 = vmatmul.mubr.msk.bf16.vlgmr.msra.gmra.mxu0 %vm192_vm1, %v10078_v3 }
  0x86   :  { %8831 = vmatprep.mubr.msk.bf16.mxu1 %vm9963_vm0, %v12284_v0  ;;  %8843 = vmatprep.mubr.msk.bf16.mxu0 %vm9963_vm0, %v12284_v0 }
  0x87   :  { %8884 = vmatpush3.bf16.msra.mxu0 %v9387_v18  ;;  %v9439_v18 = vld [vmem:[#allocation2 + $0x100] ss:$8 sps:$4 sm:$0xff]  }
  0x88   :  { %8885 = vmatprep.subr.bf16.mxu0 %v12284_v0 }
  0x8b   :  { %8886 = vmatpush3.bf16.msra.mxu0 %v9388_v19  ;;  %v9442_v19 = vld [vmem:[#allocation2 + $0x140] ss:$8 sps:$4 sm:$0xff]  }
  0x8c   :  { %1030 = vmatprep.subr.bf16.mxu0 %v9399_v20 }
  0x8d   :  { %8832 = vmatmul.mubr.msk.bf16.gmra.mxu1 %vm192_vm1, %v10083_v4  ;;  %8844 = vmatmul.mubr.msk.bf16.gmra.mxu0 %vm192_vm1, %v10111_v9 }
  0x8e   :  { %8847 = vmatprep.mubr.msk.bf16.mxu0 %vm9963_vm0, %v12284_v0  ;;  %8863 = vmatprep.mubr.msk.bf16.mxu1 %vm9963_vm0, %v12284_v0 }
  0x95   :  { %8848 = vmatmul.mubr.msk.bf16.gmra.mxu0 %vm192_vm1, %v10133_v12  ;;  %8864 = vmatmul.mubr.msk.bf16.vlgmr.msra.gmra.mxu1 %vm192_vm1, %v10078_v3 }
  0x96   :  { %8851 = vmatprep.mubr.msk.bf16.mxu0 %vm9963_vm0, %v12284_v0  ;;  %8867 = vmatprep.mubr.msk.bf16.mxu1 %vm9963_vm0, %v12284_v0 }
  0x97   :  { %8908 = vmatpush3.bf16.msra.mxu1 %v9389_v21 }
  0x98   :  { %8909 = vmatprep.subr.bf16.mxu1 %v12284_v0 }
  0x9b   :  { %8910 = vmatpush3.bf16.msra.mxu1 %v9390_v22  ;;  %v9447_v22 = vld [vmem:[#allocation2 + $0xf4] ss:$8 sps:$4 sm:$0xff]  }
  0x9c   :  { %1227 = vmatprep.subr.bf16.mxu1 %v9393_v23  ;;  %v9450_v23 = vld [vmem:[#allocation2 + $0x134] ss:$8 sps:$4 sm:$0xff]  }
  0x9d   :  { %8852 = vmatmul.mubr.msk.bf16.gmra.mxu0 %vm192_vm1, %v10148_v13  ;;  %8868 = vmatmul.mubr.msk.bf16.gmra.mxu1 %vm192_vm1, %v10111_v9 }
  0x9e   :  { %8855 = vmatprep.mubr.msk.bf16.mxu0 %vm9963_vm0, %v12284_v0  ;;  %8871 = vmatprep.mubr.msk.bf16.mxu1 %vm9963_vm0, %v12284_v0 }
  0xa5   :  { %8856 = vmatmul.mubr.msk.bf16.gmra.mxu0 %vm192_vm1, %v10083_v4  ;;  %8872 = vmatmul.mubr.msk.bf16.gmra.mxu1 %vm192_vm1, %v10133_v12 }
  0xa6   :  { %8875 = vmatprep.mubr.msk.bf16.mxu1 %vm9963_vm0, %v12284_v0  ;;  %8887 = vmatprep.mubr.msk.bf16.mxu0 %vm9963_vm0, %v12284_v0 }
  0xad   :  { %8876 = vmatmul.mubr.msk.bf16.gmra.mxu1 %vm192_vm1, %v10148_v13  ;;  %8888 = vmatmul.mubr.msk.bf16.vlgmr.msra.gmra.mxu0 %vm192_vm1, %v10078_v3 }
  0xae   :  { %8879 = vmatprep.mubr.msk.bf16.mxu1 %vm9963_vm0, %v12284_v0  ;;  %8891 = vmatprep.mubr.msk.bf16.mxu0 %vm9963_vm0, %v12284_v0 }
  0xaf   :  { %1031 = vmatpush1.bf16.msra.mxu0 %v9397_v24 }
  0xb0   :  { %1032 = vmatprep.subr.bf16.mxu0 %v9405_v25 }
  0xb3   :  { %1033 = vmatpush1.bf16.msra.mxu0 %v9403_v26 }
  0xb4   :  { %1034 = vmatprep.subr.bf16.mxu0 %v9411_v27 }
  0xb5   :  { %8880 = vmatmul.mubr.msk.bf16.gmra.mxu1 %vm192_vm1, %v10083_v4  ;;  %8892 = vmatmul.mubr.msk.bf16.gmra.mxu0 %vm192_vm1, %v10111_v9 }
  0xb6   :  { %8911 = vmatprep.mubr.msk.bf16.mxu1 %vm9963_vm0, %v12284_v0  ;;  %8895 = vmatprep.mubr.msk.bf16.mxu0 %vm9963_vm0, %v12284_v0 }
  0xb7   :  { %1035 = vmatpush1.bf16.msra.mxu0 %v9409_v28  ;;  %v9445_v28 = vld [vmem:[#allocation2 + $0xf0] ss:$8 sps:$4 sm:$0xff]  }
  0xb8   :  { %1036 = vmatprep.subr.bf16.mxu0 %v9417_v29  ;;  %v9448_v29 = vld [vmem:[#allocation2 + $0x130] ss:$8 sps:$4 sm:$0xff]  }
  0xbb   :  { %1037 = vmatpush1.bf16.msra.mxu0 %v9415_v30 }
  0xbc   :  { %1038 = vmatprep.subr.bf16.mxu0 %v9423_v31 }
  0xbd   :  { %8912 = vmatmul.mubr.msk.bf16.vlgmr.msra.gmra.mxu1 %vm192_vm1, %v10078_v3  ;;  %8896 = vmatmul.mubr.msk.bf16.gmra.mxu0 %vm192_vm1, %v10133_v12  ;;  %v9438_v3 = vld [vmem:[#allocation2 + $0x154] ss:$8 sps:$4 sm:$0xff]  }
  0xbe   :  { %8915 = vmatprep.mubr.msk.bf16.mxu1 %vm9963_vm0, %v12284_v0  ;;  %1228 = vmatpush1.bf16.msra.mxu1 %v9391_v32  ;;  %v9453_v32 = vld [vmem:[#allocation2 + $0xe4] ss:$8 sps:$4 sm:$0xff]  }
  0xbf   :  { %1229 = vmatprep.subr.bf16.mxu1 %v9396_v33  ;;  %8899 = vmatprep.mubr.msk.bf16.mxu0 %vm9963_vm0, %v12284_v0  ;;  %v9456_v33 = vld [vmem:[#allocation2 + $0x124] ss:$8 sps:$4 sm:$0xff]  }
  0xc0   :  { %1039 = vmatpush1.bf16.msra.mxu0 %v9421_v34 }
  0xc1   :  { %1040 = vmatprep.subr.bf16.mxu0 %v9426_v35 }
  0xc2   :  { %1230 = vmatpush1.bf16.msra.mxu1 %v9394_v36  ;;  %v9451_v36 = vld [vmem:[#allocation2 + $0xe0] ss:$8 sps:$4 sm:$0xff]  }
  0xc3   :  { %1231 = vmatprep.subr.bf16.mxu1 %v9402_v37  ;;  %v9454_v37 = vld [vmem:[#allocation2 + $0x120] ss:$8 sps:$4 sm:$0xff]  }
  0xc4   :  { %1041 = vmatpush1.bf16.msra.mxu0 %v9424_v38 }
  0xc5   :  { %8916 = vmatmul.mubr.msk.bf16.gmra.mxu1 %vm192_vm1, %v10111_v9  ;;  %8900 = vmatmul.mubr.msk.bf16.gmra.mxu0 %vm192_vm1, %v10148_v13 }
  0xc6   :  { %8919 = vmatprep.mubr.msk.bf16.mxu1 %vm9963_vm0, %v12284_v0  ;;  %1232 = vmatpush1.bf16.msra.mxu1 %v9400_v39 }
  0xc7   :  { %1233 = vmatprep.subr.bf16.mxu1 %v9408_v40  ;;  %8903 = vmatprep.mubr.msk.bf16.mxu0 %vm9963_vm0, %v12284_v0  ;;  %v9459_v40 = vld [vmem:[#allocation2 + $0xd4] ss:$8 sps:$4 sm:$0xff]  }
  0xc8   :  { %1437 = vmatprep.subr.bf16.mxu0 %v9435_v50 }
  0xca   :  { %1234 = vmatpush1.bf16.msra.mxu1 %v9406_v41 }
  0xcb   :  { %1235 = vmatprep.subr.bf16.mxu1 %v9414_v42 }
  0xcd   :  { %8920 = vmatmul.mubr.msk.bf16.gmra.mxu1 %vm192_vm1, %v10133_v12  ;;  %8904 = vmatmul.mubr.msk.bf16.gmra.mxu0 %vm192_vm1, %v9863_v46 }
  0xce   :  { %8923 = vmatprep.mubr.msk.bf16.mxu1 %vm9963_vm0, %v12284_v0  ;;  %1236 = vmatpush1.bf16.msra.mxu1 %v9412_v43 }
  0xcf   :  { %1237 = vmatprep.subr.bf16.mxu1 %v9420_v44  ;;  %1058 = vmatprep.mubr.bf16.mxu0 %v12286_v47 }
  0xd2   :  { %1238 = vmatpush1.bf16.msra.mxu1 %v9418_v45  ;;  %v9457_v45 = vld [vmem:[#allocation2 + $0xd0] ss:$8 sps:$4 sm:$0xff]  }
  0xd3   :  { %1679 = vmatprep.subr.bf16.mxu1 %v9429_v49  ;;  %v9462_v49 = vld [vmem:[#allocation2 + $0xc4] ss:$8 sps:$4 sm:$0xff]  }
  0xd5   :  { %8924 = vmatmul.mubr.msk.bf16.gmra.mxu1 %vm192_vm1, %v9864_v48 }
  0xd6   :  { %8927 = vmatprep.mubr.msk.bf16.mxu1 %vm9963_vm0, %v12284_v0 }
  0xdd   :  { %8928 = vmatmul.mubr.msk.bf16.gmra.mxu1 %vm192_vm1, %v9863_v46 }
  0xde   :  { %1255 = vmatprep.mubr.bf16.mxu1 %v12286_v47 }
  0xfd   :  { %v242_v51 = vpop.f32.mrf.mxu0  ;;  %v10317_v52 = vpop.f32.mrf.mxu1 }
  0xff   :  { %v8745_v53 = vpop.f32.mrf.mxu0  ;;  %v8761_v54 = vpop.f32.mrf.mxu1 }
 0x100   :  { %v9460_v53 = vld [vmem:[#allocation2 + $0xc0] ss:$8 sps:$4 sm:$0xff]  }
 0x101   :  { %v245_v55 = vpop.f32.mrf.mxu0  ;;  %v10319_v56 = vpop.f32.mrf.mxu1 }
 0x102   :  { %v876_v58 = vpack.c.bf16 %v245_v55, %v242_v51 }
 0x103   :  { %v8746_v61 = vpop.f32.mrf.mxu0  ;;  %v8762_v62 = vpop.f32.mrf.mxu1 }
 0x104   :  { %7794 = vmatmul.mubr.msk.bf16.vlgmr.msra.gmra.mxu1 %vm1001_vm2, %v876_v58 }
 0x105   :  { %v250_v63 = vpop.f32.mrf.mxu0  ;;  %v327_v1 = vpop.f32.mrf.mxu1  ;;  %1265 = vmatprep.mubr.bf16.mxu1 %v12286_v47  ;;  %1680 = vmatpush1.bf16.msra.mxu1 %v9427_v57 }
 0x106   :  { %1681 = vmatprep.subr.bf16.mxu1 %v9432_v60 }
 0x107   :  { %v8749_v4 = vpop.f32.mrf.mxu0  ;;  %v8769_v5 = vpop.f32.mrf.mxu1 }
 0x109   :  { %v253_v6 = vpop.f32.mrf.mxu0  ;;  %v330_v7 = vpop.f32.mrf.mxu1  ;;  %1682 = vmatpush1.bf16.msra.mxu1 %v9430_v2 }
 0x10a   :  { %v877_v8 = vpack.c.bf16 %v253_v6, %v250_v63  ;;  %v881_v9 = vpack.c.bf16 %v330_v7, %v327_v1  ;;  %1683 = vmatprep.subr.bf16.mxu1 %v9438_v3 }
 0x10b   :  { %v8750_v12 = vpop.f32.mrf.mxu0  ;;  %v8770_v13 = vpop.f32.mrf.mxu1 }
 0x10c   :  { %7774 = vmatmul.mubr.msk.bf16.vlgmr.msra.gmra.mxu0 %vm1001_vm2, %v877_v8  ;;  %7795 = vmatmul.mubr.msk.bf16.gmra.mxu1 %vm1001_vm2, %v881_v9 }
 0x10d   :  { %v10327_v16 = vpop.f32.mrf.mxu0  ;;  %v335_v17 = vpop.f32.mrf.mxu1  ;;  %1068 = vmatprep.mubr.bf16.mxu0 %v12286_v47  ;;  %1275 = vmatprep.mubr.bf16.mxu1 %v12286_v47 }
 0x10e   :  { %1438 = vmatpush1.bf16.msra.mxu0 %v9433_v10  ;;  %1684 = vmatpush1.bf16.msra.mxu1 %v9436_v11 }
 0x10f   :  { %v8753_v20 = vpop.f32.mrf.mxu0  ;;  %v8773_v21 = vpop.f32.mrf.mxu1  ;;  %1439 = vmatprep.subr.bf16.mxu0 %v9441_v14  ;;  %1685 = vmatprep.subr.bf16.mxu1 %v9444_v15 }
 0x111   :  { %v10331_v24 = vpop.f32.mrf.mxu0  ;;  %v338_v25 = vpop.f32.mrf.mxu1 }
 0x112   :  { %v878_v26 = vpack.c.bf16 %v10331_v24, %v10327_v16  ;;  %v882_v27 = vpack.c.bf16 %v338_v25, %v335_v17  ;;  %1440 = vmatpush1.bf16.msra.mxu0 %v9439_v18  ;;  %1686 = vmatpush1.bf16.msra.mxu1 %v9442_v19  ;;  %v9469_v16 = vld [vmem:[#allocation2 + $0x1b0] ss:$8 sps:$4 sm:$0xff]  }
 0x113   :  { %v8754_v30 = vpop.f32.mrf.mxu0  ;;  %v8774_v31 = vpop.f32.mrf.mxu1  ;;  %1441 = vmatprep.subr.bf16.mxu0 %v9447_v22  ;;  %1687 = vmatprep.subr.bf16.mxu1 %v9450_v23 }
 0x114   :  { %7775 = vmatmul.mubr.msk.bf16.gmra.mxu0 %vm1001_vm2, %v882_v27 }
 0x115   :  { %v10336_v34 = vpop.f32.mrf.mxu0  ;;  %v10338_v35 = vpop.f32.mrf.mxu1  ;;  %1078 = vmatprep.mubr.bf16.mxu0 %v12286_v47 }
 0x116   :  { %1442 = vmatpush1.bf16.msra.mxu0 %v9445_v28  ;;  %1688 = vmatpush1.bf16.msra.mxu1 %v9448_v29 }
 0x117   :  { %v8757_v38 = vpop.f32.mrf.mxu0  ;;  %v8777_v39 = vpop.f32.mrf.mxu1  ;;  %1443 = vmatprep.subr.bf16.mxu0 %v9453_v32  ;;  %1689 = vmatprep.subr.bf16.mxu1 %v9456_v33  ;;  %v9465_v32 = vld [vmem:[#allocation2 + $0x1d4] ss:$8 sps:$4 sm:$0xff]  }
 0x119   :  { %v10341_v41 = vpop.f32.mrf.mxu0  ;;  %v10343_v42 = vpop.f32.mrf.mxu1 }
 0x11a   :  { %v879_v43 = vpack.c.bf16 %v10341_v41, %v10336_v34  ;;  %v883_v44 = vpack.c.bf16 %v10343_v42, %v10338_v35  ;;  %1444 = vmatpush1.bf16.msra.mxu0 %v9451_v36  ;;  %1690 = vmatpush1.bf16.msra.mxu1 %v9454_v37  ;;  %v9475_v42 = vld [vmem:[#allocation2 + $0x190] ss:$8 sps:$4 sm:$0xff]  }
 0x11b   :  { %v8758_v46 = vpop.f32.mrf.mxu0  ;;  %v8778_v48 = vpop.f32.mrf.mxu1  ;;  %1445 = vmatprep.subr.bf16.mxu0 %v9459_v40 }
 0x11d   :  { %v10349_v50 = vpop.f32.mrf.mxu1  ;;  %v412_v51 = vpop.f32.mrf.mxu0 }
 0x11e   :  { %1446 = vmatpush1.bf16.msra.mxu0 %v9457_v45 }
 0x11f   :  { %v8781_v54 = vpop.f32.mrf.mxu1  ;;  %v8793_v55 = vpop.f32.mrf.mxu0  ;;  %1447 = vmatprep.subr.bf16.mxu0 %v9462_v49 }
 0x121   :  { %v10351_v57 = vpop.f32.mrf.mxu1  ;;  %v415_v58 = vpop.f32.mrf.mxu0 }
 0x122   :  { %v884_v60 = vpack.c.bf16 %v10351_v57, %v10349_v50  ;;  %v886_v61 = vpack.c.bf16 %v415_v58, %v412_v51  ;;  %1448 = vmatpush1.bf16.msra.mxu0 %v9460_v53  ;;  %v9472_v57 = vld [vmem:[#allocation2 + $0x1a0] ss:$8 sps:$4 sm:$0xff]  }
 0x123   :  { %v8782_v62 = vpop.f32.mrf.mxu1  ;;  %v8794_v63 = vpop.f32.mrf.mxu0  ;;  %1921 = vmatprep.subr.bf16.mxu0 %v9465_v32 }
 0x124   :  { %7796 = vmatmul.mubr.msk.bf16.gmra.mxu1 %vm1001_vm2, %v886_v61 }
 0x125   :  { %v10356_v1 = vpop.f32.mrf.mxu1  ;;  %v420_v2 = vpop.f32.mrf.mxu0  ;;  %1285 = vmatprep.mubr.bf16.mxu1 %v12286_v47 }
 0x127   :  { %v8785_v3 = vpop.f32.mrf.mxu1  ;;  %v8797_v4 = vpop.f32.mrf.mxu0 }
 0x129   :  { %v10359_v5 = vpop.f32.mrf.mxu1  ;;  %v423_v6 = vpop.f32.mrf.mxu0 }
 0x12a   :  { %v887_v8 = vpack.c.bf16 %v423_v6, %v420_v2 }
 0x12b   :  { %v8786_v9 = vpop.f32.mrf.mxu1  ;;  %v8798_v10 = vpop.f32.mrf.mxu0 }
 0x12c   :  { %7776 = vmatmul.mubr.msk.bf16.gmra.mxu0 %vm1001_vm2, %v887_v8 }
 0x12d   :  { %v10364_v11 = vpop.f32.mrf.mxu0  ;;  %v497_v12 = vpop.f32.mrf.mxu1  ;;  %1088 = vmatprep.mubr.bf16.mxu0 %v12286_v47 }
 0x12f   :  { %v8801_v13 = vpop.f32.mrf.mxu0  ;;  %v8817_v14 = vpop.f32.mrf.mxu1 }
 0x131   :  { %v10367_v15 = vpop.f32.mrf.mxu0  ;;  %v500_v17 = vpop.f32.mrf.mxu1 }
 0x132   :  { %v888_v18 = vpack.c.bf16 %v10367_v15, %v10364_v11  ;;  %v891_v19 = vpack.c.bf16 %v500_v17, %v497_v12 }
 0x133   :  { %v8802_v20 = vpop.f32.mrf.mxu0  ;;  %v8818_v21 = vpop.f32.mrf.mxu1 }
 0x134   :  { %7797 = vmatmul.mubr.msk.bf16.gmra.mxu1 %vm1001_vm2, %v891_v19 }
 0x135   :  { %v10372_v22 = vpop.f32.mrf.mxu0  ;;  %v505_v23 = vpop.f32.mrf.mxu1  ;;  %1295 = vmatprep.mubr.bf16.mxu1 %v12286_v47 }
 0x137   :  { %v8805_v25 = vpop.f32.mrf.mxu0  ;;  %v8821_v27 = vpop.f32.mrf.mxu1 }
 0x139   :  { %v10375_v28 = vpop.f32.mrf.mxu0  ;;  %v508_v29 = vpop.f32.mrf.mxu1 }
 0x13a   :  { %v889_v30 = vpack.c.bf16 %v10375_v28, %v10372_v22  ;;  %v892_v31 = vpack.c.bf16 %v508_v29, %v505_v23  ;;  %v9480_v22 = vld [vmem:[#allocation2 + $0x184] ss:$8 sps:$4 sm:$0xff]   ;;  %v9478_v28 = vld [vmem:[#allocation2 + $0x180] ss:$8 sps:$4 sm:$0xff]  }
 0x13b   :  { %v8806_v33 = vpop.f32.mrf.mxu0  ;;  %v8822_v36 = vpop.f32.mrf.mxu1 }
 0x13c   :  { %7777 = vmatmul.mubr.msk.bf16.gmra.mxu0 %vm1001_vm2, %v892_v31 }
 0x13d   :  { %v10380_v37 = vpop.f32.mrf.mxu0  ;;  %v10382_v38 = vpop.f32.mrf.mxu1  ;;  %1098 = vmatprep.mubr.bf16.mxu0 %v12286_v47 }
 0x13f   :  { %v8809_v39 = vpop.f32.mrf.mxu0  ;;  %v8825_v40 = vpop.f32.mrf.mxu1 }
 0x141   :  { %v10385_v45 = vpop.f32.mrf.mxu0  ;;  %v10387_v46 = vpop.f32.mrf.mxu1 }
 0x142   :  { %v893_v49 = vpack.c.bf16 %v10387_v46, %v10382_v38 }
 0x143   :  { %v8810_v51 = vpop.f32.mrf.mxu0  ;;  %v8826_v53 = vpop.f32.mrf.mxu1 }
 0x145   :  { %v10393_v54 = vpop.f32.mrf.mxu1  ;;  %v582_v55 = vpop.f32.mrf.mxu0 }
 0x147   :  { %v8829_v58 = vpop.f32.mrf.mxu1  ;;  %v8841_v61 = vpop.f32.mrf.mxu0 }
 0x149   :  { %v10395_v62 = vpop.f32.mrf.mxu1  ;;  %v585_v63 = vpop.f32.mrf.mxu0 }
 0x14a   :  { %v894_v2 = vpack.c.bf16 %v10395_v62, %v10393_v54  ;;  %v896_v3 = vpack.c.bf16 %v585_v63, %v582_v55 }
 0x14b   :  { %v8830_v4 = vpop.f32.mrf.mxu1  ;;  %v8842_v6 = vpop.f32.mrf.mxu0 }
 0x14c   :  { %7798 = vmatmul.mubr.msk.bf16.gmra.mxu1 %vm1001_vm2, %v896_v3 }
 0x14d   :  { %v10400_v8 = vpop.f32.mrf.mxu1  ;;  %v590_v9 = vpop.f32.mrf.mxu0  ;;  %1305 = vmatprep.mubr.bf16.mxu1 %v12286_v47 }
 0x14f   :  { %v8833_v10 = vpop.f32.mrf.mxu1  ;;  %v8845_v12 = vpop.f32.mrf.mxu0 }
 0x151   :  { %v10403_v13 = vpop.f32.mrf.mxu1  ;;  %v593_v14 = vpop.f32.mrf.mxu0 }
 0x152   :  { %v897_v19 = vpack.c.bf16 %v593_v14, %v590_v9 }
 0x153   :  { %v8834_v20 = vpop.f32.mrf.mxu1  ;;  %v8846_v21 = vpop.f32.mrf.mxu0 }
 0x154   :  { %7778 = vmatmul.mubr.msk.bf16.gmra.mxu0 %vm1001_vm2, %v897_v19 }
 0x155   :  { %v10408_v23 = vpop.f32.mrf.mxu0  ;;  %v667_v25 = vpop.f32.mrf.mxu1  ;;  %1108 = vmatprep.mubr.bf16.mxu0 %v12286_v47 }
 0x157   :  { %v8849_v27 = vpop.f32.mrf.mxu0  ;;  %v8865_v29 = vpop.f32.mrf.mxu1 }
 0x159   :  { %v10411_v31 = vpop.f32.mrf.mxu0  ;;  %v670_v32 = vpop.f32.mrf.mxu1 }
 0x15a   :  { %v898_v33 = vpack.c.bf16 %v10411_v31, %v10408_v23  ;;  %v901_v36 = vpack.c.bf16 %v670_v32, %v667_v25 }
 0x15b   :  { %v8850_v39 = vpop.f32.mrf.mxu0  ;;  %v8866_v40 = vpop.f32.mrf.mxu1 }
 0x15c   :  { %7799 = vmatmul.mubr.msk.bf16.gmra.mxu1 %vm1001_vm2, %v901_v36 }
 0x15d   :  { %v10416_v51 = vpop.f32.mrf.mxu0  ;;  %v675_v53 = vpop.f32.mrf.mxu1  ;;  %1315 = vmatprep.mubr.bf16.mxu1 %v12286_v47 }
 0x15f   :  { %v8853_v55 = vpop.f32.mrf.mxu0  ;;  %v8869_v58 = vpop.f32.mrf.mxu1 }
 0x161   :  { %v10419_v61 = vpop.f32.mrf.mxu0  ;;  %v678_v63 = vpop.f32.mrf.mxu1 }
 0x162   :  { %v899_v3 = vpack.c.bf16 %v10419_v61, %v10416_v51  ;;  %v902_v4 = vpack.c.bf16 %v678_v63, %v675_v53 }
 0x163   :  { %v8854_v6 = vpop.f32.mrf.mxu0  ;;  %v8870_v9 = vpop.f32.mrf.mxu1 }
 0x164   :  { %7779 = vmatmul.mubr.msk.bf16.gmra.mxu0 %vm1001_vm2, %v902_v4 }
 0x165   :  { %v10424_v10 = vpop.f32.mrf.mxu0  ;;  %v10426_v12 = vpop.f32.mrf.mxu1  ;;  %1118 = vmatprep.mubr.bf16.mxu0 %v12286_v47 }
 0x167   :  { %v8857_v14 = vpop.f32.mrf.mxu0  ;;  %v8873_v19 = vpop.f32.mrf.mxu1 }
 0x169   :  { %v10429_v20 = vpop.f32.mrf.mxu0  ;;  %v10431_v21 = vpop.f32.mrf.mxu1 }
 0x16a   :  { %v12289_v15 = vpack.c.bf16 %v10431_v21, %v10426_v12  ;;  %v12290_v21 = vpack.c.bf16 %v10319_v56, %v10317_v52  ;;  %v12292_v52 = vpack.c.bf16 %v10385_v45, %v10380_v37 }
 0x16b   :  { %v8858_v29 = vpop.f32.mrf.mxu0  ;;  %v8874_v32 = vpop.f32.mrf.mxu1 }
 0x16d   :  { %v10437_v36 = vpop.f32.mrf.mxu1  ;;  %v752_v39 = vpop.f32.mrf.mxu0 }
 0x16f   :  { %v8877_v40 = vpop.f32.mrf.mxu1  ;;  %v8889_v53 = vpop.f32.mrf.mxu0 }
 0x171   :  { %v10439_v55 = vpop.f32.mrf.mxu1  ;;  %v755_v58 = vpop.f32.mrf.mxu0 }
 0x172   :  { %v904_v63 = vpack.c.bf16 %v10439_v55, %v10437_v36  ;;  %v906_v4 = vpack.c.bf16 %v755_v58, %v752_v39 }
 0x173   :  { %v8878_v6 = vpop.f32.mrf.mxu1  ;;  %v8890_v9 = vpop.f32.mrf.mxu0 }
 0x174   :  { %7800 = vmatmul.mubr.msk.bf16.gmra.mxu1 %vm1001_vm2, %v906_v4 }
 0x175   :  { %v10444_v14 = vpop.f32.mrf.mxu1  ;;  %v760_v19 = vpop.f32.mrf.mxu0  ;;  %1325 = vmatprep.mubr.bf16.mxu1 %v12286_v47 }
 0x177   :  { %v8881_v29 = vpop.f32.mrf.mxu1  ;;  %v8893_v32 = vpop.f32.mrf.mxu0 }
 0x179   :  { %v10447_v40 = vpop.f32.mrf.mxu1  ;;  %v763_v53 = vpop.f32.mrf.mxu0 }
 0x17a   :  { %v907_v25 = vpack.c.bf16 %v763_v53, %v760_v19 }
 0x17b   :  { %v8882_v17 = vpop.f32.mrf.mxu1  ;;  %v8894_v39 = vpop.f32.mrf.mxu0 }
 0x17c   :  { %7780 = vmatmul.mubr.msk.bf16.gmra.mxu0 %vm1001_vm2, %v907_v25 }
 0x17d   :  { %v837_v58 = vpop.f32.mrf.mxu1  ;;  %1128 = vmatprep.mubr.bf16.mxu0 %v12286_v47  ;;  %v10453_v4 = vpop.f32.mrf.mxu0 }
 0x17f   :  { %v8913_v6 = vpop.f32.mrf.mxu1  ;;  %v8897_v9 = vpop.f32.mrf.mxu0 }
 0x181   :  { %v840_v29 = vpop.f32.mrf.mxu1  ;;  %v10455_v32 = vpop.f32.mrf.mxu0 }
 0x182   :  { %v911_v48 = vpack.c.bf16 %v840_v29, %v837_v58  ;;  %v908_v7 = vpack.c.bf16 %v10455_v32, %v10453_v4 }
 0x183   :  { %v8914_v0 = vpop.f32.mrf.mxu1  ;;  %v8898_v19 = vpop.f32.mrf.mxu0 }
 0x184   :  { %7801 = vmatmul.mubr.msk.bf16.gmra.mxu1 %vm1001_vm2, %v911_v48 }
 0x185   :  { %v845_v17 = vpop.f32.mrf.mxu1  ;;  %1707 = vmatprep.mubr.bf16.mxu1 %v12286_v47  ;;  %v10461_v25 = vpop.f32.mrf.mxu0 }
 0x187   :  { %v8917_v53 = vpop.f32.mrf.mxu1  ;;  %v8901_v39 = vpop.f32.mrf.mxu0 }
 0x189   :  { %v848_v6 = vpop.f32.mrf.mxu1  ;;  %v10463_v9 = vpop.f32.mrf.mxu0 }
 0x18a   :  { %v912_v59 = vpack.c.bf16 %v848_v6, %v845_v17  ;;  %v9466_v6 = vld [vmem:[#allocation2 + $0x1c0] ss:$8 sps:$4 sm:$0xff]   ;;  %v909_v11 = vpack.c.bf16 %v10463_v9, %v10461_v25  ;;  %v12291_v9 = vpack.c.bf16 %v10359_v5, %v10356_v1  ;;  %v12293_v1 = vpack.c.bf16 %v10403_v13, %v10400_v8 }
 0x18b   :  { %v8918_v27 = vpop.f32.mrf.mxu1  ;;  %v8902_v58 = vpop.f32.mrf.mxu0 }
 0x18c   :  { %7781 = vmatmul.mubr.msk.bf16.gmra.mxu0 %vm1001_vm2, %v912_v59  ;;  %7834 = vmatmul.mubr.msk.bf16.vlgmr.msra.gmra.mxu1 %vm1001_vm2, %v879_v43  ;;  %v9463_v59 = vld [vmem:[#allocation2 + $0x1d0] ss:$8 sps:$4 sm:$0xff]   ;;  %v9468_v43 = vld [vmem:[#allocation2 + $0x1c4] ss:$8 sps:$4 sm:$0xff]  }
 0x18d   :  { %1465 = vmatprep.mubr.bf16.mxu0 %v12286_v47  ;;  %1717 = vmatprep.mubr.bf16.mxu1 %v12286_v47  ;;  %v10472_v0 = vpop.f32.mrf.mxu1  ;;  %v10474_v48 = vpop.f32.mrf.mxu0 }
 0x18f   :  { %v8921_v29 = vpop.f32.mrf.mxu1  ;;  %v8905_v19 = vpop.f32.mrf.mxu0 }
 0x190   :  { %v9471_v29 = vld [vmem:[#allocation2 + $0x1b4] ss:$8 sps:$4 sm:$0xff]  }
 0x191   :  { %v10476_v17 = vpop.f32.mrf.mxu1  ;;  %v10478_v27 = vpop.f32.mrf.mxu0 }
 0x192   :  { %v910_v34 = vpack.c.bf16 %v10478_v27, %v10474_v48 }
 0x193   :  { %v8922_v41 = vpop.f32.mrf.mxu1  ;;  %v8906_v53 = vpop.f32.mrf.mxu0 }
 0x194   :  { %7814 = vmatmul.mubr.msk.bf16.vlgmr.msra.gmra.mxu0 %vm1001_vm2, %v878_v26  ;;  %7835 = vmatmul.mubr.msk.bf16.gmra.mxu1 %vm1001_vm2, %v884_v60  ;;  %v9474_v26 = vld [vmem:[#allocation2 + $0x1a4] ss:$8 sps:$4 sm:$0xff]  }
 0x195   :  { %1475 = vmatprep.mubr.bf16.mxu0 %v12286_v47  ;;  %1727 = vmatprep.mubr.bf16.mxu1 %v12286_v47  ;;  %v861_v39 = vpop.f32.mrf.mxu1 }
 0x196   :  { %1922 = vmatpush1.bf16.msra.mxu0 %v9463_v59  ;;  %v9477_v59 = vld [vmem:[#allocation2 + $0x194] ss:$8 sps:$4 sm:$0xff]  }
 0x197   :  { %v8925_v58 = vpop.f32.mrf.mxu1  ;;  %1923 = vmatprep.subr.bf16.mxu0 %v9468_v43 }
 0x199   :  { %v864_v19 = vpop.f32.mrf.mxu1 }
 0x19a   :  { %1924 = vmatpush1.bf16.msra.mxu0 %v9466_v6 }
 0x19b   :  { %v8926_v24 = vpop.f32.mrf.mxu1  ;;  %1925 = vmatprep.subr.bf16.mxu0 %v9471_v29  ;;  %v12294_v29 = vpack.c.bf16 %v10429_v20, %v10424_v10 }
 0x19c   :  { %7815 = vmatmul.mubr.msk.bf16.gmra.mxu0 %vm1001_vm2, %v883_v44  ;;  %7836 = vmatmul.mubr.msk.bf16.gmra.mxu1 %vm1001_vm2, %v889_v30 }
 0x19d   :  { %1485 = vmatprep.mubr.bf16.mxu0 %v12286_v47  ;;  %1737 = vmatprep.mubr.bf16.mxu1 %v12286_v47  ;;  %v10502_v50 = vpop.f32.mrf.mxu1 }
 0x19e   :  { %1926 = vmatpush1.bf16.msra.mxu0 %v9469_v16 }
 0x19f   :  { %v8929_v60 = vpop.f32.mrf.mxu1  ;;  %1927 = vmatprep.subr.bf16.mxu0 %v9474_v26  ;;  %v12295_v26 = vpack.c.bf16 %v10447_v40, %v10444_v14 }
 0x1a1   :  { %v10504_v41 = vpop.f32.mrf.mxu1 }
 0x1a2   :  { %v915_v35 = vpack.c.bf16 %v10504_v41, %v10502_v50  ;;  %1928 = vmatpush1.bf16.msra.mxu0 %v9472_v57 }
 0x1a3   :  { %v8930_v44 = vpop.f32.mrf.mxu1  ;;  %1929 = vmatprep.subr.bf16.mxu0 %v9477_v59 }
 0x1a4   :  { %7816 = vmatmul.mubr.msk.bf16.gmra.mxu0 %vm1001_vm2, %v888_v18  ;;  %7837 = vmatmul.mubr.msk.bf16.gmra.mxu1 %vm1001_vm2, %v894_v2  ;;  %v914_v18 = vpack.c.bf16 %v864_v19, %v861_v39 }
 0x1a5   :  { %1495 = vmatprep.mubr.bf16.mxu0 %v12286_v47  ;;  %1747 = vmatprep.mubr.bf16.mxu1 %v12286_v47 }
 0x1a6   :  { %1930 = vmatpush1.bf16.msra.mxu0 %v9475_v42 }
 0x1a7   :  { %1931 = vmatprep.subr.bf16.mxu0 %v9480_v22 }
 0x1aa   :  { %1932 = vmatpush1.bf16.msra.mxu0 %v9478_v28 }
 0x1ac   :  { %7817 = vmatmul.mubr.msk.bf16.gmra.mxu0 %vm1001_vm2, %v893_v49  ;;  %7838 = vmatmul.mubr.msk.bf16.gmra.mxu1 %vm1001_vm2, %v899_v3  ;;  %v913_v49 = vpack.c.bf16 %v10476_v17, %v10472_v0 }
 0x1ad   :  { %1505 = vmatprep.mubr.bf16.mxu0 %v12286_v47  ;;  %1757 = vmatprep.mubr.bf16.mxu1 %v12286_v47 }
 0x1b4   :  { %7818 = vmatmul.mubr.msk.bf16.gmra.mxu0 %vm1001_vm2, %v898_v33  ;;  %7839 = vmatmul.mubr.msk.bf16.gmra.mxu1 %vm1001_vm2, %v904_v63 }
 0x1b5   :  { %1515 = vmatprep.mubr.bf16.mxu0 %v12286_v47  ;;  %1767 = vmatprep.mubr.bf16.mxu1 %v12286_v47 }
 0x1bc   :  { %7819 = vmatmul.mubr.msk.bf16.gmra.mxu0 %vm1001_vm2, %v12289_v15  ;;  %7840 = vmatmul.mubr.msk.bf16.gmra.mxu1 %vm1001_vm2, %v909_v11 }
 0x1bd   :  { %1525 = vmatprep.mubr.bf16.mxu0 %v12286_v47  ;;  %1777 = vmatprep.mubr.bf16.mxu1 %v12286_v47 }
 0x1c4   :  { %v1257_v30 = vpop.f32.mrf.mxu1  ;;  %7820 = vmatmul.mubr.msk.bf16.gmra.mxu0 %vm1001_vm2, %v908_v7  ;;  %7841 = vmatmul.mubr.msk.bf16.gmra.mxu1 %vm1001_vm2, %v914_v18 }
 0x1c5   :  { %1535 = vmatprep.mubr.bf16.mxu0 %v12286_v47  ;;  %2305 = vmatprep.mubr.bf16.mxu1 %v12286_v47 }
 0x1c6   :  { %v1259_v38 = vpop.f32.mrf.mxu1 }
 0x1c8   :  { %v1261_v46 = vpop.f32.mrf.mxu1 }
 0x1ca   :  { %v10556_v54 = vpop.f32.mrf.mxu1 }
 0x1cc   :  { %v1060_v62 = vpop.f32.mrf.mxu0  ;;  %7821 = vmatmul.mubr.msk.bf16.gmra.mxu0 %vm1001_vm2, %v913_v49  ;;  %v1267_v31 = vpop.f32.mrf.mxu1 }
 0x1cd   :  { %v10559_v2 = vadd.f32 %v1257_v30, %v1060_v62  ;;  %1949 = vmatprep.mubr.bf16.mxu0 %v12286_v47 }
 0x1ce   :  { %v1062_v7 = vpop.f32.mrf.mxu0  ;;  %v1269_v3 = vpop.f32.mrf.mxu1 }
 0x1cf   :  { %v10562_v23 = vadd.f32 %v1259_v38, %v1062_v7 }
 0x1d0   :  { %v1064_v33 = vpop.f32.mrf.mxu0  ;;  %v1271_v4 = vpop.f32.mrf.mxu1 }
 0x1d1   :  { %v10564_v51 = vadd.f32 %v1261_v46, %v1064_v33 }
 0x1d2   :  { %v10566_v61 = vpop.f32.mrf.mxu0  ;;  %v10589_v56 = vpop.f32.mrf.mxu1 }
 0x1d4   :  { %v1070_v12 = vpop.f32.mrf.mxu0  ;;  %7854 = vmatmul.mubr.msk.bf16.vlgmr.msra.gmra.mxu0 %vm1001_vm2, %v12290_v21 }
 0x1d5   :  { %v10572_v36 = vadd.f32 %v1267_v31, %v1070_v12  ;;  %1959 = vmatprep.mubr.bf16.mxu0 %v12286_v47 }
 0x1d6   :  { %v1072_v55 = vpop.f32.mrf.mxu0 }
 0x1d7   :  { %v10575_v63 = vadd.f32 %v1269_v3, %v1072_v55 }
 0x1d8   :  { %v1074_v32 = vpop.f32.mrf.mxu0 }
 0x1d9   :  { %v10577_v25 = vadd.f32 %v1271_v4, %v1074_v32 }
 0x1da   :  { %v10591_v17 = vpop.f32.mrf.mxu0 }
 0x1dc   :  { %7855 = vmatmul.mubr.msk.bf16.gmra.mxu0 %vm1001_vm2, %v12291_v9 }
 0x1dd   :  { %1969 = vmatprep.mubr.bf16.mxu0 %v12286_v47 }
 0x1e4   :  { %7856 = vmatmul.mubr.msk.bf16.gmra.mxu0 %vm1001_vm2, %v12292_v52  ;;  %v1277_v0 = vpop.f32.mrf.mxu1 }
 0x1e5   :  { %1979 = vmatprep.mubr.bf16.mxu0 %v12286_v47 }
 0x1e6   :  { %v1279_v43 = vpop.f32.mrf.mxu1 }
 0x1e8   :  { %v1281_v39 = vpop.f32.mrf.mxu1 }
 0x1ea   :  { %v10609_v8 = vpop.f32.mrf.mxu1 }
 0x1ec   :  { %v1080_v53 = vpop.f32.mrf.mxu0  ;;  %7857 = vmatmul.mubr.msk.bf16.gmra.mxu0 %vm1001_vm2, %v12293_v1 }
 0x1ed   :  { %v10597_v5 = vadd.f32 %v1277_v0, %v1080_v53  ;;  %1989 = vmatprep.mubr.bf16.mxu0 %v12286_v47 }
 0x1ee   :  { %v1082_v37 = vpop.f32.mrf.mxu0 }
 0x1ef   :  { %v10600_v45 = vadd.f32 %v1279_v43, %v1082_v37 }
 0x1f0   :  { %v1084_v6 = vpop.f32.mrf.mxu0 }
 0x1f1   :  { %v10602_v58 = vadd.f32 %v1281_v39, %v1084_v6 }
 0x1f2   :  { %v10611_v19 = vpop.f32.mrf.mxu0 }
 0x1f4   :  { %7858 = vmatmul.mubr.msk.bf16.gmra.mxu0 %vm1001_vm2, %v12294_v29  ;;  %v1287_v13 = vpop.f32.mrf.mxu1 }
 0x1f5   :  { %1999 = vmatprep.mubr.bf16.mxu0 %v12286_v47 }
 0x1f6   :  { %v1289_v16 = vpop.f32.mrf.mxu1 }
 0x1f8   :  { %v1291_v60 = vpop.f32.mrf.mxu1 }
 0x1fa   :  { %v10634_v14 = vpop.f32.mrf.mxu1 }
 0x1fc   :  { %v1090_v24 = vpop.f32.mrf.mxu0  ;;  %7859 = vmatmul.mubr.msk.bf16.gmra.mxu0 %vm1001_vm2, %v12295_v26 }
 0x1fd   :  { %v10617_v57 = vadd.f32 %v1287_v13, %v1090_v24  ;;  %2009 = vmatprep.mubr.bf16.mxu0 %v12286_v47 }
 0x1fe   :  { %v1092_v10 = vpop.f32.mrf.mxu0 }
 0x1ff   :  { %v10620_v20 = vadd.f32 %v1289_v16, %v1092_v10 }
 0x200   :  { %v1094_v59 = vpop.f32.mrf.mxu0 }
 0x201   :  { %v10622_v42 = vadd.f32 %v1291_v60, %v1094_v59 }
 0x202   :  { %v10636_v44 = vpop.f32.mrf.mxu0 }
 0x204   :  { %7860 = vmatmul.mubr.msk.bf16.gmra.mxu0 %vm1001_vm2, %v910_v34 }
 0x205   :  { %2019 = vmatprep.mubr.bf16.mxu0 %v12286_v47 }
 0x20c   :  { %7861 = vmatmul.mubr.msk.bf16.gmra.mxu0 %vm1001_vm2, %v915_v35  ;;  %v1297_v40 = vpop.f32.mrf.mxu1 }
 0x20d   :  { %2488 = vmatprep.mubr.bf16.mxu0 %v12286_v47 }
 0x20e   :  { %v1299_v22 = vpop.f32.mrf.mxu1 }
 0x210   :  { %v1301_v34 = vpop.f32.mrf.mxu1 }
 0x212   :  { %v10644_v50 = vpop.f32.mrf.mxu1 }
 0x214   :  { %v1100_v28 = vpop.f32.mrf.mxu0 }
 0x215   :  { %v10638_v11 = vadd.f32 %v1297_v40, %v1100_v28 }
 0x216   :  { %v1102_v48 = vpop.f32.mrf.mxu0 }
 0x217   :  { %v10640_v27 = vadd.f32 %v1299_v22, %v1102_v48 }
 0x218   :  { %v1104_v15 = vpop.f32.mrf.mxu0 }
 0x219   :  { %v10642_v18 = vadd.f32 %v1301_v34, %v1104_v15 }
 0x21a   :  { %v10646_v41 = vpop.f32.mrf.mxu0 }
 0x21c   :  { %v1307_v35 = vpop.f32.mrf.mxu1 }
 0x21e   :  { %v1309_v46 = vpop.f32.mrf.mxu1 }
 0x220   :  { %v10652_v7 = vpop.f32.mrf.mxu1 }
 0x222   :  { %v10654_v31 = vpop.f32.mrf.mxu1 }
 0x224   :  { %v1110_v30 = vpop.f32.mrf.mxu0 }
 0x225   :  { %v10648_v38 = vadd.f32 %v1307_v35, %v1110_v30 }
 0x226   :  { %v1112_v49 = vpop.f32.mrf.mxu0 }
 0x227   :  { %v10650_v62 = vadd.f32 %v1309_v46, %v1112_v49 }
 0x228   :  { %v10656_v33 = vpop.f32.mrf.mxu0 }
 0x22a   :  { %v10658_v12 = vpop.f32.mrf.mxu0 }
 0x234   :  { %v1317_v3 = vpop.f32.mrf.mxu1 }
 0x236   :  { %v1319_v21 = vpop.f32.mrf.mxu1 }
 0x238   :  { %v1321_v32 = vpop.f32.mrf.mxu1 }
 0x23a   :  { %v10666_v53 = vpop.f32.mrf.mxu1 }
 0x23b   :  { %12296 = vst [vmem:[#allocation12_spill] sm:$0xff] %v10666_v53 }
 0x23c   :  { %v1120_v55 = vpop.f32.mrf.mxu0 }
 0x23d   :  { %v10660_v4 = vadd.f32 %v1317_v3, %v1120_v55 }
 0x23e   :  { %v1122_v9 = vpop.f32.mrf.mxu0 }
 0x23f   :  { %v10662_v52 = vadd.f32 %v1319_v21, %v1122_v9 }
 0x240   :  { %v1124_v0 = vpop.f32.mrf.mxu0 }
 0x241   :  { %v10664_v43 = vadd.f32 %v1321_v32, %v1124_v0 }
 0x242   :  { %v10668_v39 = vpop.f32.mrf.mxu0 }
 0x243   :  { %12297 = vst [vmem:[#allocation13_spill] sm:$0xff] %v10668_v39 }
 0x244   :  { %v1327_v1 = vpop.f32.mrf.mxu1 }
 0x246   :  { %v1329_v37 = vpop.f32.mrf.mxu1 }
 0x248   :  { %v10670_v6 = vpop.f32.mrf.mxu1 }
 0x249   :  { %12298 = vst [vmem:[#allocation14_spill] sm:$0xff] %v10670_v6 }
 0x24a   :  { %v10676_v26 = vpop.f32.mrf.mxu1 }
 0x24b   :  { %12299 = vst [vmem:[#allocation15_spill] sm:$0xff] %v10676_v26 }
 0x24c   :  { %v1130_v29 = vpop.f32.mrf.mxu0  ;;  %v10682_v59 = vpop.f32.mrf.mxu1 }
 0x24d   :  { %v10672_v13 = vadd.f32 %v1327_v1, %v1130_v29 }
 0x24e   :  { %v1132_v16 = vpop.f32.mrf.mxu0  ;;  %v10690_v34 = vpop.f32.mrf.mxu1 }
 0x24f   :  { %v10674_v24 = vadd.f32 %v1329_v37, %v1132_v16 }
 0x250   :  { %v10678_v10 = vpop.f32.mrf.mxu0  ;;  %v10697_v46 = vpop.f32.mrf.mxu1 }
 0x251   :  { %12300 = vst [vmem:[#allocation16_spill] sm:$0xff] %v10678_v10 }
 0x252   :  { %v10680_v60 = vpop.f32.mrf.mxu0 }
 0x253   :  { %12301 = vst [vmem:[#allocation17_spill] sm:$0xff] %v10680_v60 }
 0x254   :  { %v1467_v40 = vpop.f32.mrf.mxu0 }
 0x255   :  { %v10685_v22 = vadd.f32 %v1467_v40, %v10559_v2 }
 0x256   :  { %v1469_v28 = vpop.f32.mrf.mxu0 }
 0x257   :  { %v10688_v48 = vadd.f32 %v1469_v28, %v10562_v23  ;;  %v10705_v23 = vpop.f32.mrf.mxu1 }
 0x258   :  { %v1471_v15 = vpop.f32.mrf.mxu0 }
 0x259   :  { %v10693_v35 = vadd.f32 %v1471_v15, %v10564_v51  ;;  %v10712_v9 = vpop.f32.mrf.mxu1 }
 0x25a   :  { %v10695_v30 = vpop.f32.mrf.mxu0 }
 0x25c   :  { %v1477_v49 = vpop.f32.mrf.mxu0 }
 0x25d   :  { %v10700_v3 = vadd.f32 %v1477_v49, %v10572_v36 }
 0x25e   :  { %v1479_v2 = vpop.f32.mrf.mxu0 }
 0x25f   :  { %v10703_v21 = vadd.f32 %v1479_v2, %v10575_v63  ;;  %v10720_v63 = vpop.f32.mrf.mxu1 }
 0x260   :  { %v1481_v55 = vpop.f32.mrf.mxu0 }
 0x261   :  { %v10708_v32 = vadd.f32 %v1481_v55, %v10577_v25  ;;  %v10727_v40 = vpop.f32.mrf.mxu1 }
 0x262   :  { %v10710_v51 = vpop.f32.mrf.mxu0 }
 0x264   :  { %v1487_v0 = vpop.f32.mrf.mxu0 }
 0x265   :  { %v10715_v1 = vadd.f32 %v1487_v0, %v10597_v5 }
 0x266   :  { %v1489_v36 = vpop.f32.mrf.mxu0 }
 0x267   :  { %v10718_v37 = vadd.f32 %v1489_v36, %v10600_v45  ;;  %v10735_v45 = vpop.f32.mrf.mxu1 }
 0x268   :  { %v1491_v29 = vpop.f32.mrf.mxu0 }
 0x269   :  { %v10723_v16 = vadd.f32 %v1491_v29, %v10602_v58  ;;  %v10742_v0 = vpop.f32.mrf.mxu1 }
 0x26a   :  { %v10725_v25 = vpop.f32.mrf.mxu0 }
 0x26c   :  { %v1497_v28 = vpop.f32.mrf.mxu0 }
 0x26d   :  { %v10730_v15 = vadd.f32 %v1497_v28, %v10617_v57 }
 0x26e   :  { %v1499_v5 = vpop.f32.mrf.mxu0 }
 0x26f   :  { %v10733_v49 = vadd.f32 %v1499_v5, %v10620_v20  ;;  %v10750_v20 = vpop.f32.mrf.mxu1 }
 0x270   :  { %v1501_v2 = vpop.f32.mrf.mxu0 }
 0x271   :  { %v10738_v55 = vadd.f32 %v1501_v2, %v10622_v42  ;;  %v10757_v2 = vpop.f32.mrf.mxu1 }
 0x272   :  { %v10740_v58 = vpop.f32.mrf.mxu0 }
 0x274   :  { %v1507_v36 = vpop.f32.mrf.mxu0 }
 0x275   :  { %v10745_v29 = vadd.f32 %v1507_v36, %v10638_v11 }
 0x276   :  { %v1509_v57 = vpop.f32.mrf.mxu0 }
 0x277   :  { %v10748_v28 = vadd.f32 %v1509_v57, %v10640_v27  ;;  %v10765_v27 = vpop.f32.mrf.mxu1 }
 0x278   :  { %v1511_v5 = vpop.f32.mrf.mxu0 }
 0x279   :  { %v10753_v47 = vadd.f32 %v1511_v5, %v10642_v18  ;;  %v10771_v18 = vpop.f32.mrf.mxu1 }
 0x27a   :  { %v10755_v42 = vpop.f32.mrf.mxu0 }
 0x27b   :  { %12302 = vst [vmem:[#allocation18_spill] sm:$0xff] %v10753_v47 }
 0x27c   :  { %v1517_v26 = vpop.f32.mrf.mxu0 }
 0x27d   :  { %v10760_v60 = vadd.f32 %v1517_v26, %v10648_v38  ;;  %v2064_v26 = vlaneseq }
 0x27e   :  { %v1519_v11 = vpop.f32.mrf.mxu0 }
 0x27f   :  { %12303 = vst [vmem:[#allocation19_spill] sm:$0xff] %v10760_v60  ;;  %v10763_v36 = vadd.f32 %v1519_v11, %v10650_v62  ;;  %v10779_v60 = vpop.f32.mrf.mxu1 }
 0x280   :  { %v10767_v57 = vpop.f32.mrf.mxu0 }
 0x281   :  { %12304 = vst [vmem:[#allocation20_spill] sm:$0xff] %v10763_v36  ;;  %12305 = vst [vmem:[#allocation21_spill] sm:$0xff] %v10767_v57  ;;  %v10788_v57 = vpop.f32.mrf.mxu1 }
 0x282   :  { %v10769_v6 = vpop.f32.mrf.mxu0 }
 0x283   :  { %12306 = vst [vmem:[#allocation22_spill] sm:$0xff] %v10769_v6  ;;  %v10786_v6 = vshrl.u32 %v2064_v26, 7  ;;  %v2062_v26 = vld [vmem:[%s12277_s8] sm:$0x3] }
 0x284   :  { %v1527_v5 = vpop.f32.mrf.mxu0 }
 0x285   :  { %v10774_v10 = vadd.f32 %v1527_v5, %v10660_v4 }
 0x286   :  { %v1529_v47 = vpop.f32.mrf.mxu0 }
 0x287   :  { %12307 = vst [vmem:[#allocation23_spill] sm:$0xff] %v10774_v10  ;;  %v10777_v38 = vadd.f32 %v1529_v47, %v10662_v52  ;;  %v12288_v52 = vsub.s32 0, %v10786_v6 }
 0x288   :  { %v1531_v62 = vpop.f32.mrf.mxu0 }
 0x289   :  { %12308 = vst [vmem:[#allocation24_spill] sm:$0xff] %v10777_v38  ;;  %v10782_v11 = vadd.f32 %v1531_v62, %v10664_v43  ;;  %v10797_v38 = vpop.f32.mrf.mxu1  ;;  %v1789_v62 = vadd.f32 %v10690_v34, %v10688_v48  ;;  %v1274_v34 = vadd.f32 %v10589_v56, %v10591_v17  ;;  %v1793_v56 = vadd.f32 %v10720_v63, %v10703_v21 }
 0x28a   :  { %v10784_v36 = vpop.f32.mrf.mxu0  ;;  %v1284_v63 = vadd.f32 %v10609_v8, %v10611_v19 }
 0x28b   :  { %12309 = vst [vmem:[#allocation25_spill] sm:$0xff] %v10782_v11  ;;  %12310 = vst [vmem:[#allocation26_spill] sm:$0xff] %v10784_v36 }
 0x28c   :  { %v1537_v53 = vpop.f32.mrf.mxu0 }
 0x28d   :  { %v10791_v4 = vadd.f32 %v1537_v53, %v10672_v13  ;;  %v1264_v53 = vadd.f32 %v10556_v54, %v10566_v61  ;;  %v1788_v13 = vadd.f32 %v10682_v59, %v10685_v22  ;;  %v1790_v22 = vadd.f32 %v10697_v46, %v10693_v35 }
 0x28e   :  { %v1539_v5 = vpop.f32.mrf.mxu0  ;;  %v1792_v35 = vadd.f32 %v10712_v9, %v10700_v3  ;;  %v1553_v46 = vadd.f32 %v10710_v51, %v1274_v34  ;;  %v1796_v34 = vadd.f32 %v10742_v0, %v10715_v1 }
 0x28f   :  { %12311 = vst [vmem:[#allocation27_spill] sm:$0xff] %v10791_v4  ;;  %v10794_v47 = vadd.f32 %v1539_v5, %v10674_v24  ;;  %v10813_v24 = vrot.slane %v2062_v26, %v12288_v52  ;;  %v10815_v5 = vpop.f32.mrf.mxu1 }
 0x290   :  { %v10799_v43 = vpop.f32.mrf.mxu0 }
 0x291   :  { %12312 = vst [vmem:[#allocation28_spill] sm:$0xff] %v10794_v47  ;;  %12313 = vst [vmem:[#allocation29_spill] sm:$0xff] %v10799_v43  ;;  %v1549_v43 = vadd.f32 %v10695_v30, %v1264_v53  ;;  %v10827_v52 = vpop.f32.mrf.mxu1 }
 0x292   :  { %v10805_v11 = vpop.f32.mrf.mxu0 }
 0x293   :  { %12314 = vst [vmem:[#allocation30_spill] sm:$0xff] %v10805_v11  ;;  %v12315_v11 = vsub.s32 1, %v10786_v6  ;;  %v1791_v48 = vadd.f32 %v10705_v23, %v1549_v43  ;;  %v10837_v53 = vpop.f32.mrf.mxu1 }
 0x294   :  { %v1951_v47 = vpop.f32.mrf.mxu0 }
 0x295   :  { %v2030_v4 = vadd.f32 %v1951_v47, %v1788_v13  ;;  %v10822_v36 = vrot.slane %v2062_v26, %v12315_v11 }
 0x296   :  { %v1953_v54 = vpop.f32.mrf.mxu0 }
 0x297   :  { %v2074_v61 = vadd.f32 %v10813_v24, %v2030_v4  ;;  %v2031_v59 = vadd.f32 %v1953_v54, %v1789_v62  ;;  %v1794_v54 = vadd.f32 %v10727_v40, %v10708_v32 }
 0x298   :  { %v1955_v10 = vpop.f32.mrf.mxu0 }
 0x299   :  { %v2106_v39 = vmul.f32 0.5, %v2074_v61  ;;  %v2075_v30 = vadd.f32 %v10822_v36, %v2031_v59  ;;  %v2032_v47 = vadd.f32 %v1955_v10, %v1790_v22  ;;  %v10845_v61 = vpop.f32.mrf.mxu1  ;;  %v1795_v59 = vadd.f32 %v10735_v45, %v1553_v46 }
 0x29a   :  { %v1957_v11 = vpop.f32.mrf.mxu0 }
 0x29b   :  { %v2107_v26 = vmul.f32 0.5, %v2075_v30  ;;  %v2076_v4 = vadd.f32 %v10813_v24, %v2032_v47  ;;  %v2033_v62 = vadd.f32 %v1957_v11, %v1791_v48  ;;  %9751 = vtanh.f32 %v2106_v39  ;;  %v10854_v11 = vpop.f32.mrf.mxu1 }
 0x29c   :  { %v1961_v13 = vpop.f32.mrf.mxu0 }
 0x29d   :  { %v2108_v10 = vmul.f32 0.5, %v2076_v4  ;;  %v2077_v23 = vadd.f32 %v10822_v36, %v2033_v62  ;;  %v2034_v43 = vadd.f32 %v1961_v13, %v1792_v35  ;;  %9753 = vtanh.f32 %v2107_v26  ;;  %v10861_v0 = vpop.f32.mrf.mxu1 }
 0x29e   :  { %v1963_v17 = vpop.f32.mrf.mxu0  ;;  %v1797_v26 = vadd.f32 %v10750_v20, %v10718_v37  ;;  %v1557_v4 = vadd.f32 %v10725_v25, %v1284_v63 }
 0x29f   :  { %9755 = vtanh.f32 %v2108_v10  ;;  %v2109_v3 = vmul.f32 0.5, %v2077_v23  ;;  %v2078_v51 = vadd.f32 %v10813_v24, %v2034_v43  ;;  %v2035_v9 = vadd.f32 %v1963_v17, %v1793_v56 }
 0x2a0   :  { %v1965_v39 = vpop.f32.mrf.mxu0  ;;  %v1798_v10 = vadd.f32 %v10757_v2, %v10723_v16  ;;  %v1799_v43 = vadd.f32 %v10765_v27, %v1557_v4  ;;  %v1294_v56 = vadd.f32 %v10634_v14, %v10636_v44  ;;  %v1304_v17 = vadd.f32 %v10644_v50, %v10646_v41  ;;  %v10882_v50 = vpop.f32.mrf.mxu1 }
 0x2a1   :  { %9757 = vtanh.f32 %v2109_v3  ;;  %v2110_v22 = vmul.f32 0.5, %v2078_v51  ;;  %v2079_v30 = vadd.f32 %v10822_v36, %v2035_v9  ;;  %v2036_v21 = vadd.f32 %v1965_v39, %v1794_v54 }
 0x2a2   :  { %v1967_v47 = vpop.f32.mrf.mxu0  ;;  %v10873_v54 = vadd.f32 %v10652_v7, %v10656_v33  ;;  %v10877_v51 = vadd.f32 %v10654_v31, %v10658_v12  ;;  %v1800_v27 = vadd.f32 %v10771_v18, %v10730_v15  ;;  %v1561_v44 = vadd.f32 %v10740_v58, %v1294_v56 }
 0x2a3   :  { %v2111_v32 = vmul.f32 0.5, %v2079_v30  ;;  %v2080_v40 = vadd.f32 %v10813_v24, %v2036_v21  ;;  %v2037_v48 = vadd.f32 %v1967_v47, %v1795_v59  ;;  %9759 = vtanh.f32 %v2110_v22 }
 0x2a4   :  { %v1971_v45 = vpop.f32.mrf.mxu0  ;;  %v1801_v12 = vadd.f32 %v10779_v60, %v10733_v49  ;;  %v1802_v58 = vadd.f32 %v10788_v57, %v10738_v55  ;;  %v1803_v60 = vadd.f32 %v10797_v38, %v1561_v44  ;;  %v1804_v57 = vadd.f32 %v10815_v5, %v10745_v29  ;;  %v10915_v44 = vld [vmem:[%s12271_s2] sm:$0xff]  }
 0x2a5   :  { %v2112_v62 = vmul.f32 0.5, %v2080_v40  ;;  %v2081_v8 = vadd.f32 %v10822_v36, %v2037_v48  ;;  %v2038_v19 = vadd.f32 %v1971_v45, %v1796_v34  ;;  %9761 = vtanh.f32 %v2111_v32  ;;  %v10891_v48 = vpop.f32.mrf.mxu1 }
 0x2a6   :  { %v1973_v35 = vpop.f32.mrf.mxu0 }
 0x2a7   :  { %9763 = vtanh.f32 %v2112_v62  ;;  %v2113_v46 = vmul.f32 0.5, %v2081_v8  ;;  %v2082_v13 = vadd.f32 %v10813_v24, %v2038_v19  ;;  %v2039_v1 = vadd.f32 %v1973_v35, %v1797_v26  ;;  %v10897_v62 = vpop.f32.mrf.mxu1 }
 0x2a8   :  { %v1975_v23 = vpop.f32.mrf.mxu0  ;;  %v9752_v37 = vpop.eup %9751 }
 0x2a9   :  { %9765 = vtanh.f32 %v2113_v46  ;;  %v2114_v25 = vmul.f32 0.5, %v2082_v13  ;;  %v2083_v20 = vadd.f32 %v10822_v36, %v2039_v1  ;;  %v2040_v3 = vadd.f32 %v1975_v23, %v1798_v10 }
 0x2aa   :  { %v1977_v16 = vpop.f32.mrf.mxu0  ;;  %v9754_v2 = vpop.eup %9753  ;;  %v2170_v41 = vmul.f32 0.5, %v9752_v37  ;;  %v1565_v10 = vadd.f32 %v10755_v42, %v1304_v17  ;;  %v1805_v37 = vadd.f32 %v10827_v52, %v10748_v28  ;;  %v12317_v42 = vld [vmem:[#allocation12_spill] sm:$0xff] }
 0x2ab   :  { %v2115_v9 = vmul.f32 0.5, %v2083_v20  ;;  %v2041_v39 = vadd.f32 %v1977_v16, %v1799_v43  ;;  %9767 = vtanh.f32 %v2114_v25  ;;  %v2084_v7 = vadd.f32 %v10813_v24, %v2040_v3 }
 0x2ac   :  { %v9756_v14 = vpop.eup %9755  ;;  %v1981_v33 = vpop.f32.mrf.mxu0  ;;  %v2171_v21 = vmul.f32 0.5, %v9754_v2  ;;  %v2202_v34 = vadd.f32 0.5, %v2170_v41 }
 0x2ad   :  { %v2172_v59 = vmul.f32 0.5, %v9756_v14  ;;  %v2085_v22 = vadd.f32 %v10822_v36, %v2041_v39  ;;  %v2042_v31 = vadd.f32 %v1981_v33, %v1800_v27  ;;  %9769 = vtanh.f32 %v2115_v9  ;;  %v12316_v9 = vld [vmem:[#allocation13_spill] sm:$0xff]  ;;  %v10908_v39 = vpop.f32.mrf.mxu1  ;;  %v12318_v27 = vld [vmem:[#allocation18_spill] sm:$0xff] }
 0x2ae   :  { %v9758_v30 = vpop.eup %9757  ;;  %v2116_v15 = vmul.f32 0.5, %v2084_v7  ;;  %v1983_v18 = vpop.f32.mrf.mxu0  ;;  %v2203_v35 = vadd.f32 0.5, %v2171_v21  ;;  %v10906_v17 = vadd.f32 %v12317_v42, %v12316_v9  ;;  %v1806_v14 = vadd.f32 %v10837_v53, %v12318_v27  ;;  %v12319_v53 = vld [vmem:[#allocation21_spill] sm:$0xff]  ;;  %v12324_v27 = vld [vmem:[#allocation23_spill] sm:$0xff] }
 0x2af   :  { %v2204_v63 = vadd.f32 0.5, %v2172_v59  ;;  %v2117_v47 = vmul.f32 0.5, %v2085_v22  ;;  %v2086_v32 = vadd.f32 %v10813_v24, %v2042_v31  ;;  %v2043_v40 = vadd.f32 %v1983_v18, %v1801_v12 }
 0x2b0   :  { %9771 = vtanh.f32 %v2116_v15  ;;  %v1985_v45 = vpop.f32.mrf.mxu0  ;;  %v2173_v49 = vmul.f32 0.5, %v9758_v30  ;;  %v9760_v26 = vpop.eup %9759  ;;  %v1807_v30 = vadd.f32 %v10845_v61, %v1565_v10 }
 0x2b1   :  { %9773 = vtanh.f32 %v2117_v47  ;;  %v2118_v4 = vmul.f32 0.5, %v2086_v32  ;;  %v2087_v55 = vadd.f32 %v10822_v36, %v2043_v40  ;;  %v2044_v8 = vadd.f32 %v1985_v45, %v1802_v58  ;;  %v10922_v47 = vpop.f32.mrf.mxu1 }
 0x2b2   :  { %v1987_v19 = vpop.f32.mrf.mxu0  ;;  %v2205_v46 = vadd.f32 0.5, %v2173_v49  ;;  %v2234_v13 = vpack.c.bf16 %v2204_v63, %v2202_v34  ;;  %v9762_v1 = vpop.eup %9761  ;;  %v2174_v20 = vmul.f32 0.5, %v9760_v26  ;;  %v1568_v58 = vadd.f32 %v12319_v53, %v10873_v54  ;;  %v12320_v49 = vld [vmem:[#allocation22_spill] sm:$0xff] }
 0x2b3   :  { %v2119_v38 = vmul.f32 0.5, %v2087_v55  ;;  %v2045_v23 = vadd.f32 %v1987_v19, %v1803_v60  ;;  %9775 = vtanh.f32 %v2118_v4  ;;  %v2088_v29 = vadd.f32 %v10813_v24, %v2044_v8  ;;  %v12321_v55 = vld [vmem:[#allocation19_spill] sm:$0xff] }
 0x2b4   :  { %v9764_v25 = vpop.eup %9763  ;;  %v1991_v5 = vpop.f32.mrf.mxu0  ;;  %v2235_v43 = vpack.c.bf16 %v2205_v46, %v2203_v35  ;;  %v2175_v41 = vmul.f32 0.5, %v9762_v1  ;;  %v2206_v31 = vadd.f32 0.5, %v2174_v20  ;;  %v1569_v26 = vadd.f32 %v12320_v49, %v10877_v51 }
 0x2b5   :  { %v2176_v56 = vmul.f32 0.5, %v9764_v25  ;;  %9777 = vtanh.f32 %v2119_v38  ;;  %v2089_v3 = vadd.f32 %v10822_v36, %v2045_v23  ;;  %v2046_v16 = vadd.f32 %v1991_v5, %v1804_v57  ;;  %v12323_v23 = vld [vmem:[#allocation20_spill] sm:$0xff]  ;;  %v10935_v25 = vpop.f32.mrf.mxu1 }
 0x2b6   :  { %v9766_v2 = vpop.eup %9765  ;;  %v2120_v28 = vmul.f32 0.5, %v2088_v29  ;;  %2287 = vmatprep.subr.bf16.mxu1 %v2235_v43  ;;  %v1993_v52 = vpop.f32.mrf.mxu0  ;;  %v2207_v34 = vadd.f32 0.5, %v2175_v41  ;;  %v1808_v57 = vadd.f32 %v10854_v11, %v12321_v55  ;;  %v12322_v8 = vmov 0   ;;  %v10941_v43 = vld [vmem:[%s12271_s2 + $0x8] sm:$0xff]   ;;  %v12330_v55 = vld [vmem:[#allocation15_spill] sm:$0xff] }
 0x2b7   :  { %v2208_v7 = vadd.f32 0.5, %v2176_v56  ;;  %v2121_v33 = vmul.f32 0.5, %v2089_v3  ;;  %v2090_v59 = vadd.f32 %v10813_v24, %v2046_v16  ;;  %v2047_v22 = vadd.f32 %v1993_v52, %v1805_v37  ;;  %2288 = vmatpush1.bf16.msra.mxu1 %v2234_v13 }
 0x2b8   :  { %9779 = vtanh.f32 %v2120_v28  ;;  %v1995_v12 = vpop.f32.mrf.mxu0  ;;  %v2177_v15 = vmul.f32 0.5, %v9766_v2  ;;  %v9768_v18 = vpop.eup %9767  ;;  %v1809_v51 = vadd.f32 %v10861_v0, %v12323_v23  ;;  %v1810_v5 = vadd.f32 %v10882_v50, %v1568_v58 }
 0x2b9   :  { %9781 = vtanh.f32 %v2121_v33  ;;  %v2122_v21 = vmul.f32 0.5, %v2090_v59  ;;  %v2091_v63 = vadd.f32 %v10822_v36, %v2047_v22  ;;  %v2048_v32 = vadd.f32 %v1995_v12, %v1806_v14  ;;  %v1779_v59 = vpop.f32.mrf.mxu1 }
 0x2ba   :  { %7865 = vmatmul.mubr.msk.bf16.vlgmr.msra.gmra.mxu1 %vm2263_vm3, %v10915_v44  ;;  %v1997_v40 = vpop.f32.mrf.mxu0  ;;  %v2209_v45 = vadd.f32 0.5, %v2177_v15  ;;  %v2236_v60 = vpack.c.bf16 %v2208_v7, %v2206_v31  ;;  %v9770_v61 = vpop.eup %9769  ;;  %v2178_v19 = vmul.f32 0.5, %v9768_v18  ;;  %v1811_v50 = vadd.f32 %v10891_v48, %v1569_v26  ;;  %v12325_v15 = vld [vmem:[#allocation24_spill] sm:$0xff] }
 0x2bb   :  { %v2123_v4 = vmul.f32 0.5, %v2091_v63  ;;  %v2049_v54 = vadd.f32 %v1997_v40, %v1807_v30  ;;  %2315 = vmatprep.mubr.bf16.mxu1 %v12322_v8  ;;  %9783 = vtanh.f32 %v2122_v21  ;;  %v2092_v35 = vadd.f32 %v10813_v24, %v2048_v32  ;;  %v12327_v26 = vld [vmem:[#allocation16_spill] sm:$0xff] }
 0x2bc   :  { %v2001_v46 = vpop.f32.mrf.mxu0  ;;  %v2237_v13 = vpack.c.bf16 %v2209_v45, %v2207_v34  ;;  %v2179_v56 = vmul.f32 0.5, %v9770_v61  ;;  %v10944_v9 = vadd.f32 0.5, %v2178_v19  ;;  %v1812_v14 = vadd.f32 %v10897_v62, %v12324_v27  ;;  %v12326_v62 = vld [vmem:[#allocation26_spill] sm:$0xff]  ;;  %v1781_v19 = vpop.f32.mrf.mxu1 }
 0x2bd   :  { %v9772_v1 = vpop.eup %9771  ;;  %9785 = vtanh.f32 %v2123_v4  ;;  %v2093_v10 = vadd.f32 %v10822_v36, %v2049_v54  ;;  %v2050_v38 = vadd.f32 %v2001_v46, %v1808_v57  ;;  %v2124_v20 = vmul.f32 0.5, %v2092_v35  ;;  %v12328_v4 = vld [vmem:[#allocation14_spill] sm:$0xff]  ;;  %v12329_v54 = vld [vmem:[#allocation17_spill] sm:$0xff] }
 0x2be   :  { %v9774_v37 = vpop.eup %9773  ;;  %v2180_v11 = vmul.f32 0.5, %v9772_v1  ;;  %2348 = vmatprep.subr.bf16.mxu1 %v2237_v13  ;;  %v2003_v29 = vpop.f32.mrf.mxu0  ;;  %v2211_v12 = vadd.f32 0.5, %v2179_v56  ;;  %v1813_v18 = vadd.f32 %v10908_v39, %v12325_v15  ;;  %v1573_v53 = vadd.f32 %v12326_v62, %v10906_v17  ;;  %v10970_v1 = vld [vmem:[%s12271_s2 + $0x10] ss:$0 sps:$4 sm:$0xff]  }
 0x2bf   :  { %v2125_v3 = vmul.f32 0.5, %v2093_v10  ;;  %v2094_v16 = vadd.f32 %v10813_v24, %v2050_v38  ;;  %v2051_v2 = vadd.f32 %v2003_v29, %v1809_v51  ;;  %2349 = vmatpush1.bf16.msra.mxu1 %v2236_v60  ;;  %v2181_v0 = vmul.f32 0.5, %v9774_v37  ;;  %v12331_v37 = vld [vmem:[#allocation25_spill] sm:$0xff] }
 0x2c0   :  { %v10946_v42 = vadd.f32 0.5, %v2180_v11  ;;  %9787 = vtanh.f32 %v2124_v20  ;;  %v2005_v28 = vpop.f32.mrf.mxu0  ;;  %v9776_v52 = vpop.eup %9775  ;;  %v1332_v17 = vadd.f32 %v12328_v4, %v12327_v26  ;;  %v1334_v57 = vadd.f32 %v12330_v55, %v12329_v54 }
 0x2c1   :  { %9789 = vtanh.f32 %v2125_v3  ;;  %v2126_v41 = vmul.f32 0.5, %v2094_v16  ;;  %v2095_v7 = vadd.f32 %v10822_v36, %v2051_v2  ;;  %v2052_v22 = vadd.f32 %v2005_v28, %v1810_v5  ;;  %v1783_v28 = vpop.f32.mrf.mxu1 }
 0x2c2   :  { %v9778_v33 = vpop.eup %9777  ;;  %7866 = vmatmul.mubr.msk.bf16.gmra.mxu1 %vm2263_vm3, %v10941_v43  ;;  %v2007_v31 = vpop.f32.mrf.mxu0  ;;  %v2213_v30 = vadd.f32 0.5, %v2181_v0  ;;  %v2238_v48 = vpack.c.bf16 %v10946_v42, %v10944_v9  ;;  %v2182_v63 = vmul.f32 0.5, %v9776_v52  ;;  %v1814_v11 = vadd.f32 %v10922_v47, %v12331_v37 }
 0x2c3   :  { %v2127_v58 = vmul.f32 0.5, %v2095_v7  ;;  %v2053_v21 = vadd.f32 %v2007_v31, %v1811_v50  ;;  %2325 = vmatprep.mubr.bf16.mxu1 %v12322_v8  ;;  %9791 = vtanh.f32 %v2126_v41  ;;  %v2096_v32 = vadd.f32 %v10813_v24, %v2052_v22  ;;  %v12332_v41 = vld [vmem:[#allocation27_spill] sm:$0xff]  ;;  %v12334_v31 = vld [vmem:[#allocation28_spill] sm:$0xff] }
 0x2c4   :  { %v2011_v40 = vpop.f32.mrf.mxu0  ;;  %v2239_v34 = vpack.c.bf16 %v2213_v30, %v2211_v12  ;;  %v2183_v49 = vmul.f32 0.5, %v9778_v33  ;;  %v2214_v20 = vadd.f32 0.5, %v2182_v63  ;;  %v1815_v3 = vadd.f32 %v10935_v25, %v1573_v53  ;;  %v12333_v33 = vld [vmem:[#allocation29_spill] sm:$0xff] }
 0x2c5   :  { %v9780_v45 = vpop.eup %9779  ;;  %9793 = vtanh.f32 %v2127_v58  ;;  %v2097_v60 = vadd.f32 %v10822_v36, %v2053_v21  ;;  %v2054_v61 = vadd.f32 %v2011_v40, %v1812_v14  ;;  %v2128_v46 = vmul.f32 0.5, %v2096_v32  ;;  %v12335_v58 = vld [vmem:[#allocation30_spill] sm:$0xff] }
 0x2c6   :  { %v9782_v39 = vpop.eup %9781  ;;  %v2184_v35 = vmul.f32 0.5, %v9780_v45  ;;  %2409 = vmatprep.subr.bf16.mxu1 %v2239_v34  ;;  %v2013_v13 = vpop.f32.mrf.mxu0  ;;  %v2215_v2 = vadd.f32 0.5, %v2183_v49  ;;  %v1816_v7 = vadd.f32 %v1779_v59, %v12332_v41  ;;  %v1576_v22 = vadd.f32 %v12333_v33, %v1332_v17 }
 0x2c7   :  { %v2129_v10 = vmul.f32 0.5, %v2097_v60  ;;  %v2098_v38 = vadd.f32 %v10813_v24, %v2054_v61  ;;  %v2055_v23 = vadd.f32 %v2013_v13, %v1813_v18  ;;  %v2185_v51 = vmul.f32 0.5, %v9782_v39  ;;  %v1785_v34 = vpop.f32.mrf.mxu1 }
 0x2c8   :  { %v2216_v29 = vadd.f32 0.5, %v2184_v35  ;;  %9795 = vtanh.f32 %v2128_v46  ;;  %v2015_v5 = vpop.f32.mrf.mxu0  ;;  %v9784_v56 = vpop.eup %9783  ;;  %v1817_v25 = vadd.f32 %v1781_v19, %v12334_v31  ;;  %v1577_v21 = vadd.f32 %v12335_v58, %v1334_v57 }
 0x2c9   :  { %9797 = vtanh.f32 %v2129_v10  ;;  %v2130_v16 = vmul.f32 0.5, %v2098_v38  ;;  %v2099_v50 = vadd.f32 %v10822_v36, %v2055_v23  ;;  %v2056_v52 = vadd.f32 %v2015_v5, %v1814_v11 }
 0x2ca   :  { %v9786_v0 = vpop.eup %9785  ;;  %7867 = vmatmul.mubr.msk.bf16.gmra.mxu1 %vm2263_vm3, %v10970_v1  ;;  %v2017_v27 = vpop.f32.mrf.mxu0  ;;  %v2217_v47 = vadd.f32 0.5, %v2185_v51  ;;  %v2240_v14 = vpack.c.bf16 %v2216_v29, %v2214_v20  ;;  %v2186_v30 = vmul.f32 0.5, %v9784_v56  ;;  %v1818_v54 = vadd.f32 %v1783_v28, %v1576_v22 }
 0x2cb   :  { %v2057_v12 = vadd.f32 %v2017_v27, %v1815_v3  ;;  %2366 = vmatprep.mubr.bf16.mxu1 %v12322_v8  ;;  %9799 = vtanh.f32 %v2130_v16  ;;  %v2100_v15 = vadd.f32 %v10813_v24, %v2056_v52  ;;  %v2187_v59 = vmul.f32 0.5, %v9786_v0 }
 0x2cc   :  { %v2021_v18 = vpop.f32.mrf.mxu0  ;;  %v2241_v62 = vpack.c.bf16 %v2217_v47, %v2215_v2  ;;  %v2131_v60 = vmul.f32 0.5, %v2099_v50  ;;  %v10987_v55 = vadd.f32 0.5, %v2186_v30  ;;  %v1819_v46 = vadd.f32 %v1785_v34, %v1577_v21 }
 0x2cd   :  { %v9788_v53 = vpop.eup %9787  ;;  %v2101_v63 = vadd.f32 %v10822_v36, %v2057_v12  ;;  %v2058_v32 = vadd.f32 %v2021_v18, %v1816_v7  ;;  %v2132_v61 = vmul.f32 0.5, %v2100_v15  ;;  %v2219_v38 = vadd.f32 0.5, %v2187_v59 }
 0x2ce   :  { %v9790_v40 = vpop.eup %9789  ;;  %v2188_v45 = vmul.f32 0.5, %v9788_v53  ;;  %2470 = vmatprep.subr.bf16.mxu0 %v2241_v62  ;;  %v2023_v49 = vpop.f32.mrf.mxu0 }
 0x2cf   :  { %v2133_v39 = vmul.f32 0.5, %v2101_v63  ;;  %v2102_v26 = vadd.f32 %v10813_v24, %v2058_v32  ;;  %v2059_v4 = vadd.f32 %v2023_v49, %v1817_v25  ;;  %2471 = vmatpush1.bf16.msra.mxu0 %v2240_v14  ;;  %v2189_v17 = vmul.f32 0.5, %v9790_v40 }
 0x2d0   :  { %v10989_v57 = vadd.f32 0.5, %v2188_v45  ;;  %9801 = vtanh.f32 %v2132_v61  ;;  %v2025_v19 = vpop.f32.mrf.mxu0  ;;  %v9792_v35 = vpop.eup %9791 }
 0x2d1   :  { %v2134_v13 = vmul.f32 0.5, %v2102_v26  ;;  %v2103_v10 = vadd.f32 %v10822_v36, %v2059_v4  ;;  %9803 = vtanh.f32 %v2133_v39  ;;  %v2060_v51 = vadd.f32 %v2025_v19, %v1818_v54 }
 0x2d2   :  { %v9794_v23 = vpop.eup %9793  ;;  %7868 = vmatmul.mubr.msk.bf16.vlgmr.msra.gmra.mxu1 %vm2263_vm3, %v10915_v44  ;;  %v2027_v37 = vpop.f32.mrf.mxu0  ;;  %v2221_v11 = vadd.f32 0.5, %v2189_v17  ;;  %7874 = vmatmul.mubr.msk.bf16.vlgmr.msra.gmra.mxu0 %vm2263_vm3, %v10915_v44  ;;  %v2242_v20 = vpack.c.bf16 %v10989_v57, %v10987_v55  ;;  %9805 = vtanh.f32 %v2131_v60  ;;  %v2190_v56 = vmul.f32 0.5, %v9792_v35  ;;  %v9484_v55 = vld [vmem:[#allocation4 + $0x38] sm:$0xff]   ;;  %v9486_v57 = vld [vmem:[#allocation4 + $0x30] sm:$0xff]   ;;  %v9488_v35 = vld [vmem:[#allocation4 + $0x28] sm:$0xff]  }
 0x2d3   :  { %v2135_v29 = vmul.f32 0.5, %v2103_v10  ;;  %2410 = vmatpush1.bf16.msra.mxu1 %v2238_v48  ;;  %v2061_v5 = vadd.f32 %v2027_v37, %v1819_v46  ;;  %2376 = vmatprep.mubr.bf16.mxu1 %v12322_v8  ;;  %9807 = vtanh.f32 %v2134_v13  ;;  %v2104_v3 = vadd.f32 %v10813_v24, %v2060_v51  ;;  %v9490_v46 = vld [vmem:[#allocation4 + $0x20] sm:$0xff]   ;;  %v9492_v13 = vld [vmem:[#allocation4 + $0x18] sm:$0xff]   ;;  %v9494_v10 = vld [vmem:[#allocation4 + $0x10] sm:$0xff]  }
 0x2d4   :  { %v2243_v16 = vpack.c.bf16 %v2221_v11, %v2219_v38  ;;  %2498 = vmatprep.mubr.bf16.mxu0 %v12322_v8  ;;  %v2191_v28 = vmul.f32 0.5, %v9794_v23  ;;  %v2222_v48 = vadd.f32 0.5, %v2190_v56  ;;  %v9485_v38 = vld [vmem:[#allocation4 + $0x98] sm:$0xff]   ;;  %v9496_v23 = vld [vmem:[#allocation4 + $0x8] sm:$0xff]   ;;  %v9487_v51 = vld [vmem:[#allocation4 + $0x90] sm:$0xff]  }
 0x2d5   :  { %v9796_v2 = vpop.eup %9795  ;;  %9809 = vtanh.f32 %v2135_v29  ;;  %v2105_v0 = vadd.f32 %v10822_v36, %v2061_v5  ;;  %v2136_v27 = vmul.f32 0.5, %v2104_v3  ;;  %v9498_v37 = vld [vmem:[#allocation4] sm:$0xff]   ;;  %v9489_v11 = vld [vmem:[#allocation4 + $0x88] sm:$0xff]   ;;  %v9502_v29 = vld [vmem:[#allocation4 + $0x50] sm:$0xff]  }
 0x2d6   :  { %v9798_v50 = vpop.eup %9797  ;;  %v2192_v52 = vmul.f32 0.5, %v9796_v2  ;;  %2531 = vmatprep.subr.bf16.mxu1 %v2243_v16  ;;  %v2223_v24 = vadd.f32 0.5, %v2191_v28  ;;  %v9493_v5 = vld [vmem:[#allocation4 + $0x78] sm:$0xff]   ;;  %v9504_v56 = vld [vmem:[#allocation4 + $0x48] sm:$0xff]   ;;  %v9506_v3 = vld [vmem:[#allocation4 + $0x40] sm:$0xff]  }
 0x2d7   :  { %v2137_v9 = vmul.f32 0.5, %v2105_v0  ;;  %v2193_v42 = vmul.f32 0.5, %v9798_v50  ;;  %9811 = vtanh.f32 %v2136_v27  ;;  %v9497_v16 = vld [vmem:[#allocation4 + $0x68] sm:$0xff]   ;;  %v9499_v2 = vld [vmem:[#allocation4 + $0x60] sm:$0xff]   ;;  %v9503_v0 = vld [vmem:[#allocation4 + $0xb0] sm:$0xff]  }
 0x2d8   :  { %v2224_v47 = vadd.f32 0.5, %v2192_v52  ;;  %v9800_v14 = vpop.eup %9799  ;;  %v9505_v28 = vld [vmem:[#allocation4 + $0xa8] sm:$0xff]   ;;  %v9507_v50 = vld [vmem:[#allocation4 + $0xa0] sm:$0xff]  }
 0x2d9   :  { %9813 = vtanh.f32 %v2137_v9  ;;  %v2225_v41 = vadd.f32 0.5, %v2193_v42  ;;  %v2194_v33 = vmul.f32 0.5, %v9800_v14 }
 0x2da   :  { %7869 = vmatmul.mubr.msk.bf16.gmra.mxu1 %vm2263_vm3, %v10941_v43  ;;  %7875 = vmatmul.mubr.msk.bf16.gmra.mxu0 %vm2263_vm3, %v10941_v43  ;;  %v2244_v36 = vpack.c.bf16 %v2224_v47, %v2222_v48 }
 0x2db   :  { %v2245_v7 = vpack.c.bf16 %v2225_v41, %v2223_v24  ;;  %2386 = vmatprep.mubr.bf16.mxu1 %v12322_v8  ;;  %2508 = vmatprep.mubr.bf16.mxu0 %v12322_v8  ;;  %v2226_v30 = vadd.f32 0.5, %v2194_v33 }
 0x2dd   :  { %v9802_v22 = vpop.eup %9801  ;;  %2592 = vmatprep.subr.bf16.mxu0 %v2245_v7 }
 0x2de   :  { %v2196_v31 = vmul.f32 0.5, %v9802_v22  ;;  %2593 = vmatpush1.bf16.msra.mxu0 %v2244_v36  ;;  %v9804_v25 = vpop.eup %9803 }
 0x2df   :  { %v9806_v12 = vpop.eup %9805  ;;  %v2197_v53 = vmul.f32 0.5, %v9804_v25 }
 0x2e0   :  { %v2228_v15 = vadd.f32 0.5, %v2196_v31  ;;  %v9808_v18 = vpop.eup %9807  ;;  %v2195_v63 = vmul.f32 0.5, %v9806_v12 }
 0x2e1   :  { %v2198_v21 = vmul.f32 0.5, %v9808_v18  ;;  %v2229_v45 = vadd.f32 0.5, %v2197_v53 }
 0x2e2   :  { %v9810_v62 = vpop.eup %9809  ;;  %7870 = vmatmul.mubr.msk.bf16.gmra.mxu1 %vm2263_vm3, %v10970_v1  ;;  %7876 = vmatmul.mubr.msk.bf16.gmra.mxu0 %vm2263_vm3, %v10970_v1  ;;  %v2246_v58 = vpack.c.bf16 %v2228_v15, %v2226_v30  ;;  %v2227_v39 = vadd.f32 0.5, %v2195_v63  ;;  %v9508_v15 = vld [vmem:[#allocation4 + $0x158] sm:$0xff]  }
 0x2e3   :  { %2427 = vmatprep.mubr.bf16.mxu1 %v12322_v8  ;;  %2610 = vmatprep.mubr.bf16.mxu0 %v12322_v8  ;;  %v2199_v59 = vmul.f32 0.5, %v9810_v62  ;;  %v2230_v61 = vadd.f32 0.5, %v2198_v21 }
 0x2e4   :  { %v9812_v32 = vpop.eup %9811  ;;  %v2247_v17 = vpack.c.bf16 %v2229_v45, %v2227_v39 }
 0x2e5   :  { %v2200_v34 = vmul.f32 0.5, %v9812_v32  ;;  %v2231_v26 = vadd.f32 0.5, %v2199_v59  ;;  %v9509_v32 = vld [vmem:[#allocation4 + $0xf8] sm:$0xff]   ;;  %v9510_v59 = vld [vmem:[#allocation4 + $0x150] sm:$0xff]  }
 0x2e6   :  { %v9814_v40 = vpop.eup %9813 }
 0x2e7   :  { %v2201_v60 = vmul.f32 0.5, %v9814_v40  ;;  %v2232_v49 = vadd.f32 0.5, %v2200_v34 }
 0x2e9   :  { %v2233_v4 = vadd.f32 0.5, %v2201_v60  ;;  %v2248_v54 = vpack.c.bf16 %v2232_v49, %v2230_v61 }
 0x2ea   :  { %7871 = vmatmul.mubr.msk.bf16.vlgmr.msra.gmra.mxu1 %vm2263_vm3, %v10915_v44  ;;  %7880 = vmatmul.mubr.msk.bf16.vlgmr.msra.gmra.mxu0 %vm2263_vm3, %v10915_v44 }
 0x2eb   :  { %2532 = vmatpush1.bf16.msra.mxu1 %v2242_v20  ;;  %v2249_v19 = vpack.c.bf16 %v2233_v4, %v2231_v26  ;;  %2437 = vmatprep.mubr.bf16.mxu1 %v12322_v8  ;;  %v9500_v20 = vld [vmem:[#allocation4 + $0x58] sm:$0xff]   ;;  %v9511_v26 = vld [vmem:[#allocation4 + $0xf0] sm:$0xff]   ;;  %v9512_v4 = vld [vmem:[#allocation4 + $0x148] sm:$0xff]  }
 0x2ec   :  { %2653 = vmatprep.subr.bf16.mxu1 %v2247_v17  ;;  %2620 = vmatprep.mubr.bf16.mxu0 %v12322_v8 }
 0x2ed   :  { %2714 = vmatprep.subr.bf16.mxu0 %v2249_v19 }
 0x2ee   :  { %2715 = vmatpush1.bf16.msra.mxu0 %v2248_v54 }
 0x2ef   :  { %3164 = vmatprep.subr.bf16.mxu0 %v12322_v8 }
 0x2f2   :  { %7872 = vmatmul.mubr.msk.bf16.gmra.mxu1 %vm2263_vm3, %v10941_v43  ;;  %7881 = vmatmul.mubr.msk.bf16.gmra.mxu0 %vm2263_vm3, %v10941_v43 }
 0x2f3   :  { %2447 = vmatprep.mubr.bf16.mxu1 %v12322_v8  ;;  %2630 = vmatprep.mubr.bf16.mxu0 %v12322_v8 }
 0x2fa   :  { %7873 = vmatmul.mubr.msk.bf16.gmra.mxu1 %vm2263_vm3, %v10970_v1  ;;  %7882 = vmatmul.mubr.msk.bf16.gmra.mxu0 %vm2263_vm3, %v10970_v1 }
 0x2fb   :  { %2549 = vmatprep.mubr.bf16.mxu1 %v12322_v8  ;;  %2732 = vmatprep.mubr.bf16.mxu0 %v12322_v8 }
 0x302   :  { %7877 = vmatmul.mubr.msk.bf16.vlgmr.msra.gmra.mxu1 %vm2263_vm3, %v10915_v44  ;;  %7886 = vmatmul.mubr.msk.bf16.vlgmr.msra.gmra.mxu0 %vm2263_vm3, %v10915_v44 }
 0x303   :  { %2654 = vmatpush1.bf16.msra.mxu1 %v2246_v58  ;;  %2559 = vmatprep.mubr.bf16.mxu1 %v12322_v8 }
 0x304   :  { %2742 = vmatprep.mubr.bf16.mxu0 %v12322_v8  ;;  %3165 = vmatpush1.bf16.msra.mxu0 %v9484_v55 }
 0x305   :  { %3003 = vmatprep.subr.bf16.mxu1 %v12322_v8  ;;  %3166 = vmatprep.subr.bf16.mxu0 %v12322_v8 }
 0x308   :  { %3167 = vmatpush1.bf16.msra.mxu0 %v9486_v57 }
 0x309   :  { %3168 = vmatprep.subr.bf16.mxu0 %v12322_v8 }
 0x30a   :  { %7878 = vmatmul.mubr.msk.bf16.gmra.mxu1 %vm2263_vm3, %v10941_v43  ;;  %7887 = vmatmul.mubr.msk.bf16.gmra.mxu0 %vm2263_vm3, %v10941_v43 }
 0x30b   :  { %2569 = vmatprep.mubr.bf16.mxu1 %v12322_v8  ;;  %2752 = vmatprep.mubr.bf16.mxu0 %v12322_v8 }
 0x30c   :  { %3169 = vmatpush1.bf16.msra.mxu0 %v9488_v35  ;;  %v9513_v35 = vld [vmem:[#allocation4 + $0xe8] sm:$0xff]  }
 0x30d   :  { %3170 = vmatprep.subr.bf16.mxu0 %v12322_v8 }
 0x310   :  { %3171 = vmatpush1.bf16.msra.mxu0 %v9490_v46  ;;  %v9514_v46 = vld [vmem:[#allocation4 + $0x140] sm:$0xff]  }
 0x311   :  { %3172 = vmatprep.subr.bf16.mxu0 %v12322_v8 }
 0x312   :  { %7879 = vmatmul.mubr.msk.bf16.gmra.mxu1 %vm2263_vm3, %v10970_v1  ;;  %7888 = vmatmul.mubr.msk.bf16.gmra.mxu0 %vm2263_vm3, %v10970_v1 }
 0x313   :  { %2671 = vmatprep.mubr.bf16.mxu1 %v12322_v8 }
 0x314   :  { %3173 = vmatpush1.bf16.msra.mxu0 %v9492_v13 }
 0x315   :  { %3174 = vmatprep.subr.bf16.mxu0 %v12322_v8 }
 0x318   :  { %3175 = vmatpush1.bf16.msra.mxu0 %v9494_v10 }
 0x319   :  { %3176 = vmatprep.subr.bf16.mxu0 %v12322_v8 }
 0x31a   :  { %7883 = vmatmul.mubr.msk.bf16.vlgmr.msra.gmra.mxu1 %vm2263_vm3, %v10915_v44  ;;  %v9491_v44 = vld [vmem:[#allocation4 + $0x80] sm:$0xff]  }
 0x31b   :  { %2681 = vmatprep.mubr.bf16.mxu1 %v12322_v8  ;;  %3004 = vmatpush1.bf16.msra.mxu1 %v9485_v38 }
 0x31c   :  { %3005 = vmatprep.subr.bf16.mxu1 %v12322_v8  ;;  %3177 = vmatpush1.bf16.msra.mxu0 %v9496_v23 }
 0x31d   :  { %3178 = vmatprep.subr.bf16.mxu0 %v12322_v8 }
 0x31f   :  { %3006 = vmatpush1.bf16.msra.mxu1 %v9487_v51 }
 0x320   :  { %3007 = vmatprep.subr.bf16.mxu1 %v12322_v8  ;;  %3179 = vmatpush1.bf16.msra.mxu0 %v9498_v37 }
 0x321   :  { %3188 = vmatprep.subr.bf16.mxu0 %v12322_v8 }
 0x322   :  { %7884 = vmatmul.mubr.msk.bf16.gmra.mxu1 %vm2263_vm3, %v10941_v43  ;;  %v9495_v43 = vld [vmem:[#allocation4 + $0x70] sm:$0xff]  }
 0x323   :  { %2691 = vmatprep.mubr.bf16.mxu1 %v12322_v8  ;;  %3008 = vmatpush1.bf16.msra.mxu1 %v9489_v11  ;;  %v9515_v11 = vld [vmem:[#allocation4 + $0xe0] sm:$0xff]  }
 0x324   :  { %3009 = vmatprep.subr.bf16.mxu1 %v12322_v8  ;;  %3189 = vmatpush2.bf16.msra.mxu0 %v9500_v20  ;;  %v9516_v20 = vld [vmem:[#allocation4 + $0x138] sm:$0xff]  }
 0x325   :  { %3190 = vmatprep.subr.bf16.mxu0 %v12322_v8 }
 0x327   :  { %3010 = vmatpush1.bf16.msra.mxu1 %v9491_v44 }
 0x328   :  { %3011 = vmatprep.subr.bf16.mxu1 %v12322_v8  ;;  %3191 = vmatpush2.bf16.msra.mxu0 %v9502_v29 }
 0x329   :  { %3192 = vmatprep.subr.bf16.mxu0 %v12322_v8 }
 0x32a   :  { %7885 = vmatmul.mubr.msk.bf16.gmra.mxu1 %vm2263_vm3, %v10970_v1  ;;  %v9501_v1 = vld [vmem:[#allocation4 + $0xb8] sm:$0xff]  }
 0x32b   :  { %3012 = vmatpush1.bf16.msra.mxu1 %v9493_v5 }
 0x32c   :  { %3013 = vmatprep.subr.bf16.mxu1 %v12322_v8  ;;  %3193 = vmatpush2.bf16.msra.mxu0 %v9504_v56 }
 0x32d   :  { %3194 = vmatprep.subr.bf16.mxu0 %v12322_v8 }
 0x32f   :  { %3014 = vmatpush1.bf16.msra.mxu1 %v9495_v43  ;;  %v9517_v43 = vld [vmem:[#allocation4 + $0xd8] sm:$0xff]  }
 0x330   :  { %3015 = vmatprep.subr.bf16.mxu1 %v12322_v8  ;;  %3195 = vmatpush2.bf16.msra.mxu0 %v9506_v3  ;;  %v9518_v3 = vld [vmem:[#allocation4 + $0x130] sm:$0xff]  }
 0x331   :  { %3592 = vmatprep.subr.bf16.mxu0 %v12322_v8 }
 0x333   :  { %3016 = vmatpush1.bf16.msra.mxu1 %v9497_v16 }
 0x334   :  { %3017 = vmatprep.subr.bf16.mxu1 %v12322_v8 }
 0x337   :  { %3018 = vmatpush1.bf16.msra.mxu1 %v9499_v2 }
 0x338   :  { %3027 = vmatprep.subr.bf16.mxu1 %v12322_v8 }
 0x33b   :  { %3028 = vmatpush2.bf16.msra.mxu1 %v9501_v1 }
 0x33c   :  { %3029 = vmatprep.subr.bf16.mxu1 %v12322_v8 }
 0x33f   :  { %3030 = vmatpush2.bf16.msra.mxu1 %v9503_v0 }
 0x340   :  { %3031 = vmatprep.subr.bf16.mxu1 %v12322_v8 }
 0x343   :  { %3032 = vmatpush2.bf16.msra.mxu1 %v9505_v28 }
 0x344   :  { %3033 = vmatprep.subr.bf16.mxu1 %v12322_v8 }
 0x347   :  { %3034 = vmatpush2.bf16.msra.mxu1 %v9507_v50  ;;  %v9519_v50 = vld [vmem:[#allocation4 + $0xd0] sm:$0xff]  }
 0x348   :  { %3382 = vmatprep.subr.bf16.mxu1 %v12322_v8 }
 0x37a   :  { %v2307_v52 = vpop.f32.mrf.mxu1 }
 0x37c   :  { %v2309_v27 = vpop.f32.mrf.mxu1 }
 0x37e   :  { %v2311_v9 = vpop.f32.mrf.mxu1 }
 0x380   :  { %v2313_v42 = vpop.f32.mrf.mxu1 }
 0x382   :  { %v11089_v48 = vpop.f32.mrf.mxu1 }
 0x384   :  { %v11091_v47 = vpop.f32.mrf.mxu1 }
 0x386   :  { %v11093_v14 = vpop.f32.mrf.mxu1 }
 0x388   :  { %v11095_v24 = vpop.f32.mrf.mxu1 }
 0x38a   :  { %v11097_v41 = vpop.f32.mrf.mxu1 }
 0x38c   :  { %v11099_v36 = vpop.f32.mrf.mxu1 }
 0x38e   :  { %v2331_v7 = vpop.f32.mrf.mxu1 }
 0x390   :  { %v2332_v33 = vpop.f32.mrf.mxu1 }
 0x392   :  { %v2368_v22 = vpop.f32.mrf.mxu1  ;;  %v11101_v31 = vpop.f32.mrf.mxu0 }
 0x393   :  { %v8423_v18 = vpack.c.bf16 %v2368_v22, %v2307_v52  ;;  %v9520_v52 = vld [vmem:[#allocation4 + $0x128] sm:$0xff]  }
 0x394   :  { %v2370_v25 = vpop.f32.mrf.mxu1  ;;  %v11103_v12 = vpop.f32.mrf.mxu0 }
 0x395   :  { %v8424_v30 = vpack.c.bf16 %v2370_v25, %v2309_v27  ;;  %v9521_v25 = vld [vmem:[#allocation4 + $0xc8] sm:$0xff]  }
 0x396   :  { %v2372_v62 = vpop.f32.mrf.mxu1  ;;  %v11105_v53 = vpop.f32.mrf.mxu0 }
 0x397   :  { %7933 = vmatprep.mubr.msk.bf16.mxu0 %vm2990_vm4, %v8424_v30  ;;  %v8415_v40 = vpack.c.bf16 %v2372_v62, %v2311_v9 }
 0x398   :  { %v2374_v58 = vpop.f32.mrf.mxu1  ;;  %3197 = vmatmul.mubr.bf16.vlgmr.msra.gmra.mxu0 %v8423_v18  ;;  %v11108_v21 = vpop.f32.mrf.mxu0 }
 0x399   :  { %v8416_v63 = vpack.c.bf16 %v2374_v58, %v2313_v42  ;;  %3593 = vmatpush1.bf16.msra.mxu0 %v9508_v15  ;;  %v9523_v58 = vld [vmem:[#allocation4 + $0xc0] sm:$0xff]  }
 0x39a   :  { %v11110_v34 = vpop.f32.mrf.mxu1  ;;  %v11112_v45 = vpop.f32.mrf.mxu0  ;;  %3594 = vmatprep.subr.bf16.mxu0 %v12322_v8 }
 0x39b   :  { %7909 = vmatprep.mubr.msk.bf16.mxu1 %vm2990_vm4, %v8416_v63 }
 0x39c   :  { %v11118_v61 = vpop.f32.mrf.mxu1  ;;  %3036 = vmatmul.mubr.bf16.vlgmr.msra.gmra.mxu1 %v8415_v40  ;;  %v11120_v49 = vpop.f32.mrf.mxu0  ;;  %v9525_v40 = vld [vmem:[#allocation4 + $0x118] sm:$0xff]  }
 0x39d   :  { %v8432_v39 = vpack.c.bf16 %v11118_v61, %v11091_v47  ;;  %3383 = vmatpush1.bf16.msra.mxu1 %v9509_v32  ;;  %3595 = vmatpush1.bf16.msra.mxu0 %v9510_v59  ;;  %v12337_v61 = vpack.c.bf16 %v11110_v34, %v11089_v48  ;;  %v9534_v48 = vld [vmem:[#allocation4 + $0x1a8] sm:$0xff]  }
 0x39e   :  { %v11124_v17 = vpop.f32.mrf.mxu1  ;;  %v11126_v54 = vpop.f32.mrf.mxu0  ;;  %3384 = vmatprep.subr.bf16.mxu1 %v12322_v8  ;;  %3596 = vmatprep.subr.bf16.mxu0 %v12322_v8 }
 0x39f   :  { %v8439_v19 = vpack.c.bf16 %v11124_v17, %v11093_v14  ;;  %v9533_v14 = vld [vmem:[#allocation4 + $0x1b0] sm:$0xff]  }
 0x3a0   :  { %v11132_v55 = vpop.f32.mrf.mxu1  ;;  %v11134_v57 = vpop.f32.mrf.mxu0 }
 0x3a1   :  { %3385 = vmatpush1.bf16.msra.mxu1 %v9511_v26  ;;  %3597 = vmatpush1.bf16.msra.mxu0 %v9512_v4  ;;  %v9526_v26 = vld [vmem:[#allocation4 + $0x170] sm:$0xff]   ;;  %v8440_v37 = vpack.c.bf16 %v11132_v55, %v11095_v24 }
 0x3a2   :  { %v11136_v13 = vpop.f32.mrf.mxu1  ;;  %v11138_v10 = vpop.f32.mrf.mxu0  ;;  %3386 = vmatprep.subr.bf16.mxu1 %v12322_v8  ;;  %3598 = vmatprep.subr.bf16.mxu0 %v12322_v8 }
 0x3a4   :  { %v11144_v23 = vpop.f32.mrf.mxu1  ;;  %v11146_v51 = vpop.f32.mrf.mxu0 }
 0x3a5   :  { %3387 = vmatpush1.bf16.msra.mxu1 %v9513_v35  ;;  %3599 = vmatpush1.bf16.msra.mxu0 %v9514_v46 }
 0x3a6   :  { %v2392_v44 = vpop.f32.mrf.mxu1  ;;  %v2514_v29 = vpop.f32.mrf.mxu0  ;;  %3388 = vmatprep.subr.bf16.mxu1 %v12322_v8  ;;  %3600 = vmatprep.subr.bf16.mxu0 %v12322_v8 }
 0x3a7   :  { %v9527_v29 = vld [vmem:[#allocation4 + $0x110] sm:$0xff]  }
 0x3a8   :  { %v2393_v5 = vpop.f32.mrf.mxu1  ;;  %v2515_v56 = vpop.f32.mrf.mxu0 }
 0x3a9   :  { %3389 = vmatpush1.bf16.msra.mxu1 %v9515_v11  ;;  %3601 = vmatpush1.bf16.msra.mxu0 %v9516_v20  ;;  %v9528_v5 = vld [vmem:[#allocation4 + $0x168] sm:$0xff]  }
 0x3aa   :  { %v2429_v16 = vpop.f32.mrf.mxu1  ;;  %v11152_v2 = vpop.f32.mrf.mxu0  ;;  %3390 = vmatprep.subr.bf16.mxu1 %v12322_v8  ;;  %3602 = vmatprep.subr.bf16.mxu0 %v12322_v8 }
 0x3ab   :  { %v8425_v27 = vpack.c.bf16 %v11101_v31, %v2429_v16 }
 0x3ac   :  { %v2431_v1 = vpop.f32.mrf.mxu1  ;;  %v11156_v0 = vpop.f32.mrf.mxu0 }
 0x3ad   :  { %v8426_v28 = vpack.c.bf16 %v11103_v12, %v2431_v1  ;;  %3391 = vmatpush1.bf16.msra.mxu1 %v9517_v43  ;;  %3603 = vmatpush1.bf16.msra.mxu0 %v9518_v3  ;;  %v9522_v12 = vld [vmem:[#allocation4 + $0x120] sm:$0xff]   ;;  %v9529_v1 = vld [vmem:[#allocation4 + $0x108] sm:$0xff]  }
 0x3ae   :  { %v2433_v9 = vpop.f32.mrf.mxu1  ;;  %v11160_v42 = vpop.f32.mrf.mxu0  ;;  %3392 = vmatprep.subr.bf16.mxu1 %v12322_v8  ;;  %3604 = vmatprep.subr.bf16.mxu0 %v12322_v8 }
 0x3af   :  { %7934 = vmatprep.mubr.msk.bf16.mxu0 %vm2990_vm4, %v8426_v28  ;;  %v8417_v31 = vpack.c.bf16 %v11105_v53, %v2433_v9  ;;  %v9530_v28 = vld [vmem:[#allocation4 + $0x160] sm:$0xff]  }
 0x3b0   :  { %v2435_v7 = vpop.f32.mrf.mxu1  ;;  %3205 = vmatmul.mubr.bf16.gmra.mxu0 %v8425_v27  ;;  %v11165_v33 = vpop.f32.mrf.mxu0 }
 0x3b1   :  { %v8418_v22 = vpack.c.bf16 %v11108_v21, %v2435_v7  ;;  %3393 = vmatpush1.bf16.msra.mxu1 %v9519_v50  ;;  %3605 = vmatpush1.bf16.msra.mxu0 %v9520_v52  ;;  %v9524_v21 = vld [vmem:[#allocation4 + $0x178] sm:$0xff]  }
 0x3b2   :  { %v11169_v30 = vpop.f32.mrf.mxu1  ;;  %v11171_v15 = vpop.f32.mrf.mxu0  ;;  %3394 = vmatprep.subr.bf16.mxu1 %v12322_v8  ;;  %3606 = vmatprep.subr.bf16.mxu0 %v12322_v8 }
 0x3b3   :  { %7910 = vmatprep.mubr.msk.bf16.mxu1 %vm2990_vm4, %v8418_v22  ;;  %v9531_v22 = vld [vmem:[#allocation4 + $0x100] sm:$0xff]   ;;  %v8433_v34 = vpack.c.bf16 %v11112_v45, %v11169_v30  ;;  %v9536_v45 = vld [vmem:[#allocation4 + $0x198] sm:$0xff]  }
 0x3b4   :  { %v11176_v18 = vpop.f32.mrf.mxu1  ;;  %3044 = vmatmul.mubr.bf16.gmra.mxu1 %v8417_v31  ;;  %v11178_v62 = vpop.f32.mrf.mxu0 }
 0x3b5   :  { %3395 = vmatpush1.bf16.msra.mxu1 %v9521_v25  ;;  %3607 = vmatpush1.bf16.msra.mxu0 %v9522_v12 }
 0x3b6   :  { %v11180_v53 = vpop.f32.mrf.mxu1  ;;  %v11182_v63 = vpop.f32.mrf.mxu0  ;;  %3396 = vmatprep.subr.bf16.mxu1 %v12322_v8  ;;  %3616 = vmatprep.subr.bf16.mxu0 %v12322_v8 }
 0x3b7   :  { %v8441_v17 = vpack.c.bf16 %v11126_v54, %v11180_v53  ;;  %v9535_v54 = vld [vmem:[#allocation4 + $0x1a0] sm:$0xff]  }
 0x3b8   :  { %v11186_v32 = vpop.f32.mrf.mxu1  ;;  %v11188_v59 = vpop.f32.mrf.mxu0 }
 0x3b9   :  { %3397 = vmatpush1.bf16.msra.mxu1 %v9523_v58  ;;  %3617 = vmatpush2.bf16.msra.mxu0 %v9524_v21  ;;  %v12336_v58 = vmov 0.0   ;;  %v8442_v24 = vpack.c.bf16 %v11134_v57, %v11186_v32 }
 0x3ba   :  { %v11190_v4 = vpop.f32.mrf.mxu1  ;;  %v11192_v35 = vpop.f32.mrf.mxu0  ;;  %3406 = vmatprep.subr.bf16.mxu1 %v12322_v8  ;;  %3618 = vmatprep.subr.bf16.mxu0 %v12322_v8 }
 0x3bc   :  { %v11198_v11 = vpop.f32.mrf.mxu1  ;;  %v11200_v20 = vpop.f32.mrf.mxu0 }
 0x3bd   :  { %3407 = vmatpush2.bf16.msra.mxu1 %v9525_v40  ;;  %3619 = vmatpush2.bf16.msra.mxu0 %v9526_v26 }
 0x3be   :  { %v2453_v56 = vpop.f32.mrf.mxu1  ;;  %v2636_v43 = vpop.f32.mrf.mxu0  ;;  %3408 = vmatprep.subr.bf16.mxu1 %v12322_v8  ;;  %3620 = vmatprep.subr.bf16.mxu0 %v12322_v8 }
 0x3c0   :  { %v2454_v3 = vpop.f32.mrf.mxu1  ;;  %v2637_v16 = vpop.f32.mrf.mxu0 }
 0x3c1   :  { %3409 = vmatpush2.bf16.msra.mxu1 %v9527_v29  ;;  %3621 = vmatpush2.bf16.msra.mxu0 %v9528_v5 }
 0x3c2   :  { %v2551_v50 = vpop.f32.mrf.mxu1  ;;  %v2734_v52 = vpop.f32.mrf.mxu0  ;;  %3410 = vmatprep.subr.bf16.mxu1 %v12322_v8  ;;  %3622 = vmatprep.subr.bf16.mxu0 %v12322_v8 }
 0x3c3   :  { %v8427_v25 = vpack.c.bf16 %v11152_v2, %v2551_v50 }
 0x3c4   :  { %v2553_v27 = vpop.f32.mrf.mxu1  ;;  %v2736_v9 = vpop.f32.mrf.mxu0 }
 0x3c5   :  { %v8428_v7 = vpack.c.bf16 %v11156_v0, %v2553_v27  ;;  %3411 = vmatpush2.bf16.msra.mxu1 %v9529_v1  ;;  %3623 = vmatpush2.bf16.msra.mxu0 %v9530_v28 }
 0x3c6   :  { %v2555_v12 = vpop.f32.mrf.mxu1  ;;  %v2738_v31 = vpop.f32.mrf.mxu0  ;;  %3412 = vmatprep.subr.bf16.mxu1 %v12322_v8  ;;  %8931 = vmatprep.subr.bf16.mxu0 %v12336_v58 }
 0x3c7   :  { %7935 = vmatprep.mubr.msk.bf16.mxu0 %vm2990_vm4, %v8428_v7  ;;  %v8419_v0 = vpack.c.bf16 %v11160_v42, %v2555_v12 }
 0x3c8   :  { %v2557_v21 = vpop.f32.mrf.mxu1  ;;  %3213 = vmatmul.mubr.bf16.gmra.mxu0 %v8427_v25  ;;  %v2740_v40 = vpop.f32.mrf.mxu0 }
 0x3c9   :  { %v8420_v26 = vpack.c.bf16 %v11165_v33, %v2557_v21  ;;  %3413 = vmatpush2.bf16.msra.mxu1 %v9531_v22 }
 0x3ca   :  { %v11215_v29 = vpop.f32.mrf.mxu1  ;;  %3818 = vmatprep.subr.bf16.mxu1 %v12322_v8  ;;  %v11218_v2 = vpop.f32.mrf.mxu0 }
 0x3cb   :  { %7911 = vmatprep.mubr.msk.bf16.mxu1 %vm2990_vm4, %v8420_v26 }
 0x3cc   :  { %v11221_v5 = vpop.f32.mrf.mxu1  ;;  %3052 = vmatmul.mubr.bf16.gmra.mxu1 %v8419_v0  ;;  %v11223_v56 = vpop.f32.mrf.mxu0 }
 0x3ce   :  { %v11225_v43 = vpop.f32.mrf.mxu1  ;;  %v11227_v3 = vpop.f32.mrf.mxu0 }
 0x3cf   :  { %v8443_v32 = vpack.c.bf16 %v11182_v63, %v11225_v43 }
 0x3d0   :  { %v2567_v33 = vpop.f32.mrf.mxu1  ;;  %v11229_v16 = vpop.f32.mrf.mxu0 }
 0x3d2   :  { %v11231_v42 = vpop.f32.mrf.mxu1  ;;  %v11233_v1 = vpop.f32.mrf.mxu0 }
 0x3d4   :  { %v11237_v50 = vpop.f32.mrf.mxu1  ;;  %v11239_v27 = vpop.f32.mrf.mxu0 }
 0x3d6   :  { %v2575_v22 = vpop.f32.mrf.mxu1  ;;  %v2758_v25 = vpop.f32.mrf.mxu0 }
 0x3d8   :  { %v2576_v12 = vpop.f32.mrf.mxu1  ;;  %v2759_v21 = vpop.f32.mrf.mxu0 }
 0x3da   :  { %v2673_v26 = vpop.f32.mrf.mxu1 }
 0x3db   :  { %v8429_v44 = vpack.c.bf16 %v2734_v52, %v2673_v26 }
 0x3dc   :  { %v2675_v0 = vpop.f32.mrf.mxu1 }
 0x3dd   :  { %v8430_v46 = vpack.c.bf16 %v2736_v9, %v2675_v0  ;;  %v9539_v9 = vld [vmem:[#allocation4 + $0x180] sm:$0xff]  }
 0x3de   :  { %v2677_v38 = vpop.f32.mrf.mxu1 }
 0x3df   :  { %7936 = vmatprep.mubr.msk.bf16.mxu0 %vm2990_vm4, %v8430_v46  ;;  %v8421_v7 = vpack.c.bf16 %v2738_v31, %v2677_v38  ;;  %v9532_v38 = vld [vmem:[#allocation4 + $0x1b8] sm:$0xff]   ;;  %v9537_v46 = vld [vmem:[#allocation4 + $0x190] sm:$0xff]  }
 0x3e0   :  { %v2679_v28 = vpop.f32.mrf.mxu1  ;;  %3221 = vmatmul.mubr.bf16.gmra.mxu0 %v8429_v44  ;;  %v9538_v44 = vld [vmem:[#allocation4 + $0x188] sm:$0xff]   ;;  %v9540_v31 = vld [vmem:[#allocation4 + $0x1d8] sm:$0xff]  }
 0x3e1   :  { %v8422_v60 = vpack.c.bf16 %v2740_v40, %v2679_v28  ;;  %7981 = vmatprep.mubr.msk.bf16.mxu0 %vm2990_vm4, %v8440_v37  ;;  %v8434_v37 = vpack.c.bf16 %v11120_v49, %v11176_v18  ;;  %v8444_v49 = vpack.c.bf16 %v11188_v59, %v2567_v33  ;;  %v8436_v18 = vpack.c.bf16 %v11178_v62, %v11221_v5  ;;  %v9541_v40 = vld [vmem:[#allocation4 + $0x1d0] sm:$0xff]  }
 0x3e2   :  { %v2683_v22 = vpop.f32.mrf.mxu1  ;;  %v8435_v62 = vpack.c.bf16 %v11171_v15, %v11215_v29  ;;  %v12338_v15 = vpack.c.bf16 %v11144_v23, %v11099_v36  ;;  %v9542_v29 = vld [vmem:[#allocation4 + $0x1c8] sm:$0xff]   ;;  %v12339_v36 = vpack.c.bf16 %v11136_v13, %v11097_v41  ;;  %v12340_v23 = vpack.c.bf16 %v11146_v51, %v11198_v11 }
 0x3e3   :  { %7912 = vmatprep.mubr.msk.bf16.mxu1 %vm2990_vm4, %v8422_v60  ;;  %v8437_v63 = vpack.c.bf16 %v11218_v2, %v2683_v22  ;;  %v9543_v2 = vld [vmem:[#allocation4 + $0x1c0] sm:$0xff]   ;;  %v12341_v5 = vpack.c.bf16 %v11138_v10, %v11190_v4  ;;  %v12343_v41 = vpack.c.bf16 %v11192_v35, %v11231_v42 }
 0x3e4   :  { %3060 = vmatmul.mubr.bf16.gmra.mxu1 %v8421_v7  ;;  %v2685_v25 = vpop.f32.mrf.mxu1 }
 0x3e5   :  { %7957 = vmatprep.mubr.msk.bf16.mxu1 %vm2990_vm4, %v8432_v39  ;;  %v8438_v30 = vpack.c.bf16 %v11223_v56, %v2685_v25  ;;  %v12342_v56 = vpack.c.bf16 %v11200_v20, %v11237_v50 }
 0x3e6   :  { %v2687_v52 = vpop.f32.mrf.mxu1 }
 0x3e7   :  { %v8445_v59 = vpack.c.bf16 %v11227_v3, %v2687_v52 }
 0x3e8   :  { %3625 = vmatmul.mubr.bf16.vlgmr.msra.gmra.mxu0 %v8439_v19  ;;  %v2689_v55 = vpop.f32.mrf.mxu1 }
 0x3e9   :  { %7982 = vmatprep.mubr.msk.bf16.mxu0 %vm2990_vm4, %v8442_v24  ;;  %v8446_v53 = vpack.c.bf16 %v11229_v16, %v2689_v55 }
 0x3ea   :  { %v11258_v60 = vpop.f32.mrf.mxu1 }
 0x3eb   :  { %v8453_v47 = vpack.c.bf16 %v11233_v1, %v11258_v60 }
 0x3ec   :  { %3415 = vmatmul.mubr.bf16.vlgmr.msra.gmra.mxu1 %v12337_v61  ;;  %v11267_v39 = vpop.f32.mrf.mxu1 }
 0x3ed   :  { %3819 = vmatpush1.bf16.msra.mxu1 %v9532_v38  ;;  %7958 = vmatprep.mubr.msk.bf16.mxu1 %vm2990_vm4, %v8434_v37  ;;  %v8454_v43 = vpack.c.bf16 %v11239_v27, %v11267_v39 }
 0x3ee   :  { %3820 = vmatprep.subr.bf16.mxu1 %v12322_v8  ;;  %v2697_v19 = vpop.f32.mrf.mxu1 }
 0x3f0   :  { %3633 = vmatmul.mubr.bf16.gmra.mxu0 %v8441_v17  ;;  %v2698_v57 = vpop.f32.mrf.mxu1 }
 0x3f1   :  { %3821 = vmatpush1.bf16.msra.mxu1 %v9533_v14  ;;  %7983 = vmatprep.mubr.msk.bf16.mxu0 %vm2990_vm4, %v8444_v49 }
 0x3f2   :  { %3822 = vmatprep.subr.bf16.mxu1 %v12322_v8 }
 0x3f4   :  { %3423 = vmatmul.mubr.bf16.gmra.mxu1 %v8433_v34 }
 0x3f5   :  { %3823 = vmatpush1.bf16.msra.mxu1 %v9534_v48  ;;  %7959 = vmatprep.mubr.msk.bf16.mxu1 %vm2990_vm4, %v8436_v18 }
 0x3f6   :  { %3824 = vmatprep.subr.bf16.mxu1 %v12322_v8 }
 0x3f8   :  { %3641 = vmatmul.mubr.bf16.gmra.mxu0 %v8443_v32 }
 0x3f9   :  { %3825 = vmatpush1.bf16.msra.mxu1 %v9535_v54  ;;  %7984 = vmatprep.mubr.msk.bf16.mxu0 %vm2990_vm4, %v8446_v53 }
 0x3fa   :  { %3826 = vmatprep.subr.bf16.mxu1 %v12322_v8 }
 0x3fc   :  { %3431 = vmatmul.mubr.bf16.gmra.mxu1 %v8435_v62 }
 0x3fd   :  { %3827 = vmatpush1.bf16.msra.mxu1 %v9536_v45  ;;  %7960 = vmatprep.mubr.msk.bf16.mxu1 %vm2990_vm4, %v8438_v30 }
 0x3fe   :  { %3828 = vmatprep.subr.bf16.mxu1 %v12322_v8 }
 0x400   :  { %3649 = vmatmul.mubr.bf16.gmra.mxu0 %v8445_v59 }
 0x401   :  { %3829 = vmatpush1.bf16.msra.mxu1 %v9537_v46  ;;  %8933 = vmatprep.mubr.msk.bf16.mxu0 %vm9963_vm0, %v12336_v58 }
 0x402   :  { %3830 = vmatprep.subr.bf16.mxu1 %v12322_v8 }
 0x404   :  { %3439 = vmatmul.mubr.bf16.gmra.mxu1 %v8437_v63 }
 0x405   :  { %3831 = vmatpush1.bf16.msra.mxu1 %v9538_v44  ;;  %8005 = vmatprep.mubr.msk.bf16.mxu1 %vm2990_vm4, %v12338_v15 }
 0x406   :  { %3832 = vmatprep.subr.bf16.mxu1 %v12322_v8 }
 0x409   :  { %3833 = vmatpush1.bf16.msra.mxu1 %v9539_v9 }
 0x40a   :  { %3842 = vmatprep.subr.bf16.mxu1 %v12322_v8 }
 0x40d   :  { %3843 = vmatpush2.bf16.msra.mxu1 %v9540_v31 }
 0x40e   :  { %3844 = vmatprep.subr.bf16.mxu1 %v12322_v8 }
 0x411   :  { %3845 = vmatpush2.bf16.msra.mxu1 %v9541_v40 }
 0x412   :  { %3846 = vmatprep.subr.bf16.mxu1 %v12322_v8 }
 0x415   :  { %3847 = vmatpush2.bf16.msra.mxu1 %v9542_v29 }
 0x416   :  { %3848 = vmatprep.subr.bf16.mxu1 %v12322_v8 }
 0x419   :  { %3849 = vmatpush2.bf16.msra.mxu1 %v9543_v2 }
 0x41a   :  { %8959 = vmatprep.subr.bf16.mxu1 %v12336_v58 }
 0x41c   :  { %3851 = vmatmul.mubr.bf16.vlgmr.msra.gmra.mxu1 %v12339_v36 }
 0x41d   :  { %8006 = vmatprep.mubr.msk.bf16.mxu1 %vm2990_vm4, %v12340_v23 }
 0x424   :  { %3859 = vmatmul.mubr.bf16.gmra.mxu1 %v12341_v5 }
 0x425   :  { %8007 = vmatprep.mubr.msk.bf16.mxu1 %vm2990_vm4, %v12342_v56 }
 0x42c   :  { %3867 = vmatmul.mubr.bf16.gmra.mxu1 %v12343_v41 }
 0x42d   :  { %8008 = vmatprep.mubr.msk.bf16.mxu1 %vm2990_vm4, %v8454_v43 }
 0x434   :  { %3875 = vmatmul.mubr.bf16.gmra.mxu1 %v8453_v47 }
 0x435   :  { %8961 = vmatprep.mubr.msk.bf16.mxu1 %vm9963_vm0, %v12336_v58 }
 0x458   :  { %v3198_v13 = vpop.f32.mrf.mxu0 }
 0x45a   :  { %v3200_v10 = vpop.f32.mrf.mxu0 }
 0x45c   :  { %v3037_v51 = vpop.f32.mrf.mxu1  ;;  %v3201_v4 = vpop.f32.mrf.mxu0 }
 0x45d   :  { %v11332_v11 = vadd.f32 %v3198_v13, %v3037_v51 }
 0x45e   :  { %v3039_v20 = vpop.f32.mrf.mxu1  ;;  %v3203_v3 = vpop.f32.mrf.mxu0 }
 0x460   :  { %v3040_v33 = vpop.f32.mrf.mxu1 }
 0x461   :  { %v11334_v35 = vadd.f32 %v3201_v4, %v3040_v33 }
 0x462   :  { %v3042_v16 = vpop.f32.mrf.mxu1 }
 0x470   :  { %v3206_v42 = vpop.f32.mrf.mxu0 }
 0x472   :  { %v3208_v28 = vpop.f32.mrf.mxu0 }
 0x474   :  { %v3045_v50 = vpop.f32.mrf.mxu1  ;;  %v3209_v1 = vpop.f32.mrf.mxu0 }
 0x475   :  { %v11336_v27 = vadd.f32 %v3206_v42, %v3045_v50 }
 0x476   :  { %v3047_v7 = vpop.f32.mrf.mxu1  ;;  %v3211_v12 = vpop.f32.mrf.mxu0 }
 0x478   :  { %v3048_v21 = vpop.f32.mrf.mxu1 }
 0x479   :  { %v3210_v26 = vadd.f32 %v3209_v1, %v3048_v21 }
 0x47a   :  { %v3050_v0 = vpop.f32.mrf.mxu1 }
 0x488   :  { %v3214_v22 = vpop.f32.mrf.mxu0 }
 0x48a   :  { %v3216_v25 = vpop.f32.mrf.mxu0 }
 0x48c   :  { %v3053_v52 = vpop.f32.mrf.mxu1  ;;  %v3217_v24 = vpop.f32.mrf.mxu0 }
 0x48d   :  { %v11338_v55 = vadd.f32 %v3214_v22, %v3053_v52 }
 0x48e   :  { %v3055_v38 = vpop.f32.mrf.mxu1  ;;  %v3219_v60 = vpop.f32.mrf.mxu0 }
 0x48f   :  { %v11349_v38 = vld [vmem:[%s12278_s9] ss:$0 sm:$0xff] }
 0x490   :  { %v3056_v37 = vpop.f32.mrf.mxu1 }
 0x491   :  { %v3218_v47 = vadd.f32 %v3217_v24, %v3056_v37 }
 0x492   :  { %v3058_v61 = vpop.f32.mrf.mxu1 }
 0x4a0   :  { %v3222_v39 = vpop.f32.mrf.mxu0 }
 0x4a2   :  { %v3224_v14 = vpop.f32.mrf.mxu0 }
 0x4a4   :  { %v3061_v17 = vpop.f32.mrf.mxu1  ;;  %v3225_v19 = vpop.f32.mrf.mxu0 }
 0x4a5   :  { %v11340_v49 = vadd.f32 %v3222_v39, %v3061_v17 }
 0x4a6   :  { %v3063_v57 = vpop.f32.mrf.mxu1  ;;  %v3227_v48 = vpop.f32.mrf.mxu0 }
 0x4a8   :  { %v3064_v34 = vpop.f32.mrf.mxu1  ;;  %v3626_v18 = vpop.f32.mrf.mxu0 }
 0x4a9   :  { %v3226_v54 = vadd.f32 %v3225_v19, %v3064_v34 }
 0x4aa   :  { %v3066_v53 = vpop.f32.mrf.mxu1  ;;  %v3628_v32 = vpop.f32.mrf.mxu0 }
 0x4ac   :  { %v3416_v45 = vpop.f32.mrf.mxu1  ;;  %v3629_v30 = vpop.f32.mrf.mxu0 }
 0x4ad   :  { %v3447_v22 = vadd.f32 %v3416_v45, %v11332_v11 }
 0x4ae   :  { %v3418_v62 = vpop.f32.mrf.mxu1  ;;  %v3631_v59 = vpop.f32.mrf.mxu0 }
 0x4af   :  { %v3657_v52 = vadd.f32 %v3626_v18, %v3447_v22 }
 0x4b0   :  { %v3419_v46 = vpop.f32.mrf.mxu1  ;;  %v3634_v63 = vpop.f32.mrf.mxu0 }
 0x4b1   :  { %v3448_v25 = vadd.f32 %v3419_v46, %v11334_v35 }
 0x4b2   :  { %v3421_v44 = vpop.f32.mrf.mxu1  ;;  %v3636_v15 = vpop.f32.mrf.mxu0 }
 0x4b3   :  { %v3658_v39 = vadd.f32 %v3629_v30, %v3448_v25 }
 0x4b4   :  { %v3424_v9 = vpop.f32.mrf.mxu1  ;;  %v3637_v31 = vpop.f32.mrf.mxu0 }
 0x4b6   :  { %v3426_v40 = vpop.f32.mrf.mxu1  ;;  %v3639_v29 = vpop.f32.mrf.mxu0 }
 0x4b8   :  { %v3427_v2 = vpop.f32.mrf.mxu1  ;;  %v3642_v36 = vpop.f32.mrf.mxu0 }
 0x4b9   :  { %v3450_v23 = vadd.f32 %v3427_v2, %v3210_v26 }
 0x4ba   :  { %v3429_v5 = vpop.f32.mrf.mxu1  ;;  %v3644_v56 = vpop.f32.mrf.mxu0 }
 0x4bb   :  { %v3660_v43 = vadd.f32 %v3637_v31, %v3450_v23 }
 0x4bc   :  { %v3432_v41 = vpop.f32.mrf.mxu1  ;;  %v3645_v13 = vpop.f32.mrf.mxu0 }
 0x4bd   :  { %v3451_v53 = vadd.f32 %v3432_v41, %v11338_v55 }
 0x4be   :  { %v3434_v10 = vpop.f32.mrf.mxu1  ;;  %v3647_v51 = vpop.f32.mrf.mxu0 }
 0x4bf   :  { %v3661_v59 = vadd.f32 %v3642_v36, %v3451_v53 }
 0x4c0   :  { %v3435_v4 = vpop.f32.mrf.mxu1  ;;  %v3650_v20 = vpop.f32.mrf.mxu0 }
 0x4c1   :  { %v3452_v3 = vadd.f32 %v3435_v4, %v3218_v47  ;;  %v3449_v47 = vadd.f32 %v3424_v9, %v11336_v27 }
 0x4c2   :  { %v3437_v33 = vpop.f32.mrf.mxu1  ;;  %v3652_v16 = vpop.f32.mrf.mxu0 }
 0x4c3   :  { %v11342_v42 = vadd.f32 %v3645_v13, %v3452_v3  ;;  %v3659_v57 = vadd.f32 %v3634_v63, %v3449_v47  ;;  %v11364_v33 = vld [vmem:[%s12272_s3] sm:$0xff]  }
 0x4c4   :  { %v3440_v28 = vpop.f32.mrf.mxu1  ;;  %v3653_v50 = vpop.f32.mrf.mxu0 }
 0x4c5   :  { %v3453_v63 = vadd.f32 %v3440_v28, %v11340_v49 }
 0x4c6   :  { %v3442_v1 = vpop.f32.mrf.mxu1  ;;  %v3655_v7 = vpop.f32.mrf.mxu0 }
 0x4c7   :  { %v3663_v5 = vadd.f32 %v3650_v20, %v3453_v63 }
 0x4c8   :  { %v3443_v12 = vpop.f32.mrf.mxu1 }
 0x4c9   :  { %v3454_v21 = vadd.f32 %v3443_v12, %v3226_v54 }
 0x4ca   :  { %v3445_v26 = vpop.f32.mrf.mxu1 }
 0x4cb   :  { %v3664_v0 = vadd.f32 %v3653_v50, %v3454_v21 }
 0x4dc   :  { %v3852_v24 = vpop.f32.mrf.mxu1 }
 0x4dd   :  { %v3883_v60 = vadd.f32 %v3852_v24, %v3657_v52  ;;  %v11378_v24 = vld [vmem:[%s12272_s3 + $0x8] sm:$0xff]  }
 0x4de   :  { %v3854_v37 = vpop.f32.mrf.mxu1 }
 0x4df   :  { %v3898_v61 = vadd.f32 %v11349_v38, %v3883_v60 }
 0x4e0   :  { %v3855_v14 = vpop.f32.mrf.mxu1 }
 0x4e1   :  { %v3906_v17 = vmul.f32 0.5, %v3898_v61  ;;  %v3884_v19 = vadd.f32 %v3855_v14, %v3658_v39 }
 0x4e2   :  { %v3857_v11 = vpop.f32.mrf.mxu1 }
 0x4e3   :  { %9815 = vtanh.f32 %v3906_v17  ;;  %v3899_v35 = vadd.f32 %v11349_v38, %v3884_v19 }
 0x4e4   :  { %v3860_v48 = vpop.f32.mrf.mxu1 }
 0x4e5   :  { %v3907_v34 = vmul.f32 0.5, %v3899_v35  ;;  %v3885_v18 = vadd.f32 %v3860_v48, %v3659_v57 }
 0x4e6   :  { %v3862_v54 = vpop.f32.mrf.mxu1 }
 0x4e7   :  { %9817 = vtanh.f32 %v3907_v34  ;;  %v3900_v27 = vadd.f32 %v11349_v38, %v3885_v18 }
 0x4e8   :  { %v3863_v32 = vpop.f32.mrf.mxu1 }
 0x4e9   :  { %v3908_v45 = vmul.f32 0.5, %v3900_v27  ;;  %v3886_v62 = vadd.f32 %v3863_v32, %v3660_v43 }
 0x4ea   :  { %v3865_v30 = vpop.f32.mrf.mxu1 }
 0x4eb   :  { %9819 = vtanh.f32 %v3908_v45  ;;  %v3901_v9 = vadd.f32 %v11349_v38, %v3886_v62 }
 0x4ec   :  { %v3868_v46 = vpop.f32.mrf.mxu1 }
 0x4ed   :  { %v3887_v44 = vadd.f32 %v3868_v46, %v3661_v59  ;;  %v3909_v56 = vmul.f32 0.5, %v3901_v9 }
 0x4ee   :  { %v3870_v15 = vpop.f32.mrf.mxu1 }
 0x4ef   :  { %v3902_v31 = vadd.f32 %v11349_v38, %v3887_v44 }
 0x4f0   :  { %v9816_v40 = vpop.eup %9815  ;;  %v3871_v55 = vpop.f32.mrf.mxu1 }
 0x4f1   :  { %v3910_v29 = vmul.f32 0.5, %v3902_v31  ;;  %v3922_v2 = vmul.f32 0.5, %v9816_v40  ;;  %v3888_v47 = vadd.f32 %v3871_v55, %v11342_v42  ;;  %v11395_v42 = vld [vmem:[%s12272_s3 + $0x10] ss:$0 sps:$4 sm:$0xff]   ;;  %v9547_v40 = vld [vmem:[#allocation6 + $0x28] sm:$0xff]   ;;  %v9548_v55 = vld [vmem:[#allocation6 + $0x58] sm:$0xff]  }
 0x4f2   :  { %v3873_v23 = vpop.f32.mrf.mxu1 }
 0x4f3   :  { %9821 = vtanh.f32 %v3910_v29  ;;  %v3930_v41 = vadd.f32 0.5, %v3922_v2  ;;  %v3903_v17 = vadd.f32 %v11349_v38, %v3888_v47  ;;  %v9549_v29 = vld [vmem:[#allocation6 + $0x20] sm:$0xff]   ;;  %v9550_v2 = vld [vmem:[#allocation6 + $0x50] sm:$0xff]   ;;  %v9551_v23 = vld [vmem:[#allocation6 + $0x18] sm:$0xff]  }
 0x4f4   :  { %v9818_v43 = vpop.eup %9817  ;;  %v3876_v36 = vpop.f32.mrf.mxu1  ;;  %9823 = vtanh.f32 %v3909_v56  ;;  %v9553_v56 = vld [vmem:[#allocation6 + $0x10] sm:$0xff]  }
 0x4f5   :  { %v3889_v13 = vadd.f32 %v3876_v36, %v3663_v5  ;;  %v8455_v10 = vpack.c.bf16 %v3930_v41, %v3930_v41  ;;  %v3923_v51 = vmul.f32 0.5, %v9818_v43  ;;  %v3911_v35 = vmul.f32 0.5, %v3903_v17  ;;  %v9552_v5 = vld [vmem:[#allocation6 + $0x48] sm:$0xff]   ;;  %v9554_v41 = vld [vmem:[#allocation6 + $0x40] sm:$0xff]   ;;  %v9556_v36 = vld [vmem:[#allocation6 + $0x38] sm:$0xff]  }
 0x4f6   :  { %v3878_v49 = vpop.f32.mrf.mxu1  ;;  %v9555_v43 = vld [vmem:[#allocation6 + $0x8] sm:$0xff]  }
 0x4f7   :  { %v3904_v4 = vadd.f32 %v11349_v38, %v3889_v13  ;;  %v3987_v3 = vsel %vm3985_vm5, %v8455_v10, 0  ;;  %v3931_v20 = vadd.f32 0.5, %v3923_v51  ;;  %v9557_v13 = vld [vmem:[#allocation6] sm:$0xff]   ;;  %v9558_v10 = vld [vmem:[#allocation6 + $0x30] sm:$0xff]   ;;  %v9559_v51 = vld [vmem:[#allocation6 + $0xb8] sm:$0xff]  }
 0x4f8   :  { %v9820_v16 = vpop.eup %9819  ;;  %v3879_v28 = vpop.f32.mrf.mxu1  ;;  %8932 = vmatpush3.bf16.msra.mxu0 %v3987_v3  ;;  %v11484_v49 = vld [vmem:[#allocation6 + $0x88] sm:$0xff]  }
 0x4f9   :  { %v3890_v50 = vadd.f32 %v3879_v28, %v3664_v0  ;;  %8945 = vmatprep.subr.bf16.mxu0 %v12336_v58  ;;  %v8456_v1 = vpack.c.bf16 %v3931_v20, %v3931_v20  ;;  %v3924_v7 = vmul.f32 0.5, %v9820_v16  ;;  %v3912_v21 = vmul.f32 0.5, %v3904_v4 }
 0x4fa   :  { %v3881_v12 = vpop.f32.mrf.mxu1 }
 0x4fb   :  { %v3905_v26 = vadd.f32 %v11349_v38, %v3890_v50  ;;  %8934 = vmatmul.mubr.msk.bf16.vlgmr.msra.gmra.mxu0 %vm3975_vm6, %v11364_v33  ;;  %v4046_v22 = vsel %vm3985_vm5, %v8456_v1, 0  ;;  %v3932_v25 = vadd.f32 0.5, %v3924_v7  ;;  %9825 = vtanh.f32 %v3912_v21 }
 0x4fc   :  { %8946 = vmatpush3.bf16.msra.mxu0 %v4046_v22  ;;  %8937 = vmatprep.mubr.msk.bf16.mxu0 %vm9963_vm0, %v12336_v58  ;;  %9827 = vtanh.f32 %v3911_v35 }
 0x4fd   :  { %v8457_v52 = vpack.c.bf16 %v3932_v25, %v3932_v25  ;;  %8973 = vmatprep.subr.bf16.mxu0 %v12336_v58  ;;  %v3913_v30 = vmul.f32 0.5, %v3905_v26 }
 0x4ff   :  { %v4105_v0 = vsel %vm3985_vm5, %v8457_v52, 0  ;;  %9829 = vtanh.f32 %v3913_v30 }
 0x500   :  { %v9822_v60 = vpop.eup %9821  ;;  %8960 = vmatpush3.bf16.msra.mxu1 %v4105_v0 }
 0x501   :  { %8987 = vmatprep.subr.bf16.mxu1 %v12336_v58  ;;  %v3926_v37 = vmul.f32 0.5, %v9822_v60  ;;  %v9824_v39 = vpop.eup %9823 }
 0x502   :  { %v3925_v11 = vmul.f32 0.5, %v9824_v39 }
 0x503   :  { %8938 = vmatmul.mubr.msk.bf16.gmra.mxu0 %vm3975_vm6, %v11378_v24  ;;  %8962 = vmatmul.mubr.msk.bf16.vlgmr.msra.gmra.mxu1 %vm3975_vm6, %v11364_v33  ;;  %v3934_v61 = vadd.f32 0.5, %v3926_v37 }
 0x504   :  { %8941 = vmatprep.mubr.msk.bf16.mxu0 %vm9963_vm0, %v12336_v58  ;;  %8965 = vmatprep.mubr.msk.bf16.mxu1 %vm9963_vm0, %v12336_v58  ;;  %v3933_v57 = vadd.f32 0.5, %v3925_v11 }
 0x505   :  { %v8459_v14 = vpack.c.bf16 %v3934_v61, %v3934_v61 }
 0x506   :  { %v8458_v48 = vpack.c.bf16 %v3933_v57, %v3933_v57 }
 0x507   :  { %v4223_v19 = vsel %vm3985_vm5, %v8459_v14, 0 }
 0x508   :  { %8988 = vmatpush3.bf16.msra.mxu1 %v4223_v19  ;;  %v9826_v38 = vpop.eup %9825  ;;  %v4164_v18 = vsel %vm3985_vm5, %v8458_v48, 0 }
 0x509   :  { %9015 = vmatprep.subr.bf16.mxu1 %v12336_v58  ;;  %v3928_v34 = vmul.f32 0.5, %v9826_v38  ;;  %v9828_v32 = vpop.eup %9827 }
 0x50a   :  { %v3927_v45 = vmul.f32 0.5, %v9828_v32 }
 0x50b   :  { %8942 = vmatmul.mubr.msk.bf16.gmra.mxu0 %vm3975_vm6, %v11395_v42  ;;  %8966 = vmatmul.mubr.msk.bf16.gmra.mxu1 %vm3975_vm6, %v11378_v24  ;;  %v3936_v54 = vadd.f32 0.5, %v3928_v34 }
 0x50c   :  { %8947 = vmatprep.mubr.msk.bf16.mxu0 %vm9963_vm0, %v12336_v58  ;;  %8969 = vmatprep.mubr.msk.bf16.mxu1 %vm9963_vm0, %v12336_v58  ;;  %v3935_v62 = vadd.f32 0.5, %v3927_v45  ;;  %v9830_v44 = vpop.eup %9829 }
 0x50d   :  { %v8461_v53 = vpack.c.bf16 %v3936_v54, %v3936_v54  ;;  %v3929_v15 = vmul.f32 0.5, %v9830_v44 }
 0x50e   :  { %v8460_v59 = vpack.c.bf16 %v3935_v62, %v3935_v62 }
 0x50f   :  { %v4341_v27 = vsel %vm3985_vm5, %v8461_v53, 0  ;;  %v3937_v63 = vadd.f32 0.5, %v3929_v15 }
 0x510   :  { %v4282_v46 = vsel %vm3985_vm5, %v8460_v59, 0 }
 0x511   :  { %v8462_v9 = vpack.c.bf16 %v3937_v63, %v3937_v63 }
 0x513   :  { %8948 = vmatmul.mubr.msk.bf16.vlgmr.msra.gmra.mxu0 %vm3975_vm6, %v11364_v33  ;;  %8970 = vmatmul.mubr.msk.bf16.gmra.mxu1 %vm3975_vm6, %v11395_v42  ;;  %v4400_v31 = vsel %vm3985_vm5, %v8462_v9, 0 }
 0x514   :  { %8974 = vmatpush3.bf16.msra.mxu0 %v4164_v18  ;;  %8951 = vmatprep.mubr.msk.bf16.mxu0 %vm9963_vm0, %v12336_v58 }
 0x515   :  { %8989 = vmatprep.mubr.msk.bf16.mxu1 %vm9963_vm0, %v12336_v58  ;;  %9001 = vmatprep.subr.bf16.mxu0 %v12336_v58 }
 0x51b   :  { %8952 = vmatmul.mubr.msk.bf16.gmra.mxu0 %vm3975_vm6, %v11378_v24  ;;  %8990 = vmatmul.mubr.msk.bf16.vlgmr.msra.gmra.mxu1 %vm3975_vm6, %v11364_v33 }
 0x51c   :  { %9016 = vmatpush3.bf16.msra.mxu1 %v4341_v27  ;;  %8955 = vmatprep.mubr.msk.bf16.mxu0 %vm9963_vm0, %v12336_v58 }
 0x51d   :  { %8993 = vmatprep.mubr.msk.bf16.mxu1 %vm9963_vm0, %v12336_v58  ;;  %9043 = vmatprep.subr.bf16.mxu1 %v9548_v55 }
 0x523   :  { %8956 = vmatmul.mubr.msk.bf16.gmra.mxu0 %vm3975_vm6, %v11395_v42  ;;  %8994 = vmatmul.mubr.msk.bf16.gmra.mxu1 %vm3975_vm6, %v11378_v24 }
 0x524   :  { %8975 = vmatprep.mubr.msk.bf16.mxu0 %vm9963_vm0, %v12336_v58  ;;  %8997 = vmatprep.mubr.msk.bf16.mxu1 %vm9963_vm0, %v12336_v58 }
 0x52b   :  { %8976 = vmatmul.mubr.msk.bf16.vlgmr.msra.gmra.mxu0 %vm3975_vm6, %v11364_v33  ;;  %8998 = vmatmul.mubr.msk.bf16.gmra.mxu1 %vm3975_vm6, %v11395_v42 }
 0x52c   :  { %9002 = vmatpush3.bf16.msra.mxu0 %v4282_v46  ;;  %8979 = vmatprep.mubr.msk.bf16.mxu0 %vm9963_vm0, %v12336_v58 }
 0x52d   :  { %9029 = vmatprep.subr.bf16.mxu0 %v12336_v58  ;;  %9017 = vmatprep.mubr.msk.bf16.mxu1 %vm9963_vm0, %v12336_v58 }
 0x533   :  { %8980 = vmatmul.mubr.msk.bf16.gmra.mxu0 %vm3975_vm6, %v11378_v24  ;;  %9018 = vmatmul.mubr.msk.bf16.vlgmr.msra.gmra.mxu1 %vm3975_vm6, %v11364_v33 }
 0x534   :  { %8983 = vmatprep.mubr.msk.bf16.mxu0 %vm9963_vm0, %v12336_v58  ;;  %9021 = vmatprep.mubr.msk.bf16.mxu1 %vm9963_vm0, %v12336_v58 }
 0x535   :  { %9044 = vmatpush3.bf16.msra.mxu1 %v9548_v55 }
 0x536   :  { %9045 = vmatprep.subr.bf16.mxu1 %v9550_v2 }
 0x539   :  { %9046 = vmatpush3.bf16.msra.mxu1 %v9550_v2 }
 0x53a   :  { %9047 = vmatprep.subr.bf16.mxu1 %v9552_v5 }
 0x53b   :  { %8984 = vmatmul.mubr.msk.bf16.gmra.mxu0 %vm3975_vm6, %v11395_v42  ;;  %9022 = vmatmul.mubr.msk.bf16.gmra.mxu1 %vm3975_vm6, %v11378_v24 }
 0x53c   :  { %9003 = vmatprep.mubr.msk.bf16.mxu0 %vm9963_vm0, %v12336_v58  ;;  %9025 = vmatprep.mubr.msk.bf16.mxu1 %vm9963_vm0, %v12336_v58 }
 0x53d   :  { %9048 = vmatpush3.bf16.msra.mxu1 %v9552_v5 }
 0x53e   :  { %9049 = vmatprep.subr.bf16.mxu1 %v9554_v41 }
 0x541   :  { %9050 = vmatpush3.bf16.msra.mxu1 %v9554_v41  ;;  %v9561_v41 = vld [vmem:[#allocation6 + $0xb0] sm:$0xff]  }
 0x542   :  { %9051 = vmatprep.subr.bf16.mxu1 %v9556_v36 }
 0x543   :  { %9004 = vmatmul.mubr.msk.bf16.vlgmr.msra.gmra.mxu0 %vm3975_vm6, %v11364_v33  ;;  %9026 = vmatmul.mubr.msk.bf16.gmra.mxu1 %vm3975_vm6, %v11395_v42 }
 0x544   :  { %9030 = vmatpush3.bf16.msra.mxu0 %v4400_v31  ;;  %9007 = vmatprep.mubr.msk.bf16.mxu0 %vm9963_vm0, %v12336_v58 }
 0x545   :  { %9063 = vmatprep.subr.bf16.mxu0 %v9547_v40  ;;  %9052 = vmatpush3.bf16.msra.mxu1 %v9556_v36 }
 0x546   :  { %9053 = vmatprep.subr.bf16.mxu1 %v9558_v10 }
 0x549   :  { %9054 = vmatpush3.bf16.msra.mxu1 %v9558_v10 }
 0x54a   :  { %9083 = vmatprep.subr.bf16.mxu1 %v11484_v49 }
 0x54b   :  { %9008 = vmatmul.mubr.msk.bf16.gmra.mxu0 %vm3975_vm6, %v11378_v24 }
 0x54c   :  { %9011 = vmatprep.mubr.msk.bf16.mxu0 %vm9963_vm0, %v12336_v58 }
 0x553   :  { %9012 = vmatmul.mubr.msk.bf16.gmra.mxu0 %vm3975_vm6, %v11395_v42 }
 0x554   :  { %9031 = vmatprep.mubr.msk.bf16.mxu0 %vm9963_vm0, %v12336_v58 }
 0x55b   :  { %9032 = vmatmul.mubr.msk.bf16.vlgmr.msra.gmra.mxu0 %vm3975_vm6, %v11364_v33 }
 0x55c   :  { %9035 = vmatprep.mubr.msk.bf16.mxu0 %vm9963_vm0, %v12336_v58  ;;  %9064 = vmatpush3.bf16.msra.mxu0 %v9547_v40 }
 0x55d   :  { %9065 = vmatprep.subr.bf16.mxu0 %v9549_v29 }
 0x560   :  { %9066 = vmatpush3.bf16.msra.mxu0 %v9549_v29 }
 0x561   :  { %9067 = vmatprep.subr.bf16.mxu0 %v9551_v23 }
 0x563   :  { %9036 = vmatmul.mubr.msk.bf16.gmra.mxu0 %vm3975_vm6, %v11378_v24 }
 0x564   :  { %9039 = vmatprep.mubr.msk.bf16.mxu0 %vm9963_vm0, %v12336_v58  ;;  %9068 = vmatpush3.bf16.msra.mxu0 %v9551_v23 }
 0x565   :  { %9069 = vmatprep.subr.bf16.mxu0 %v9553_v56 }
 0x568   :  { %9070 = vmatpush3.bf16.msra.mxu0 %v9553_v56 }
 0x569   :  { %9071 = vmatprep.subr.bf16.mxu0 %v9555_v43 }
 0x56b   :  { %9040 = vmatmul.mubr.msk.bf16.gmra.mxu0 %vm3975_vm6, %v11395_v42 }
 0x56c   :  { %9072 = vmatpush3.bf16.msra.mxu0 %v9555_v43 }
 0x56d   :  { %9073 = vmatprep.subr.bf16.mxu0 %v9557_v13 }
 0x570   :  { %9074 = vmatpush3.bf16.msra.mxu0 %v9557_v13 }
 0x571   :  { %9103 = vmatprep.subr.bf16.mxu0 %v9559_v51 }
 0x5bb   :  { %v4023_v4 = vpop.f32.mrf.mxu0 }
 0x5bd   :  { %v8935_v3 = vpop.f32.mrf.mxu0 }
 0x5be   :  { %v9562_v3 = vld [vmem:[#allocation6 + $0x80] sm:$0xff]  }
 0x5bf   :  { %v4026_v20 = vpop.f32.mrf.mxu0 }
 0x5c1   :  { %v8936_v16 = vpop.f32.mrf.mxu0 }
 0x5c3   :  { %v11487_v28 = vpop.f32.mrf.mxu0  ;;  %v4141_v50 = vpop.f32.mrf.mxu1 }
 0x5c5   :  { %v8939_v1 = vpop.f32.mrf.mxu0  ;;  %v8963_v7 = vpop.f32.mrf.mxu1 }
 0x5c7   :  { %v11489_v12 = vpop.f32.mrf.mxu0  ;;  %v4144_v21 = vpop.f32.mrf.mxu1 }
 0x5c9   :  { %v8940_v26 = vpop.f32.mrf.mxu0  ;;  %v8964_v22 = vpop.f32.mrf.mxu1 }
 0x5ca   :  { %v9564_v26 = vld [vmem:[#allocation6 + $0x78] sm:$0xff]  }
 0x5cb   :  { %v11491_v25 = vpop.f32.mrf.mxu0  ;;  %v11493_v52 = vpop.f32.mrf.mxu1 }
 0x5cd   :  { %v8943_v0 = vpop.f32.mrf.mxu0  ;;  %v8967_v60 = vpop.f32.mrf.mxu1 }
 0x5cf   :  { %v4042_v37 = vpop.f32.mrf.mxu0  ;;  %v11495_v47 = vpop.f32.mrf.mxu1 }
 0x5d0   :  { %v9566_v37 = vld [vmem:[#allocation6 + $0x70] sm:$0xff]  }
 0x5d1   :  { %v8944_v61 = vpop.f32.mrf.mxu0  ;;  %v8968_v39 = vpop.f32.mrf.mxu1 }
 0x5d2   :  { %v9567_v61 = vld [vmem:[#allocation6 + $0x98] sm:$0xff]  }
 0x5d3   :  { %v4082_v14 = vpop.f32.mrf.mxu0  ;;  %v11497_v17 = vpop.f32.mrf.mxu1 }
 0x5d4   :  { %v8467_v19 = vpack.c.bf16 %v4082_v14, %v4023_v4 }
 0x5d5   :  { %v8949_v11 = vpop.f32.mrf.mxu0  ;;  %v8971_v35 = vpop.f32.mrf.mxu1 }
 0x5d6   :  { %9075 = vmatprep.mubr.msk.bf16.mxu0 %vm1001_vm2, %v8467_v19  ;;  %v9568_v35 = vld [vmem:[#allocation6 + $0x68] sm:$0xff]  }
 0x5d7   :  { %v4085_v57 = vpop.f32.mrf.mxu0  ;;  %v4160_v38 = vpop.f32.mrf.mxu1 }
 0x5d8   :  { %v8463_v48 = vpack.c.bf16 %v4085_v57, %v4026_v20  ;;  %v9563_v20 = vld [vmem:[#allocation6 + $0xa8] sm:$0xff]   ;;  %v9569_v57 = vld [vmem:[#allocation6 + $0x90] sm:$0xff]  }
 0x5d9   :  { %v8950_v34 = vpop.f32.mrf.mxu0  ;;  %v8972_v18 = vpop.f32.mrf.mxu1 }
 0x5da   :  { %9055 = vmatprep.mubr.msk.bf16.mxu1 %vm1001_vm2, %v8463_v48 }
 0x5db   :  { %v11501_v54 = vpop.f32.mrf.mxu0  ;;  %v11503_v53 = vpop.f32.mrf.mxu1 }
 0x5dc   :  { %v8471_v27 = vpack.c.bf16 %v11501_v54, %v11487_v28 }
 0x5dd   :  { %v8953_v32 = vpop.f32.mrf.mxu0  ;;  %v8991_v45 = vpop.f32.mrf.mxu1 }
 0x5de   :  { %v9570_v32 = vld [vmem:[#allocation6 + $0x60] sm:$0xff]  }
 0x5df   :  { %v11507_v30 = vpop.f32.mrf.mxu0  ;;  %v11509_v62 = vpop.f32.mrf.mxu1 }
 0x5e1   :  { %v8954_v59 = vpop.f32.mrf.mxu0  ;;  %v8992_v46 = vpop.f32.mrf.mxu1 }
 0x5e3   :  { %v11511_v44 = vpop.f32.mrf.mxu0  ;;  %v11513_v15 = vpop.f32.mrf.mxu1 }
 0x5e4   :  { %v8479_v63 = vpack.c.bf16 %v11511_v44, %v11491_v25 }
 0x5e5   :  { %v8957_v9 = vpop.f32.mrf.mxu0  ;;  %v8995_v31 = vpop.f32.mrf.mxu1 }
 0x5e7   :  { %v4101_v40 = vpop.f32.mrf.mxu0  ;;  %v11517_v55 = vpop.f32.mrf.mxu1 }
 0x5e8   :  { %v9571_v40 = vld [vmem:[#allocation6 + $0xe8] sm:$0xff]  }
 0x5e9   :  { %v8958_v29 = vpop.f32.mrf.mxu0  ;;  %v8996_v2 = vpop.f32.mrf.mxu1 }
 0x5eb   :  { %v4200_v23 = vpop.f32.mrf.mxu0  ;;  %v11519_v5 = vpop.f32.mrf.mxu1 }
 0x5ec   :  { %v8468_v56 = vpack.c.bf16 %v4200_v23, %v4141_v50 }
 0x5ed   :  { %v8977_v43 = vpop.f32.mrf.mxu0  ;;  %v8999_v36 = vpop.f32.mrf.mxu1 }
 0x5ee   :  { %9076 = vmatmul.mubr.msk.bf16.vlgmr.msra.gmra.mxu0 %vm1001_vm2, %v8468_v56 }
 0x5ef   :  { %v4203_v13 = vpop.f32.mrf.mxu0  ;;  %9104 = vmatpush3.bf16.msra.mxu0 %v9559_v51  ;;  %v4278_v10 = vpop.f32.mrf.mxu1  ;;  %v9565_v51 = vld [vmem:[#allocation6 + $0xa0] sm:$0xff]  }
 0x5f0   :  { %v8464_v4 = vpack.c.bf16 %v4203_v13, %v4144_v21  ;;  %9105 = vmatprep.subr.bf16.mxu0 %v9561_v41 }
 0x5f1   :  { %v8978_v16 = vpop.f32.mrf.mxu0  ;;  %v9000_v1 = vpop.f32.mrf.mxu1 }
 0x5f2   :  { %9056 = vmatmul.mubr.msk.bf16.vlgmr.msra.gmra.mxu1 %vm1001_vm2, %v8464_v4 }
 0x5f3   :  { %v11523_v7 = vpop.f32.mrf.mxu0  ;;  %9084 = vmatpush3.bf16.msra.mxu1 %v11484_v49  ;;  %9106 = vmatpush3.bf16.msra.mxu0 %v9561_v41  ;;  %v11526_v50 = vpop.f32.mrf.mxu1 }
 0x5f4   :  { %9085 = vmatprep.subr.bf16.mxu1 %v9562_v3  ;;  %9107 = vmatprep.subr.bf16.mxu0 %v9563_v20 }
 0x5f5   :  { %v8981_v22 = vpop.f32.mrf.mxu0  ;;  %v9019_v21 = vpop.f32.mrf.mxu1 }
 0x5f6   :  { %v8475_v22 = vpack.c.bf16 %v11507_v30, %v11489_v12 }
 0x5f7   :  { %v11528_v0 = vpop.f32.mrf.mxu0  ;;  %9086 = vmatpush3.bf16.msra.mxu1 %v9562_v3  ;;  %9108 = vmatpush3.bf16.msra.mxu0 %v9563_v20  ;;  %v11530_v60 = vpop.f32.mrf.mxu1 }
 0x5f8   :  { %9087 = vmatprep.subr.bf16.mxu1 %v9564_v26  ;;  %9109 = vmatprep.subr.bf16.mxu0 %v9565_v51  ;;  %v8476_v12 = vpack.c.bf16 %v11528_v0, %v11495_v47 }
 0x5f9   :  { %v8982_v49 = vpop.f32.mrf.mxu0  ;;  %v9020_v39 = vpop.f32.mrf.mxu1 }
 0x5fa   :  { %v8472_v39 = vpack.c.bf16 %v11523_v7, %v11493_v52 }
 0x5fb   :  { %v11532_v14 = vpop.f32.mrf.mxu0  ;;  %9088 = vmatpush3.bf16.msra.mxu1 %v9564_v26  ;;  %9110 = vmatpush3.bf16.msra.mxu0 %v9565_v51  ;;  %v11534_v19 = vpop.f32.mrf.mxu1 }
 0x5fc   :  { %v8480_v11 = vpack.c.bf16 %v11532_v14, %v11497_v17  ;;  %9089 = vmatprep.subr.bf16.mxu1 %v9566_v37  ;;  %9111 = vmatprep.subr.bf16.mxu0 %v9567_v61 }
 0x5fd   :  { %v8985_v38 = vpop.f32.mrf.mxu0  ;;  %v9023_v48 = vpop.f32.mrf.mxu1 }
 0x5fe   :  { %v9576_v38 = vld [vmem:[#allocation6 + $0xc0] sm:$0xff]  }
 0x5ff   :  { %v4219_v34 = vpop.f32.mrf.mxu0  ;;  %9090 = vmatpush3.bf16.msra.mxu1 %v9566_v37  ;;  %9112 = vmatpush3.bf16.msra.mxu0 %v9567_v61  ;;  %v11538_v18 = vpop.f32.mrf.mxu1 }
 0x600   :  { %9091 = vmatprep.subr.bf16.mxu1 %v9568_v35  ;;  %9113 = vmatprep.subr.bf16.mxu0 %v9569_v57 }
 0x601   :  { %v8986_v45 = vpop.f32.mrf.mxu0  ;;  %v9024_v59 = vpop.f32.mrf.mxu1 }
 0x603   :  { %v4318_v46 = vpop.f32.mrf.mxu0  ;;  %9092 = vmatpush3.bf16.msra.mxu1 %v9568_v35  ;;  %9114 = vmatpush3.bf16.msra.mxu0 %v9569_v57  ;;  %v11540_v9 = vpop.f32.mrf.mxu1  ;;  %v9572_v35 = vld [vmem:[#allocation6 + $0xe0] sm:$0xff]  }
 0x604   :  { %v8469_v31 = vpack.c.bf16 %v4318_v46, %v11503_v53  ;;  %9093 = vmatprep.subr.bf16.mxu1 %v9570_v32  ;;  %9143 = vmatprep.subr.bf16.mxu0 %v12336_v58 }
 0x605   :  { %v9005_v29 = vpop.f32.mrf.mxu0  ;;  %v9027_v2 = vpop.f32.mrf.mxu1 }
 0x606   :  { %9079 = vmatprep.mubr.msk.bf16.mxu0 %vm1001_vm2, %v8469_v31 }
 0x607   :  { %v4321_v23 = vpop.f32.mrf.mxu0  ;;  %9094 = vmatpush3.bf16.msra.mxu1 %v9570_v32  ;;  %v4396_v56 = vpop.f32.mrf.mxu1 }
 0x608   :  { %v8465_v41 = vpack.c.bf16 %v4321_v23, %v11509_v62  ;;  %9123 = vmatprep.subr.bf16.mxu1 %v9571_v40 }
 0x609   :  { %v9006_v43 = vpop.f32.mrf.mxu0  ;;  %v9028_v36 = vpop.f32.mrf.mxu1 }
 0x60a   :  { %9059 = vmatprep.mubr.msk.bf16.mxu1 %vm1001_vm2, %v8465_v41 }
 0x60b   :  { %v4326_v13 = vpop.f32.mrf.mxu0 }
 0x60c   :  { %v8473_v28 = vpack.c.bf16 %v4326_v13, %v11513_v15  ;;  %v9574_v15 = vld [vmem:[#allocation6 + $0xd0] sm:$0xff]  }
 0x60d   :  { %v9009_v53 = vpop.f32.mrf.mxu0 }
 0x60f   :  { %v4329_v10 = vpop.f32.mrf.mxu0 }
 0x610   :  { %v8477_v30 = vpack.c.bf16 %v4329_v10, %v11517_v55  ;;  %v9573_v55 = vld [vmem:[#allocation6 + $0xd8] sm:$0xff]  }
 0x611   :  { %v9010_v4 = vpop.f32.mrf.mxu0 }
 0x613   :  { %v4334_v3 = vpop.f32.mrf.mxu0 }
 0x614   :  { %v8481_v48 = vpack.c.bf16 %v4334_v3, %v11519_v5 }
 0x615   :  { %v9013_v20 = vpop.f32.mrf.mxu0 }
 0x617   :  { %v4337_v16 = vpop.f32.mrf.mxu0 }
 0x619   :  { %v9014_v1 = vpop.f32.mrf.mxu0 }
 0x61b   :  { %v4436_v26 = vpop.f32.mrf.mxu0 }
 0x61c   :  { %v8470_v51 = vpack.c.bf16 %v4436_v26, %v11526_v50 }
 0x61d   :  { %v9033_v62 = vpop.f32.mrf.mxu0 }
 0x61e   :  { %9080 = vmatmul.mubr.msk.bf16.gmra.mxu0 %vm1001_vm2, %v8470_v51 }
 0x61f   :  { %v4439_v21 = vpop.f32.mrf.mxu0  ;;  %9115 = vmatprep.mubr.msk.bf16.mxu0 %vm1001_vm2, %v8475_v22 }
 0x620   :  { %v8466_v37 = vpack.c.bf16 %v4439_v21, %v11530_v60 }
 0x621   :  { %v9034_v61 = vpop.f32.mrf.mxu0 }
 0x622   :  { %9060 = vmatmul.mubr.msk.bf16.gmra.mxu1 %vm1001_vm2, %v8466_v37  ;;  %v11604_v61 = vld [vmem:[%s12279_s10] ss:$0 sm:$0xff] }
 0x623   :  { %9095 = vmatprep.mubr.msk.bf16.mxu1 %vm1001_vm2, %v8471_v27  ;;  %v4444_v50 = vpop.f32.mrf.mxu0 }
 0x624   :  { %v8474_v57 = vpack.c.bf16 %v4444_v50, %v11534_v19  ;;  %v9575_v19 = vld [vmem:[#allocation6 + $0xc8] sm:$0xff]  }
 0x625   :  { %v9037_v49 = vpop.f32.mrf.mxu0 }
 0x626   :  { %9116 = vmatmul.mubr.msk.bf16.vlgmr.msra.gmra.mxu0 %vm1001_vm2, %v8476_v12 }
 0x627   :  { %9119 = vmatprep.mubr.msk.bf16.mxu0 %vm1001_vm2, %v8477_v30  ;;  %v4447_v60 = vpop.f32.mrf.mxu0 }
 0x628   :  { %v8478_v27 = vpack.c.bf16 %v4447_v60, %v11538_v18 }
 0x629   :  { %v9038_v54 = vpop.f32.mrf.mxu0 }
 0x62a   :  { %9096 = vmatmul.mubr.msk.bf16.vlgmr.msra.gmra.mxu1 %vm1001_vm2, %v8472_v39 }
 0x62b   :  { %9124 = vmatpush3.bf16.msra.mxu1 %v9571_v40  ;;  %9099 = vmatprep.mubr.msk.bf16.mxu1 %vm1001_vm2, %v8473_v28  ;;  %v4452_v47 = vpop.f32.mrf.mxu0 }
 0x62c   :  { %9125 = vmatprep.subr.bf16.mxu1 %v9572_v35  ;;  %v8482_v25 = vpack.c.bf16 %v4452_v47, %v11540_v9 }
 0x62d   :  { %v9041_v0 = vpop.f32.mrf.mxu0 }
 0x62e   :  { %9120 = vmatmul.mubr.msk.bf16.gmra.mxu0 %vm1001_vm2, %v8478_v27 }
 0x62f   :  { %9126 = vmatpush3.bf16.msra.mxu1 %v9572_v35  ;;  %v4455_v52 = vpop.f32.mrf.mxu0  ;;  %9145 = vmatprep.mubr.msk.bf16.mxu0 %vm9963_vm0, %v12336_v58 }
 0x630   :  { %9127 = vmatprep.subr.bf16.mxu1 %v9573_v55 }
 0x631   :  { %v9042_v7 = vpop.f32.mrf.mxu0 }
 0x632   :  { %9100 = vmatmul.mubr.msk.bf16.gmra.mxu1 %vm1001_vm2, %v8474_v57 }
 0x633   :  { %9128 = vmatpush3.bf16.msra.mxu1 %v9573_v55  ;;  %9135 = vmatprep.mubr.msk.bf16.mxu1 %vm1001_vm2, %v8479_v63 }
 0x634   :  { %9129 = vmatprep.subr.bf16.mxu1 %v9574_v15 }
 0x637   :  { %9130 = vmatpush3.bf16.msra.mxu1 %v9574_v15 }
 0x638   :  { %9131 = vmatprep.subr.bf16.mxu1 %v9575_v19 }
 0x63b   :  { %9132 = vmatpush3.bf16.msra.mxu1 %v9575_v19 }
 0x63c   :  { %9133 = vmatprep.subr.bf16.mxu1 %v9576_v38 }
 0x63f   :  { %9134 = vmatpush3.bf16.msra.mxu1 %v9576_v38 }
 0x640   :  { %9157 = vmatprep.subr.bf16.mxu1 %v12336_v58 }
 0x642   :  { %9136 = vmatmul.mubr.msk.bf16.vlgmr.msra.gmra.mxu1 %vm1001_vm2, %v8480_v11 }
 0x643   :  { %9139 = vmatprep.mubr.msk.bf16.mxu1 %vm1001_vm2, %v8481_v48 }
 0x64a   :  { %9140 = vmatmul.mubr.msk.bf16.gmra.mxu1 %vm1001_vm2, %v8482_v25 }
 0x64b   :  { %9159 = vmatprep.mubr.msk.bf16.mxu1 %vm9963_vm0, %v12336_v58 }
 0x6ae   :  { %v9077_v34 = vpop.f32.mrf.mxu0 }
 0x6b0   :  { %v4734_v32 = vpop.f32.mrf.mxu0 }
 0x6b2   :  { %v9057_v44 = vpop.f32.mrf.mxu1  ;;  %v9078_v45 = vpop.f32.mrf.mxu0 }
 0x6b3   :  { %v4743_v53 = vadd.f32 %v9077_v34, %v9057_v44 }
 0x6b4   :  { %v4609_v63 = vpop.f32.mrf.mxu1  ;;  %v4737_v14 = vpop.f32.mrf.mxu0 }
 0x6b5   :  { %v4735_v3 = vadd.f32 %v4734_v32, %v4609_v63 }
 0x6b6   :  { %v9058_v18 = vpop.f32.mrf.mxu1 }
 0x6b7   :  { %v4746_v16 = vadd.f32 %v9078_v45, %v9058_v18 }
 0x6b8   :  { %v4612_v5 = vpop.f32.mrf.mxu1 }
 0x6b9   :  { %v4738_v22 = vadd.f32 %v4737_v14, %v4612_v5 }
 0x6de   :  { %v11593_v46 = vpop.f32.mrf.mxu0 }
 0x6e0   :  { %v4750_v40 = vpop.f32.mrf.mxu0 }
 0x6e2   :  { %v11589_v59 = vpop.f32.mrf.mxu1  ;;  %v11595_v23 = vpop.f32.mrf.mxu0 }
 0x6e4   :  { %v4625_v17 = vpop.f32.mrf.mxu1  ;;  %v4753_v41 = vpop.f32.mrf.mxu0 }
 0x6e5   :  { %v4751_v48 = vadd.f32 %v4750_v40, %v4625_v17 }
 0x6e6   :  { %v11591_v11 = vpop.f32.mrf.mxu1  ;;  %v9117_v36 = vpop.f32.mrf.mxu0 }
 0x6e8   :  { %v4628_v9 = vpop.f32.mrf.mxu1  ;;  %v5026_v10 = vpop.f32.mrf.mxu0 }
 0x6e9   :  { %v4754_v45 = vadd.f32 %v4753_v41, %v4628_v9 }
 0x6ea   :  { %v9097_v31 = vpop.f32.mrf.mxu1  ;;  %v9118_v1 = vpop.f32.mrf.mxu0 }
 0x6eb   :  { %v4913_v20 = vadd.f32 %v9097_v31, %v4743_v53 }
 0x6ec   :  { %v4880_v29 = vpop.f32.mrf.mxu1  ;;  %v5029_v50 = vpop.f32.mrf.mxu0 }
 0x6ed   :  { %v4911_v26 = vadd.f32 %v4880_v29, %v4735_v3  ;;  %v5059_v21 = vadd.f32 %v9117_v36, %v4913_v20 }
 0x6ee   :  { %v9098_v2 = vpop.f32.mrf.mxu1  ;;  %v11607_v54 = vpop.f32.mrf.mxu0 }
 0x6ef   :  { %v4914_v62 = vadd.f32 %v9098_v2, %v4746_v16  ;;  %v5057_v49 = vadd.f32 %v5026_v10, %v4911_v26 }
 0x6f0   :  { %v4883_v56 = vpop.f32.mrf.mxu1  ;;  %v5042_v38 = vpop.f32.mrf.mxu0 }
 0x6f1   :  { %v4912_v12 = vadd.f32 %v4883_v56, %v4738_v22  ;;  %v5060_v28 = vadd.f32 %v9118_v1, %v4914_v62 }
 0x6f2   :  { %v11597_v43 = vpop.f32.mrf.mxu1  ;;  %v9122_v5 = vpop.f32.mrf.mxu0 }
 0x6f3   :  { %v5058_v57 = vadd.f32 %v5029_v50, %v4912_v12 }
 0x6f4   :  { %v4896_v13 = vpop.f32.mrf.mxu1  ;;  %v5045_v2 = vpop.f32.mrf.mxu0 }
 0x6f5   :  { %v4915_v34 = vadd.f32 %v4896_v13, %v4751_v48 }
 0x6f6   :  { %v11599_v4 = vpop.f32.mrf.mxu1 }
 0x6f7   :  { %v5061_v29 = vadd.f32 %v5042_v38, %v4915_v34 }
 0x6f8   :  { %v4899_v51 = vpop.f32.mrf.mxu1 }
 0x6f9   :  { %v4916_v31 = vadd.f32 %v4899_v51, %v4754_v45 }
 0x6fb   :  { %v5062_v17 = vadd.f32 %v5045_v2, %v4916_v31 }
 0x702   :  { %v9137_v37 = vpop.f32.mrf.mxu1 }
 0x703   :  { %v5213_v30 = vadd.f32 %v9137_v37, %v5059_v21 }
 0x704   :  { %v5180_v60 = vpop.f32.mrf.mxu1 }
 0x705   :  { %v5228_v39 = vadd.f32 %v11604_v61, %v5213_v30  ;;  %v5211_v35 = vadd.f32 %v5180_v60, %v5057_v49 }
 0x706   :  { %v9138_v27 = vpop.f32.mrf.mxu1 }
 0x707   :  { %v5236_v47 = vmul.f32 0.5, %v5228_v39  ;;  %v5226_v55 = vadd.f32 %v11604_v61, %v5211_v35  ;;  %v5214_v0 = vadd.f32 %v9138_v27, %v5060_v28  ;;  %v4759_v39 = vadd.f32 %v11593_v46, %v11589_v59 }
 0x708   :  { %v5183_v52 = vpop.f32.mrf.mxu1  ;;  %v4762_v59 = vadd.f32 %v11595_v23, %v11591_v11 }
 0x709   :  { %9831 = vtanh.f32 %v5236_v47  ;;  %v5234_v15 = vmul.f32 0.5, %v5226_v55  ;;  %v5229_v7 = vadd.f32 %v11604_v61, %v5214_v0  ;;  %v5212_v19 = vadd.f32 %v5183_v52, %v5058_v57 }
 0x70a   :  { %v11611_v25 = vpop.f32.mrf.mxu1  ;;  %v4917_v47 = vadd.f32 %v11597_v43, %v4759_v39  ;;  %v4918_v43 = vadd.f32 %v11599_v4, %v4762_v59 }
 0x70b   :  { %9833 = vtanh.f32 %v5234_v15  ;;  %v5237_v44 = vmul.f32 0.5, %v5229_v7  ;;  %v5227_v63 = vadd.f32 %v11604_v61, %v5212_v19 }
 0x70c   :  { %v5196_v18 = vpop.f32.mrf.mxu1  ;;  %v5063_v55 = vadd.f32 %v11607_v54, %v4917_v47  ;;  %v5064_v11 = vadd.f32 %v9122_v5, %v4918_v43 }
 0x70d   :  { %9835 = vtanh.f32 %v5237_v44  ;;  %v5235_v32 = vmul.f32 0.5, %v5227_v63  ;;  %v5215_v56 = vadd.f32 %v5196_v18, %v5061_v29 }
 0x70e   :  { %v9142_v14 = vpop.f32.mrf.mxu1  ;;  %v5217_v57 = vadd.f32 %v11611_v25, %v5063_v55 }
 0x70f   :  { %9837 = vtanh.f32 %v5235_v32  ;;  %v5230_v53 = vadd.f32 %v11604_v61, %v5215_v56  ;;  %v5218_v52 = vadd.f32 %v9142_v14, %v5064_v11 }
 0x710   :  { %v5199_v36 = vpop.f32.mrf.mxu1  ;;  %v5232_v23 = vadd.f32 %v11604_v61, %v5217_v57 }
 0x711   :  { %v5216_v10 = vadd.f32 %v5199_v36, %v5062_v17  ;;  %v5238_v1 = vmul.f32 0.5, %v5230_v53  ;;  %v5233_v7 = vadd.f32 %v11604_v61, %v5218_v52  ;;  %v9865_v36 = vld [vmem:[%s12272_s3] sm:$0xff]   ;;  %v9582_v53 = vld [vmem:[#allocation7 + $0x18] sm:$0xff]  }
 0x712   :  { %v5240_v15 = vmul.f32 0.5, %v5232_v23 }
 0x713   :  { %v5231_v26 = vadd.f32 %v11604_v61, %v5216_v10  ;;  %9839 = vtanh.f32 %v5238_v1  ;;  %v5241_v48 = vmul.f32 0.5, %v5233_v7  ;;  %v9866_v10 = vld [vmem:[%s12272_s3 + $0x8] sm:$0xff]   ;;  %v9867_v1 = vld [vmem:[%s12272_s3 + $0x10] ss:$0 sps:$4 sm:$0xff]  }
 0x715   :  { %v5239_v37 = vmul.f32 0.5, %v5231_v26  ;;  %v9585_v26 = vld [vmem:[#allocation7 + $0x38] sm:$0xff]  }
 0x716   :  { %v9832_v40 = vpop.eup %9831 }
 0x717   :  { %v5252_v3 = vmul.f32 0.5, %v9832_v40  ;;  %9841 = vtanh.f32 %v5239_v37  ;;  %v9580_v40 = vld [vmem:[#allocation7 + $0x20] sm:$0xff]  }
 0x718   :  { %v9834_v20 = vpop.eup %9833  ;;  %9843 = vtanh.f32 %v5240_v15 }
 0x719   :  { %v5250_v13 = vmul.f32 0.5, %v9834_v20  ;;  %v5260_v41 = vadd.f32 0.5, %v5252_v3  ;;  %9845 = vtanh.f32 %v5241_v48  ;;  %v9581_v3 = vld [vmem:[#allocation7 + $0x48] sm:$0xff]   ;;  %v9584_v20 = vld [vmem:[#allocation7 + $0x10] sm:$0xff]  }
 0x71a   :  { %v9836_v16 = vpop.eup %9835 }
 0x71b   :  { %v5258_v9 = vadd.f32 0.5, %v5250_v13  ;;  %v5253_v22 = vmul.f32 0.5, %v9836_v16  ;;  %v8485_v30 = vpack.c.bf16 %v5260_v41, %v5260_v41  ;;  %v9583_v13 = vld [vmem:[#allocation7 + $0x40] sm:$0xff]   ;;  %v9586_v16 = vld [vmem:[#allocation7 + $0x8] sm:$0xff]   ;;  %v9590_v41 = vld [vmem:[#allocation7 + $0xb8] sm:$0xff]  }
 0x71c   :  { %v9838_v51 = vpop.eup %9837 }
 0x71d   :  { %v8483_v62 = vpack.c.bf16 %v5258_v9, %v5258_v9  ;;  %v5251_v21 = vmul.f32 0.5, %v9838_v51  ;;  %v5261_v49 = vadd.f32 0.5, %v5253_v22  ;;  %v5409_v28 = vsel %vm3985_vm5, %v8485_v30, 0  ;;  %v9588_v9 = vld [vmem:[#allocation7] sm:$0xff]   ;;  %v9589_v22 = vld [vmem:[#allocation7 + $0x88] sm:$0xff]  }
 0x71f   :  { %v5291_v50 = vsel %vm3985_vm5, %v8483_v62, 0  ;;  %v5259_v12 = vadd.f32 0.5, %v5251_v21  ;;  %v8486_v27 = vpack.c.bf16 %v5261_v49, %v5261_v49 }
 0x720   :  { %9144 = vmatpush3.bf16.msra.mxu0 %v5291_v50  ;;  %v9840_v0 = vpop.eup %9839 }
 0x721   :  { %9171 = vmatprep.subr.bf16.mxu0 %v12336_v58  ;;  %v8484_v60 = vpack.c.bf16 %v5259_v12, %v5259_v12  ;;  %v5468_v46 = vsel %vm3985_vm5, %v8486_v27, 0  ;;  %v5254_v4 = vmul.f32 0.5, %v9840_v0 }
 0x723   :  { %9146 = vmatmul.mubr.msk.bf16.vlgmr.msra.gmra.mxu0 %vm3975_vm6, %v11364_v33  ;;  %v5350_v35 = vsel %vm3985_vm5, %v8484_v60, 0  ;;  %v5262_v19 = vadd.f32 0.5, %v5254_v4 }
 0x724   :  { %9158 = vmatpush3.bf16.msra.mxu1 %v5350_v35  ;;  %9172 = vmatpush3.bf16.msra.mxu0 %v5409_v28  ;;  %v9842_v54 = vpop.eup %9841 }
 0x725   :  { %9185 = vmatprep.subr.bf16.mxu1 %v12336_v58  ;;  %9149 = vmatprep.mubr.msk.bf16.mxu0 %vm9963_vm0, %v12336_v58  ;;  %v5255_v38 = vmul.f32 0.5, %v9842_v54  ;;  %v8487_v25 = vpack.c.bf16 %v5262_v19, %v5262_v19  ;;  %v9844_v18 = vpop.eup %9843 }
 0x726   :  { %9199 = vmatprep.subr.bf16.mxu0 %v12336_v58  ;;  %v5256_v32 = vmul.f32 0.5, %v9844_v18  ;;  %v9846_v5 = vpop.eup %9845 }
 0x727   :  { %9160 = vmatmul.mubr.msk.bf16.vlgmr.msra.gmra.mxu1 %vm3975_vm6, %v11364_v33  ;;  %v5263_v44 = vadd.f32 0.5, %v5255_v38  ;;  %v5527_v61 = vsel %vm3985_vm5, %v8487_v25, 0  ;;  %v5257_v14 = vmul.f32 0.5, %v9846_v5 }
 0x728   :  { %9186 = vmatpush3.bf16.msra.mxu1 %v5468_v46  ;;  %9163 = vmatprep.mubr.msk.bf16.mxu1 %vm9963_vm0, %v12336_v58  ;;  %v5264_v45 = vadd.f32 0.5, %v5256_v32 }
 0x729   :  { %9213 = vmatprep.subr.bf16.mxu1 %v12336_v58  ;;  %v8488_v63 = vpack.c.bf16 %v5263_v44, %v5263_v44  ;;  %v5265_v29 = vadd.f32 0.5, %v5257_v14  ;;  %v9591_v14 = vld [vmem:[#allocation7 + $0x80] sm:$0xff]  }
 0x72a   :  { %v8489_v31 = vpack.c.bf16 %v5264_v45, %v5264_v45 }
 0x72b   :  { %9150 = vmatmul.mubr.msk.bf16.gmra.mxu0 %vm3975_vm6, %v11378_v24  ;;  %v5586_v34 = vsel %vm3985_vm5, %v8488_v63, 0  ;;  %v8490_v56 = vpack.c.bf16 %v5265_v29, %v5265_v29  ;;  %v9592_v63 = vld [vmem:[#allocation7 + $0xb0] sm:$0xff]  }
 0x72c   :  { %9153 = vmatprep.mubr.msk.bf16.mxu0 %vm9963_vm0, %v12336_v58  ;;  %v5645_v2 = vsel %vm3985_vm5, %v8489_v31, 0  ;;  %v9594_v31 = vld [vmem:[#allocation7 + $0xa8] sm:$0xff]  }
 0x72d   :  { %v5704_v17 = vsel %vm3985_vm5, %v8490_v56, 0 }
 0x72f   :  { %9164 = vmatmul.mubr.msk.bf16.gmra.mxu1 %vm3975_vm6, %v11378_v24 }
 0x730   :  { %9167 = vmatprep.mubr.msk.bf16.mxu1 %vm9963_vm0, %v12336_v58 }
 0x733   :  { %9154 = vmatmul.mubr.msk.bf16.gmra.mxu0 %vm3975_vm6, %v11395_v42 }
 0x734   :  { %9173 = vmatprep.mubr.msk.bf16.mxu0 %vm9963_vm0, %v12336_v58 }
 0x737   :  { %9168 = vmatmul.mubr.msk.bf16.gmra.mxu1 %vm3975_vm6, %v11395_v42 }
 0x738   :  { %9187 = vmatprep.mubr.msk.bf16.mxu1 %vm9963_vm0, %v12336_v58 }
 0x73b   :  { %9174 = vmatmul.mubr.msk.bf16.vlgmr.msra.gmra.mxu0 %vm3975_vm6, %v11364_v33 }
 0x73c   :  { %9200 = vmatpush3.bf16.msra.mxu0 %v5527_v61  ;;  %9177 = vmatprep.mubr.msk.bf16.mxu0 %vm9963_vm0, %v12336_v58 }
 0x73d   :  { %9227 = vmatprep.subr.bf16.mxu0 %v12336_v58 }
 0x73f   :  { %9188 = vmatmul.mubr.msk.bf16.vlgmr.msra.gmra.mxu1 %vm3975_vm6, %v11364_v33 }
 0x740   :  { %9214 = vmatpush3.bf16.msra.mxu1 %v5586_v34  ;;  %9191 = vmatprep.mubr.msk.bf16.mxu1 %vm9963_vm0, %v12336_v58 }
 0x741   :  { %9241 = vmatprep.subr.bf16.mxu1 %v12336_v58 }
 0x743   :  { %9178 = vmatmul.mubr.msk.bf16.gmra.mxu0 %vm3975_vm6, %v11378_v24 }
 0x744   :  { %9181 = vmatprep.mubr.msk.bf16.mxu0 %vm9963_vm0, %v12336_v58 }
 0x747   :  { %9192 = vmatmul.mubr.msk.bf16.gmra.mxu1 %vm3975_vm6, %v11378_v24 }
 0x748   :  { %9195 = vmatprep.mubr.msk.bf16.mxu1 %vm9963_vm0, %v12336_v58 }
 0x74b   :  { %9182 = vmatmul.mubr.msk.bf16.gmra.mxu0 %vm3975_vm6, %v11395_v42 }
 0x74c   :  { %9201 = vmatprep.mubr.msk.bf16.mxu0 %vm9963_vm0, %v12336_v58 }
 0x74f   :  { %9196 = vmatmul.mubr.msk.bf16.gmra.mxu1 %vm3975_vm6, %v11395_v42 }
 0x750   :  { %9215 = vmatprep.mubr.msk.bf16.mxu1 %vm9963_vm0, %v12336_v58 }
 0x753   :  { %9202 = vmatmul.mubr.msk.bf16.vlgmr.msra.gmra.mxu0 %vm3975_vm6, %v11364_v33  ;;  %v9578_v33 = vld [vmem:[#allocation7 + $0x28] sm:$0xff]  }
 0x754   :  { %9228 = vmatpush3.bf16.msra.mxu0 %v5645_v2  ;;  %9205 = vmatprep.mubr.msk.bf16.mxu0 %vm9963_vm0, %v12336_v58 }
 0x757   :  { %9216 = vmatmul.mubr.msk.bf16.vlgmr.msra.gmra.mxu1 %vm3975_vm6, %v9865_v36 }
 0x758   :  { %9242 = vmatpush3.bf16.msra.mxu1 %v5704_v17  ;;  %9219 = vmatprep.mubr.msk.bf16.mxu1 %vm9963_vm0, %v12336_v58  ;;  %v9593_v17 = vld [vmem:[#allocation7 + $0x78] sm:$0xff]  }
 0x759   :  { %9275 = vmatprep.subr.bf16.mxu1 %v9578_v33 }
 0x75b   :  { %9206 = vmatmul.mubr.msk.bf16.gmra.mxu0 %vm3975_vm6, %v11378_v24 }
 0x75c   :  { %9209 = vmatprep.mubr.msk.bf16.mxu0 %vm9963_vm0, %v12336_v58 }
 0x75f   :  { %9220 = vmatmul.mubr.msk.bf16.gmra.mxu1 %vm3975_vm6, %v11378_v24  ;;  %v9577_v24 = vld [vmem:[#allocation7 + $0x58] sm:$0xff]  }
 0x760   :  { %9223 = vmatprep.mubr.msk.bf16.mxu1 %vm9963_vm0, %v12336_v58  ;;  %9255 = vmatprep.subr.bf16.mxu0 %v9577_v24 }
 0x763   :  { %9210 = vmatmul.mubr.msk.bf16.gmra.mxu0 %vm3975_vm6, %v11395_v42 }
 0x764   :  { %9229 = vmatprep.mubr.msk.bf16.mxu0 %vm9963_vm0, %v12336_v58 }
 0x767   :  { %9224 = vmatmul.mubr.msk.bf16.gmra.mxu1 %vm3975_vm6, %v11395_v42  ;;  %v9579_v42 = vld [vmem:[#allocation7 + $0x50] sm:$0xff]  }
 0x768   :  { %9243 = vmatprep.mubr.msk.bf16.mxu1 %vm9963_vm0, %v12336_v58 }
 0x76b   :  { %9230 = vmatmul.mubr.msk.bf16.vlgmr.msra.gmra.mxu0 %vm3975_vm6, %v9865_v36 }
 0x76c   :  { %9233 = vmatprep.mubr.msk.bf16.mxu0 %vm9963_vm0, %v12336_v58  ;;  %9256 = vmatpush3.bf16.msra.mxu0 %v9577_v24 }
 0x76d   :  { %9257 = vmatprep.subr.bf16.mxu0 %v9579_v42 }
 0x76f   :  { %9244 = vmatmul.mubr.msk.bf16.vlgmr.msra.gmra.mxu1 %vm3975_vm6, %v9865_v36 }
 0x770   :  { %9247 = vmatprep.mubr.msk.bf16.mxu1 %vm9963_vm0, %v12336_v58  ;;  %9276 = vmatpush3.bf16.msra.mxu1 %v9578_v33  ;;  %v9596_v33 = vld [vmem:[#allocation7 + $0xa0] sm:$0xff]  }
 0x771   :  { %9277 = vmatprep.subr.bf16.mxu1 %v9580_v40  ;;  %9258 = vmatpush3.bf16.msra.mxu0 %v9579_v42 }
 0x772   :  { %9259 = vmatprep.subr.bf16.mxu0 %v9581_v3 }
 0x773   :  { %9234 = vmatmul.mubr.msk.bf16.gmra.mxu0 %vm3975_vm6, %v9866_v10 }
 0x774   :  { %9237 = vmatprep.mubr.msk.bf16.mxu0 %vm9963_vm0, %v12336_v58  ;;  %9278 = vmatpush3.bf16.msra.mxu1 %v9580_v40 }
 0x775   :  { %9279 = vmatprep.subr.bf16.mxu1 %v9582_v53  ;;  %9260 = vmatpush3.bf16.msra.mxu0 %v9581_v3  ;;  %v9598_v3 = vld [vmem:[#allocation7 + $0x98] sm:$0xff]  }
 0x776   :  { %9261 = vmatprep.subr.bf16.mxu0 %v9583_v13 }
 0x777   :  { %9248 = vmatmul.mubr.msk.bf16.gmra.mxu1 %vm3975_vm6, %v9866_v10  ;;  %v9595_v10 = vld [vmem:[#allocation7 + $0x70] sm:$0xff]  }
 0x778   :  { %9251 = vmatprep.mubr.msk.bf16.mxu1 %vm9963_vm0, %v12336_v58  ;;  %9280 = vmatpush3.bf16.msra.mxu1 %v9582_v53  ;;  %v9587_v58 = vld [vmem:[#allocation7 + $0x30] sm:$0xff]  }
 0x779   :  { %9281 = vmatprep.subr.bf16.mxu1 %v9584_v20  ;;  %9262 = vmatpush3.bf16.msra.mxu0 %v9583_v13 }
 0x77a   :  { %9263 = vmatprep.subr.bf16.mxu0 %v9585_v26 }
 0x77b   :  { %9238 = vmatmul.mubr.msk.bf16.gmra.mxu0 %vm3975_vm6, %v9867_v1 }
 0x77c   :  { %9282 = vmatpush3.bf16.msra.mxu1 %v9584_v20 }
 0x77d   :  { %9283 = vmatprep.subr.bf16.mxu1 %v9586_v16  ;;  %9264 = vmatpush3.bf16.msra.mxu0 %v9585_v26 }
 0x77e   :  { %9265 = vmatprep.subr.bf16.mxu0 %v9587_v58 }
 0x77f   :  { %9252 = vmatmul.mubr.msk.bf16.gmra.mxu1 %vm3975_vm6, %v9867_v1 }
 0x780   :  { %9284 = vmatpush3.bf16.msra.mxu1 %v9586_v16 }
 0x781   :  { %9285 = vmatprep.subr.bf16.mxu1 %v9588_v9  ;;  %9266 = vmatpush3.bf16.msra.mxu0 %v9587_v58  ;;  %v9600_v58 = vld [vmem:[#allocation7 + $0x90] sm:$0xff]  }
 0x782   :  { %9295 = vmatprep.subr.bf16.mxu0 %v9589_v22 }
 0x784   :  { %9286 = vmatpush3.bf16.msra.mxu1 %v9588_v9  ;;  %v9597_v9 = vld [vmem:[#allocation7 + $0x68] sm:$0xff]  }
 0x785   :  { %9315 = vmatprep.subr.bf16.mxu1 %v9590_v41 }
 0x7e3   :  { %v5327_v51 = vpop.f32.mrf.mxu0 }
 0x7e5   :  { %v9147_v62 = vpop.f32.mrf.mxu0 }
 0x7e7   :  { %v5386_v21 = vpop.f32.mrf.mxu1  ;;  %v5330_v37 = vpop.f32.mrf.mxu0 }
 0x7e8   :  { %v8495_v50 = vpack.c.bf16 %v5386_v21, %v5327_v51  ;;  %v9599_v21 = vld [vmem:[#allocation7 + $0x60] sm:$0xff]  }
 0x7e9   :  { %v9161_v12 = vpop.f32.mrf.mxu1  ;;  %v9148_v30 = vpop.f32.mrf.mxu0 }
 0x7ea   :  { %9287 = vmatprep.mubr.msk.bf16.mxu1 %vm1001_vm2, %v8495_v50 }
 0x7eb   :  { %v5389_v49 = vpop.f32.mrf.mxu1  ;;  %v11735_v60 = vpop.f32.mrf.mxu0 }
 0x7ec   :  { %v8491_v39 = vpack.c.bf16 %v5389_v49, %v5330_v37 }
 0x7ed   :  { %v9162_v35 = vpop.f32.mrf.mxu1  ;;  %v9151_v28 = vpop.f32.mrf.mxu0 }
 0x7ee   :  { %9267 = vmatprep.mubr.msk.bf16.mxu0 %vm1001_vm2, %v8491_v39  ;;  %v9601_v39 = vld [vmem:[#allocation7 + $0xe8] sm:$0xff]  }
 0x7ef   :  { %v11738_v27 = vpop.f32.mrf.mxu1  ;;  %v11740_v47 = vpop.f32.mrf.mxu0 }
 0x7f0   :  { %v8499_v59 = vpack.c.bf16 %v11738_v27, %v11735_v60  ;;  %v9602_v60 = vld [vmem:[#allocation7 + $0xe0] sm:$0xff]  }
 0x7f1   :  { %v9165_v46 = vpop.f32.mrf.mxu1  ;;  %v9152_v43 = vpop.f32.mrf.mxu0 }
 0x7f3   :  { %v11744_v55 = vpop.f32.mrf.mxu1  ;;  %v11746_v0 = vpop.f32.mrf.mxu0 }
 0x7f5   :  { %v9166_v57 = vpop.f32.mrf.mxu1  ;;  %v9155_v11 = vpop.f32.mrf.mxu0 }
 0x7f7   :  { %v11748_v23 = vpop.f32.mrf.mxu1  ;;  %v5346_v52 = vpop.f32.mrf.mxu0 }
 0x7f8   :  { %v8507_v4 = vpack.c.bf16 %v11748_v23, %v11746_v0  ;;  %v9609_v23 = vld [vmem:[%s12281_s12 + $0x54] ss:$8 sps:$4 sm:$0xff]  }
 0x7f9   :  { %v9169_v54 = vpop.f32.mrf.mxu1  ;;  %v9156_v15 = vpop.f32.mrf.mxu0 }
 0x7fb   :  { %v5405_v7 = vpop.f32.mrf.mxu1  ;;  %v5445_v19 = vpop.f32.mrf.mxu0 }
 0x7fd   :  { %v9170_v38 = vpop.f32.mrf.mxu1  ;;  %v9175_v48 = vpop.f32.mrf.mxu0 }
 0x7ff   :  { %v5504_v25 = vpop.f32.mrf.mxu1  ;;  %v5448_v44 = vpop.f32.mrf.mxu0 }
 0x800   :  { %v8496_v61 = vpack.c.bf16 %v5504_v25, %v5445_v19 }
 0x801   :  { %v9189_v34 = vpop.f32.mrf.mxu1  ;;  %v9176_v18 = vpop.f32.mrf.mxu0 }
 0x802   :  { %9288 = vmatmul.mubr.msk.bf16.vlgmr.msra.gmra.mxu1 %vm1001_vm2, %v8496_v61 }
 0x803   :  { %v5507_v32 = vpop.f32.mrf.mxu1  ;;  %v11753_v5 = vpop.f32.mrf.mxu0  ;;  %9316 = vmatpush3.bf16.msra.mxu1 %v9590_v41 }
 0x804   :  { %v8492_v45 = vpack.c.bf16 %v5507_v32, %v5448_v44  ;;  %9317 = vmatprep.subr.bf16.mxu1 %v9592_v63 }
 0x805   :  { %v9190_v29 = vpop.f32.mrf.mxu1  ;;  %v9179_v2 = vpop.f32.mrf.mxu0 }
 0x806   :  { %9268 = vmatmul.mubr.msk.bf16.vlgmr.msra.gmra.mxu0 %vm1001_vm2, %v8492_v45 }
 0x807   :  { %v11756_v56 = vpop.f32.mrf.mxu1  ;;  %v11758_v36 = vpop.f32.mrf.mxu0  ;;  %9296 = vmatpush3.bf16.msra.mxu0 %v9589_v22  ;;  %9318 = vmatpush3.bf16.msra.mxu1 %v9592_v63 }
 0x808   :  { %9297 = vmatprep.subr.bf16.mxu0 %v9591_v14  ;;  %9319 = vmatprep.subr.bf16.mxu1 %v9594_v31 }
 0x809   :  { %v9193_v24 = vpop.f32.mrf.mxu1  ;;  %v9180_v40 = vpop.f32.mrf.mxu0 }
 0x80b   :  { %v11760_v42 = vpop.f32.mrf.mxu1  ;;  %v11762_v53 = vpop.f32.mrf.mxu0  ;;  %9298 = vmatpush3.bf16.msra.mxu0 %v9591_v14  ;;  %9320 = vmatpush3.bf16.msra.mxu1 %v9594_v31 }
 0x80c   :  { %9299 = vmatprep.subr.bf16.mxu0 %v9593_v17  ;;  %9321 = vmatprep.subr.bf16.mxu1 %v9596_v33 }
 0x80d   :  { %v9194_v20 = vpop.f32.mrf.mxu1  ;;  %v9183_v13 = vpop.f32.mrf.mxu0 }
 0x80f   :  { %v11764_v16 = vpop.f32.mrf.mxu1  ;;  %v5464_v1 = vpop.f32.mrf.mxu0  ;;  %9300 = vmatpush3.bf16.msra.mxu0 %v9593_v17  ;;  %9322 = vmatpush3.bf16.msra.mxu1 %v9596_v33  ;;  %v8503_v33 = vpack.c.bf16 %v11744_v55, %v11740_v47  ;;  %v8504_v55 = vpack.c.bf16 %v11760_v42, %v11758_v36 }
 0x810   :  { %v8508_v26 = vpack.c.bf16 %v11764_v16, %v11762_v53  ;;  %9301 = vmatprep.subr.bf16.mxu0 %v9595_v10  ;;  %9323 = vmatprep.subr.bf16.mxu1 %v9598_v3  ;;  %v9607_v53 = vld [vmem:[%s12281_s12 + $0x50] ss:$8 sps:$4 sm:$0xff]  }
 0x811   :  { %v9197_v41 = vpop.f32.mrf.mxu1  ;;  %v9184_v22 = vpop.f32.mrf.mxu0  ;;  %v9610_v16 = vld [vmem:[%s12281_s12 + $0xb0] ss:$8 sps:$4 sm:$0xff]  }
 0x813   :  { %v5523_v51 = vpop.f32.mrf.mxu1  ;;  %v5563_v62 = vpop.f32.mrf.mxu0  ;;  %9302 = vmatpush3.bf16.msra.mxu0 %v9595_v10  ;;  %9324 = vmatpush3.bf16.msra.mxu1 %v9598_v3 }
 0x814   :  { %9303 = vmatprep.subr.bf16.mxu0 %v9597_v9  ;;  %9325 = vmatprep.subr.bf16.mxu1 %v9600_v58 }
 0x815   :  { %v9198_v37 = vpop.f32.mrf.mxu1  ;;  %v9203_v50 = vpop.f32.mrf.mxu0 }
 0x817   :  { %v5622_v12 = vpop.f32.mrf.mxu1  ;;  %v5566_v30 = vpop.f32.mrf.mxu0  ;;  %9304 = vmatpush3.bf16.msra.mxu0 %v9597_v9  ;;  %9326 = vmatpush3.bf16.msra.mxu1 %v9600_v58 }
 0x818   :  { %v8497_v49 = vpack.c.bf16 %v5622_v12, %v5563_v62  ;;  %9305 = vmatprep.subr.bf16.mxu0 %v9599_v21  ;;  %v9603_v12 = vld [vmem:[#allocation7 + $0xd8] sm:$0xff]   ;;  %6704 = vmatprep.subr.bf16.mxu1 %v9609_v23 }
 0x819   :  { %v9217_v35 = vpop.f32.mrf.mxu1  ;;  %v9204_v28 = vpop.f32.mrf.mxu0 }
 0x81a   :  { %9291 = vmatprep.mubr.msk.bf16.mxu1 %vm1001_vm2, %v8497_v49 }
 0x81b   :  { %v5625_v46 = vpop.f32.mrf.mxu1  ;;  %v5571_v43 = vpop.f32.mrf.mxu0  ;;  %9306 = vmatpush3.bf16.msra.mxu0 %v9599_v21  ;;  %v8500_v21 = vpack.c.bf16 %v11756_v56, %v11753_v5  ;;  %v9604_v56 = vld [vmem:[#allocation7 + $0xd0] sm:$0xff]  }
 0x81c   :  { %v8493_v57 = vpack.c.bf16 %v5625_v46, %v5566_v30  ;;  %9335 = vmatprep.subr.bf16.mxu0 %v9601_v39  ;;  %v9606_v46 = vld [vmem:[#allocation7 + $0xc0] sm:$0xff]  }
 0x81d   :  { %v9218_v11 = vpop.f32.mrf.mxu1  ;;  %v9207_v52 = vpop.f32.mrf.mxu0 }
 0x81e   :  { %9271 = vmatprep.mubr.msk.bf16.mxu0 %vm1001_vm2, %v8493_v57  ;;  %v9618_v57 = vld [vmem:[%s12281_s12 + $0xa4] ss:$8 sps:$4 sm:$0xff]   ;;  %v9613_v11 = vld [vmem:[%s12281_s12 + $0x40] ss:$8 sps:$4 sm:$0xff]  }
 0x81f   :  { %v5630_v54 = vpop.f32.mrf.mxu1  ;;  %v5574_v15 = vpop.f32.mrf.mxu0  ;;  %v9616_v52 = vld [vmem:[%s12281_s12 + $0xa0] ss:$8 sps:$4 sm:$0xff]  }
 0x820   :  { %v8501_v27 = vpack.c.bf16 %v5630_v54, %v5571_v43  ;;  %v9621_v54 = vld [vmem:[%s12281_s12 + $0x34] ss:$8 sps:$4 sm:$0xff]  }
 0x821   :  { %v9221_v7 = vpop.f32.mrf.mxu1  ;;  %v9208_v19 = vpop.f32.mrf.mxu0 }
 0x822   :  { %v9619_v7 = vld [vmem:[%s12281_s12 + $0x30] ss:$8 sps:$4 sm:$0xff]  }
 0x823   :  { %v5633_v38 = vpop.f32.mrf.mxu1  ;;  %v11770_v48 = vpop.f32.mrf.mxu0  ;;  %v9622_v19 = vld [vmem:[%s12281_s12 + $0x90] ss:$8 sps:$4 sm:$0xff]  }
 0x824   :  { %v8505_v58 = vpack.c.bf16 %v5633_v38, %v5574_v15  ;;  %v9624_v15 = vld [vmem:[%s12281_s12 + $0x94] ss:$8 sps:$4 sm:$0xff]   ;;  %v9627_v38 = vld [vmem:[%s12281_s12 + $0x24] ss:$8 sps:$4 sm:$0xff]  }
 0x825   :  { %v9222_v25 = vpop.f32.mrf.mxu1  ;;  %v9211_v44 = vpop.f32.mrf.mxu0 }
 0x826   :  { %v9625_v25 = vld [vmem:[%s12281_s12 + $0x20] ss:$8 sps:$4 sm:$0xff]  }
 0x827   :  { %v11772_v61 = vpop.f32.mrf.mxu1  ;;  %v5582_v63 = vpop.f32.mrf.mxu0  ;;  %v9628_v44 = vld [vmem:[%s12281_s12 + $0x80] ss:$8 sps:$4 sm:$0xff]  }
 0x828   :  { %v8509_v43 = vpack.c.bf16 %v11772_v61, %v11770_v48  ;;  %v9630_v48 = vld [vmem:[%s12281_s12 + $0x84] ss:$8 sps:$4 sm:$0xff]   ;;  %v9633_v61 = vld [vmem:[%s12281_s12 + $0x14] ss:$8 sps:$4 sm:$0xff]  }
 0x829   :  { %v9225_v34 = vpop.f32.mrf.mxu1  ;;  %v9212_v18 = vpop.f32.mrf.mxu0  ;;  %v9636_v63 = vld [vmem:[%s12281_s12 + $0x74] ss:$8 sps:$4 sm:$0xff]  }
 0x82a   :  { %v9631_v34 = vld [vmem:[%s12281_s12 + $0x10] ss:$8 sps:$4 sm:$0xff]  }
 0x82b   :  { %v5641_v32 = vpop.f32.mrf.mxu1  ;;  %v5681_v45 = vpop.f32.mrf.mxu0  ;;  %v9634_v18 = vld [vmem:[%s12281_s12 + $0x70] ss:$8 sps:$4 sm:$0xff]  }
 0x82c   :  { %v9639_v32 = vld [vmem:[%s12281_s12 + $0x4] ss:$8 sps:$4 sm:$0xff]  }
 0x82d   :  { %v9226_v14 = vpop.f32.mrf.mxu1  ;;  %v9231_v31 = vpop.f32.mrf.mxu0 }
 0x82e   :  { %v9637_v14 = vld [vmem:[%s12281_s12] ss:$8 sps:$4 sm:$0xff]  }
 0x82f   :  { %v5740_v29 = vpop.f32.mrf.mxu1  ;;  %v5684_v2 = vpop.f32.mrf.mxu0  ;;  %v9640_v31 = vld [vmem:[%s12281_s12 + $0x60] ss:$8 sps:$4 sm:$0xff]  }
 0x830   :  { %v8498_v17 = vpack.c.bf16 %v5740_v29, %v5681_v45  ;;  %v9642_v45 = vld [vmem:[%s12281_s12 + $0x64] ss:$8 sps:$4 sm:$0xff]   ;;  %v9645_v29 = vld [vmem:[%s12281_s12 + $0x114] ss:$8 sps:$4 sm:$0xff]  }
 0x831   :  { %v9245_v24 = vpop.f32.mrf.mxu1  ;;  %v9232_v40 = vpop.f32.mrf.mxu0 }
 0x832   :  { %9292 = vmatmul.mubr.msk.bf16.gmra.mxu1 %vm1001_vm2, %v8498_v17 }
 0x833   :  { %v5743_v10 = vpop.f32.mrf.mxu1  ;;  %9327 = vmatprep.mubr.msk.bf16.mxu1 %vm1001_vm2, %v8503_v33  ;;  %v5689_v3 = vpop.f32.mrf.mxu0 }
 0x834   :  { %v8494_v20 = vpack.c.bf16 %v5743_v10, %v5684_v2  ;;  %v9648_v2 = vld [vmem:[%s12281_s12 + $0x174] ss:$8 sps:$4 sm:$0xff]  }
 0x835   :  { %v9246_v13 = vpop.f32.mrf.mxu1  ;;  %v9235_v1 = vpop.f32.mrf.mxu0 }
 0x836   :  { %9272 = vmatmul.mubr.msk.bf16.gmra.mxu0 %vm1001_vm2, %v8494_v20 }
 0x837   :  { %9307 = vmatprep.mubr.msk.bf16.mxu0 %vm1001_vm2, %v8499_v59  ;;  %v5748_v9 = vpop.f32.mrf.mxu1  ;;  %v5692_v47 = vpop.f32.mrf.mxu0 }
 0x838   :  { %v8502_v35 = vpack.c.bf16 %v5748_v9, %v5689_v3 }
 0x839   :  { %v9249_v41 = vpop.f32.mrf.mxu1  ;;  %v9236_v22 = vpop.f32.mrf.mxu0 }
 0x83a   :  { %9328 = vmatmul.mubr.msk.bf16.vlgmr.msra.gmra.mxu1 %vm1001_vm2, %v8504_v55 }
 0x83b   :  { %v5751_v51 = vpop.f32.mrf.mxu1  ;;  %v5697_v62 = vpop.f32.mrf.mxu0  ;;  %9331 = vmatprep.mubr.msk.bf16.mxu1 %vm1001_vm2, %v8505_v58  ;;  %6705 = vmatpush1.bf16.msra.mxu1 %v9607_v53 }
 0x83c   :  { %v8506_v50 = vpack.c.bf16 %v5751_v51, %v5692_v47 }
 0x83d   :  { %v9250_v59 = vpop.f32.mrf.mxu1  ;;  %v9239_v37 = vpop.f32.mrf.mxu0 }
 0x83e   :  { %9308 = vmatmul.mubr.msk.bf16.vlgmr.msra.gmra.mxu0 %vm1001_vm2, %v8500_v21 }
 0x83f   :  { %9336 = vmatpush3.bf16.msra.mxu0 %v9601_v39  ;;  %9311 = vmatprep.mubr.msk.bf16.mxu0 %vm1001_vm2, %v8501_v27  ;;  %v5756_v36 = vpop.f32.mrf.mxu1  ;;  %v5700_v42 = vpop.f32.mrf.mxu0  ;;  %v9605_v39 = vld [vmem:[#allocation7 + $0xc8] sm:$0xff]  }
 0x840   :  { %9337 = vmatprep.subr.bf16.mxu0 %v9602_v60  ;;  %v8510_v0 = vpack.c.bf16 %v5756_v36, %v5697_v62 }
 0x841   :  { %v9253_v30 = vpop.f32.mrf.mxu1  ;;  %v9240_v49 = vpop.f32.mrf.mxu0 }
 0x842   :  { %9332 = vmatmul.mubr.msk.bf16.gmra.mxu1 %vm1001_vm2, %v8506_v50 }
 0x843   :  { %9338 = vmatpush3.bf16.msra.mxu0 %v9602_v60  ;;  %v5759_v5 = vpop.f32.mrf.mxu1  ;;  %6732 = vmatprep.mubr.bf16.mxu1 %v12322_v8 }
 0x844   :  { %9339 = vmatprep.subr.bf16.mxu0 %v9603_v12 }
 0x845   :  { %v9254_v28 = vpop.f32.mrf.mxu1 }
 0x846   :  { %9312 = vmatmul.mubr.msk.bf16.gmra.mxu0 %vm1001_vm2, %v8502_v35 }
 0x847   :  { %9340 = vmatpush3.bf16.msra.mxu0 %v9603_v12  ;;  %9347 = vmatprep.mubr.msk.bf16.mxu0 %vm1001_vm2, %v8507_v4  ;;  %v9612_v4 = vld [vmem:[%s12281_s12 + $0xb4] ss:$8 sps:$4 sm:$0xff]  }
 0x848   :  { %9341 = vmatprep.subr.bf16.mxu0 %v9604_v56 }
 0x84b   :  { %9342 = vmatpush3.bf16.msra.mxu0 %v9604_v56 }
 0x84c   :  { %9343 = vmatprep.subr.bf16.mxu0 %v9605_v39 }
 0x84f   :  { %9344 = vmatpush3.bf16.msra.mxu0 %v9605_v39 }
 0x850   :  { %9345 = vmatprep.subr.bf16.mxu0 %v9606_v46 }
 0x853   :  { %9346 = vmatpush3.bf16.msra.mxu0 %v9606_v46 }
 0x854   :  { %6849 = vmatprep.subr.bf16.mxu0 %v9612_v4 }
 0x856   :  { %9348 = vmatmul.mubr.msk.bf16.vlgmr.msra.gmra.mxu0 %vm1001_vm2, %v8508_v26  ;;  %v9615_v26 = vld [vmem:[%s12281_s12 + $0x44] ss:$8 sps:$4 sm:$0xff]  }
 0x857   :  { %9351 = vmatprep.mubr.msk.bf16.mxu0 %vm1001_vm2, %v8509_v43  ;;  %6850 = vmatpush1.bf16.msra.mxu0 %v9610_v16  ;;  %v8218_v16 = vld [vmem:[%s12280_s11] ss:$0 sm:$0xff] }
 0x858   :  { %6706 = vmatprep.subr.bf16.mxu1 %v9615_v26  ;;  %6851 = vmatprep.subr.bf16.mxu0 %v9618_v57 }
 0x859   :  { %6707 = vmatpush1.bf16.msra.mxu1 %v9613_v11 }
 0x85a   :  { %6708 = vmatprep.subr.bf16.mxu1 %v9621_v54 }
 0x85b   :  { %6852 = vmatpush1.bf16.msra.mxu0 %v9616_v52 }
 0x85c   :  { %6853 = vmatprep.subr.bf16.mxu0 %v9624_v15 }
 0x85d   :  { %6709 = vmatpush1.bf16.msra.mxu1 %v9619_v7 }
 0x85e   :  { %9352 = vmatmul.mubr.msk.bf16.gmra.mxu0 %vm1001_vm2, %v8510_v0  ;;  %6710 = vmatprep.subr.bf16.mxu1 %v9627_v38 }
 0x85f   :  { %6877 = vmatprep.mubr.bf16.mxu0 %v12322_v8  ;;  %6854 = vmatpush1.bf16.msra.mxu0 %v9622_v19 }
 0x860   :  { %6855 = vmatprep.subr.bf16.mxu0 %v9630_v48 }
 0x861   :  { %6711 = vmatpush1.bf16.msra.mxu1 %v9625_v25 }
 0x862   :  { %6712 = vmatprep.subr.bf16.mxu1 %v9633_v61 }
 0x863   :  { %6856 = vmatpush1.bf16.msra.mxu0 %v9628_v44 }
 0x864   :  { %6857 = vmatprep.subr.bf16.mxu0 %v9636_v63 }
 0x865   :  { %6713 = vmatpush1.bf16.msra.mxu1 %v9631_v34 }
 0x866   :  { %6714 = vmatprep.subr.bf16.mxu1 %v9639_v32 }
 0x867   :  { %6858 = vmatpush1.bf16.msra.mxu0 %v9634_v18 }
 0x868   :  { %6859 = vmatprep.subr.bf16.mxu0 %v9642_v45 }
 0x869   :  { %6715 = vmatpush1.bf16.msra.mxu1 %v9637_v14 }
 0x86a   :  { %6983 = vmatprep.subr.bf16.mxu1 %v9645_v29 }
 0x86b   :  { %6860 = vmatpush1.bf16.msra.mxu0 %v9640_v31 }
 0x86c   :  { %7117 = vmatprep.subr.bf16.mxu0 %v9648_v2 }
 0x8c2   :  { %v9289_v17 = vpop.f32.mrf.mxu1 }
 0x8c4   :  { %v6038_v24 = vpop.f32.mrf.mxu1 }
 0x8c6   :  { %v9269_v33 = vpop.f32.mrf.mxu0  ;;  %v9290_v10 = vpop.f32.mrf.mxu1 }
 0x8c7   :  { %v6047_v12 = vadd.f32 %v9289_v17, %v9269_v33 }
 0x8c8   :  { %v5913_v40 = vpop.f32.mrf.mxu0  ;;  %v6041_v20 = vpop.f32.mrf.mxu1 }
 0x8c9   :  { %v6039_v49 = vadd.f32 %v6038_v24, %v5913_v40 }
 0x8ca   :  { %v9270_v3 = vpop.f32.mrf.mxu0 }
 0x8cb   :  { %v6050_v56 = vadd.f32 %v9290_v10, %v9270_v3 }
 0x8cc   :  { %v5916_v13 = vpop.f32.mrf.mxu0 }
 0x8cd   :  { %v6042_v43 = vadd.f32 %v6041_v20, %v5916_v13 }
 0x8f2   :  { %v9293_v1 = vpop.f32.mrf.mxu1 }
 0x8f4   :  { %v6054_v55 = vpop.f32.mrf.mxu1 }
 0x8f6   :  { %v9273_v9 = vpop.f32.mrf.mxu0  ;;  %v9294_v22 = vpop.f32.mrf.mxu1 }
 0x8f7   :  { %v6063_v4 = vadd.f32 %v9293_v1, %v9273_v9 }
 0x8f8   :  { %v5929_v47 = vpop.f32.mrf.mxu0  ;;  %v6057_v21 = vpop.f32.mrf.mxu1 }
 0x8f9   :  { %v6055_v54 = vadd.f32 %v6054_v55, %v5929_v47 }
 0x8fa   :  { %v9274_v58 = vpop.f32.mrf.mxu0  ;;  %v9329_v59 = vpop.f32.mrf.mxu1 }
 0x8fb   :  { %v6066_v25 = vadd.f32 %v9294_v22, %v9274_v58 }
 0x8fc   :  { %v5932_v41 = vpop.f32.mrf.mxu0  ;;  %v6330_v50 = vpop.f32.mrf.mxu1 }
 0x8fd   :  { %v6058_v14 = vadd.f32 %v6057_v21, %v5932_v41 }
 0x8fe   :  { %v9309_v51 = vpop.f32.mrf.mxu0  ;;  %v9330_v42 = vpop.f32.mrf.mxu1 }
 0x8ff   :  { %v6217_v35 = vadd.f32 %v9309_v51, %v6047_v12 }
 0x900   :  { %v6184_v62 = vpop.f32.mrf.mxu0  ;;  %v6333_v5 = vpop.f32.mrf.mxu1 }
 0x901   :  { %v6215_v28 = vadd.f32 %v6184_v62, %v6039_v49  ;;  %v6363_v0 = vadd.f32 %v9329_v59, %v6217_v35 }
 0x902   :  { %v9310_v60 = vpop.f32.mrf.mxu0  ;;  %v9333_v39 = vpop.f32.mrf.mxu1 }
 0x903   :  { %v6218_v23 = vadd.f32 %v9310_v60, %v6050_v56  ;;  %v6361_v26 = vadd.f32 %v6330_v50, %v6215_v28 }
 0x904   :  { %v6187_v27 = vpop.f32.mrf.mxu0  ;;  %v6346_v52 = vpop.f32.mrf.mxu1 }
 0x905   :  { %v6216_v57 = vadd.f32 %v6187_v27, %v6042_v43  ;;  %v6364_v19 = vadd.f32 %v9330_v42, %v6218_v23 }
 0x906   :  { %v9313_v37 = vpop.f32.mrf.mxu0  ;;  %v9334_v45 = vpop.f32.mrf.mxu1 }
 0x907   :  { %v6221_v15 = vadd.f32 %v9313_v37, %v6063_v4  ;;  %v6362_v63 = vadd.f32 %v6333_v5, %v6216_v57 }
 0x908   :  { %v6200_v36 = vpop.f32.mrf.mxu0  ;;  %v6349_v9 = vpop.f32.mrf.mxu1 }
 0x909   :  { %v6219_v44 = vadd.f32 %v6200_v36, %v6055_v54  ;;  %v6367_v29 = vadd.f32 %v9333_v39, %v6221_v15 }
 0x90a   :  { %v9314_v30 = vpop.f32.mrf.mxu0 }
 0x90b   :  { %v6222_v31 = vadd.f32 %v9314_v30, %v6066_v25  ;;  %v6365_v10 = vadd.f32 %v6346_v52, %v6219_v44 }
 0x90c   :  { %v6203_v46 = vpop.f32.mrf.mxu0 }
 0x90d   :  { %v6220_v40 = vadd.f32 %v6203_v46, %v6058_v14  ;;  %v6368_v47 = vadd.f32 %v9334_v45, %v6222_v31 }
 0x90f   :  { %v6366_v51 = vadd.f32 %v6349_v9, %v6220_v40 }
 0x916   :  { %v9349_v53 = vpop.f32.mrf.mxu0 }
 0x917   :  { %v6517_v11 = vadd.f32 %v9349_v53, %v6363_v0 }
 0x918   :  { %v6484_v7 = vpop.f32.mrf.mxu0 }
 0x919   :  { %v6532_v38 = vadd.f32 %v8218_v16, %v6517_v11  ;;  %v6515_v48 = vadd.f32 %v6484_v7, %v6361_v26 }
 0x91a   :  { %v9350_v61 = vpop.f32.mrf.mxu0 }
 0x91b   :  { %v6540_v34 = vmul.f32 0.5, %v6532_v38  ;;  %v6530_v18 = vadd.f32 %v8218_v16, %v6515_v48  ;;  %v6518_v32 = vadd.f32 %v9350_v61, %v6364_v19 }
 0x91c   :  { %v6487_v2 = vpop.f32.mrf.mxu0 }
 0x91d   :  { %9847 = vtanh.f32 %v6540_v34  ;;  %v6538_v17 = vmul.f32 0.5, %v6530_v18  ;;  %v6533_v33 = vadd.f32 %v8218_v16, %v6518_v32  ;;  %v6516_v24 = vadd.f32 %v6487_v2, %v6362_v63 }
 0x91e   :  { %v9353_v3 = vpop.f32.mrf.mxu0 }
 0x91f   :  { %9849 = vtanh.f32 %v6538_v17  ;;  %v6541_v20 = vmul.f32 0.5, %v6533_v33  ;;  %v6531_v13 = vadd.f32 %v8218_v16, %v6516_v24  ;;  %v6521_v1 = vadd.f32 %v9353_v3, %v6367_v29 }
 0x920   :  { %v6500_v55 = vpop.f32.mrf.mxu0 }
 0x921   :  { %9851 = vtanh.f32 %v6541_v20  ;;  %v6539_v58 = vmul.f32 0.5, %v6531_v13  ;;  %v6536_v41 = vadd.f32 %v8218_v16, %v6521_v1  ;;  %v6519_v22 = vadd.f32 %v6500_v55, %v6365_v10 }
 0x922   :  { %v9354_v62 = vpop.f32.mrf.mxu0 }
 0x923   :  { %9853 = vtanh.f32 %v6539_v58  ;;  %v6544_v21 = vmul.f32 0.5, %v6536_v41  ;;  %v6534_v60 = vadd.f32 %v8218_v16, %v6519_v22  ;;  %v6522_v27 = vadd.f32 %v9354_v62, %v6368_v47 }
 0x924   :  { %v6503_v59 = vpop.f32.mrf.mxu0 }
 0x925   :  { %9855 = vtanh.f32 %v6544_v21  ;;  %v6542_v37 = vmul.f32 0.5, %v6534_v60  ;;  %v6537_v50 = vadd.f32 %v8218_v16, %v6522_v27  ;;  %v6520_v36 = vadd.f32 %v6503_v59, %v6366_v51 }
 0x927   :  { %9857 = vtanh.f32 %v6542_v37  ;;  %v6545_v42 = vmul.f32 0.5, %v6537_v50  ;;  %v6535_v12 = vadd.f32 %v8218_v16, %v6520_v36 }
 0x929   :  { %9859 = vtanh.f32 %v6545_v42  ;;  %v6543_v30 = vmul.f32 0.5, %v6535_v12 }
 0x92a   :  { %v9848_v49 = vpop.eup %9847 }
 0x92b   :  { %v6556_v35 = vmul.f32 0.5, %v9848_v49  ;;  %9861 = vtanh.f32 %v6543_v30 }
 0x92c   :  { %v9850_v5 = vpop.eup %9849 }
 0x92d   :  { %v6554_v56 = vmul.f32 0.5, %v9850_v5  ;;  %v6564_v39 = vadd.f32 0.5, %v6556_v35 }
 0x92e   :  { %v9852_v28 = vpop.eup %9851 }
 0x92f   :  { %v6562_v46 = vadd.f32 0.5, %v6554_v56  ;;  %v6557_v43 = vmul.f32 0.5, %v9852_v28  ;;  %v8513_v57 = vpack.c.bf16 %v6564_v39, %v6564_v39 }
 0x930   :  { %v9854_v0 = vpop.eup %9853 }
 0x931   :  { %v8511_v23 = vpack.c.bf16 %v6562_v46, %v6562_v46  ;;  %v6565_v4 = vadd.f32 0.5, %v6557_v43  ;;  %v6555_v53 = vmul.f32 0.5, %v9854_v0  ;;  %v11890_v38 = vunpack.c.l.b16 %v8513_v57  ;;  %v9643_v46 = vld [vmem:[%s12281_s12 + $0x110] ss:$8 sps:$4 sm:$0xff]   ;;  %v9654_v57 = vld [vmem:[%s12281_s12 + $0x164] ss:$8 sps:$4 sm:$0xff]  }
 0x932   :  { %v9856_v26 = vpop.eup %9855  ;;  %v9646_v43 = vld [vmem:[%s12281_s12 + $0x170] ss:$8 sps:$4 sm:$0xff]  }
 0x933   :  { %v6563_v11 = vadd.f32 0.5, %v6555_v53  ;;  %v6560_v52 = vmul.f32 0.5, %v9856_v26  ;;  %v11888_v54 = vunpack.c.l.b16 %v8511_v23  ;;  %v8514_v15 = vpack.c.bf16 %v6565_v4, %v6565_v4  ;;  %v9651_v26 = vld [vmem:[%s12281_s12 + $0x104] ss:$8 sps:$4 sm:$0xff]  }
 0x934   :  { %v9858_v16 = vpop.eup %9857  ;;  %v6618_v17 = vrot.slane %v11890_v38, 6  ;;  %v6769_v13 = vrot.slane %v11890_v38, 7 }
 0x935   :  { %v8512_v7 = vpack.c.bf16 %v6563_v11, %v6563_v11  ;;  %v6568_v48 = vadd.f32 0.5, %v6560_v52  ;;  %v6558_v25 = vmul.f32 0.5, %v9858_v16  ;;  %v6767_v34 = vrot.slane %v11888_v54, 1  ;;  %v9649_v16 = vld [vmem:[%s12281_s12 + $0x100] ss:$8 sps:$4 sm:$0xff]  }
 0x936   :  { %v9860_v19 = vpop.eup %9859  ;;  %v11895_v32 = vunpack.c.l.b16 %v8514_v15  ;;  %v6901_v39 = vrot.slane %v11888_v54, 2  ;;  %v9652_v15 = vld [vmem:[%s12281_s12 + $0x160] ss:$8 sps:$4 sm:$0xff]  }
 0x937   :  { %v11892_v44 = vunpack.c.l.b16 %v8512_v7  ;;  %v6561_v61 = vmul.f32 0.5, %v9860_v19  ;;  %v6566_v18 = vadd.f32 0.5, %v6558_v25  ;;  %v8517_v29 = vpack.c.bf16 %v6568_v48, %v6568_v48  ;;  %v9657_v48 = vld [vmem:[%s12281_s12 + $0xf4] ss:$8 sps:$4 sm:$0xff]  }
 0x938   :  { %v9862_v63 = vpop.eup %9861  ;;  %v6621_v9 = vrot.slane %v11895_v32, 5  ;;  %v6771_v21 = vrot.slane %v11895_v32, 6  ;;  %v7035_v19 = vrot.slane %v11888_v54, 3  ;;  %v9660_v25 = vld [vmem:[%s12281_s12 + $0x154] ss:$8 sps:$4 sm:$0xff]  }
 0x939   :  { %v6615_v45 = vrot.slane %v11892_v44, 7  ;;  %v6569_v14 = vadd.f32 0.5, %v6561_v61  ;;  %v6559_v31 = vmul.f32 0.5, %v9862_v63  ;;  %v8515_v2 = vpack.c.bf16 %v6566_v18, %v6566_v18 }
 0x93a   :  { %v6768_v10 = vsel %vm6616_vm7, %v11892_v44, %v6767_v34  ;;  %v11908_v47 = vunpack.c.l.b16 %v8517_v29  ;;  %v6902_v37 = vrot.slane %v11892_v44, 1  ;;  %v7036_v52 = vrot.slane %v11892_v44, 2 }
 0x93b   :  { %v8518_v33 = vpack.c.bf16 %v6569_v14, %v6569_v14  ;;  %v6567_v24 = vadd.f32 0.5, %v6559_v31  ;;  %v6617_v40 = vsel %vm6616_vm7, %v6615_v45, %v11888_v54  ;;  %v11903_v3 = vunpack.c.l.b16 %v8515_v2  ;;  %v9655_v14 = vld [vmem:[%s12281_s12 + $0xf0] ss:$8 sps:$4 sm:$0xff]  }
 0x93c   :  { %v6620_v20 = vsel %vm6619_vm8, %v6618_v17, %v6617_v40  ;;  %v6770_v58 = vsel %vm6619_vm8, %v6769_v13, %v6768_v10  ;;  %v6630_v36 = vrot.slane %v11908_v47, 2  ;;  %v6777_v12 = vrot.slane %v11908_v47, 3  ;;  %v9658_v31 = vld [vmem:[%s12281_s12 + $0x150] ss:$8 sps:$4 sm:$0xff]   ;;  %v9663_v17 = vld [vmem:[%s12281_s12 + $0xe4] ss:$8 sps:$4 sm:$0xff]  }
 0x93d   :  { %v8516_v1 = vpack.c.bf16 %v6567_v24, %v6567_v24  ;;  %v6624_v55 = vrot.slane %v11903_v3, 4  ;;  %v6773_v41 = vrot.slane %v11903_v3, 5  ;;  %v11913_v22 = vunpack.c.l.b16 %v8518_v33  ;;  %v9666_v33 = vld [vmem:[%s12281_s12 + $0x144] ss:$8 sps:$4 sm:$0xff]  }
 0x93e   :  { %v6623_v62 = vsel %vm6622_vm9, %v6621_v9, %v6620_v20  ;;  %v6772_v27 = vsel %vm6622_vm9, %v6771_v21, %v6770_v58  ;;  %v6903_v11 = vsel %vm6616_vm7, %v6902_v37, %v6901_v39  ;;  %v6905_v61 = vrot.slane %v11895_v32, 7 }
 0x93f   :  { %v11915_v51 = vunpack.c.l.b16 %v8516_v1  ;;  %v6626_v50 = vsel %vm6625_vm10, %v6624_v55, %v6623_v62  ;;  %v6774_v42 = vsel %vm6625_vm10, %v6773_v41, %v6772_v27  ;;  %v6633_v49 = vrot.slane %v11913_v22, 1  ;;  %v9661_v55 = vld [vmem:[%s12281_s12 + $0xe0] ss:$8 sps:$4 sm:$0xff]   ;;  %v9669_v27 = vld [vmem:[%s12281_s12 + $0xd4] ss:$8 sps:$4 sm:$0xff]  }
 0x940   :  { %v6779_v5 = vrot.slane %v11913_v22, 2  ;;  %v6904_v7 = vsel %vm6619_vm8, %v11890_v38, %v6903_v11  ;;  %v6907_v63 = vrot.slane %v11903_v3, 6  ;;  %v7037_v34 = vsel %vm6616_vm7, %v7036_v52, %v7035_v19 }
 0x941   :  { %v6627_v60 = vrot.slane %v11915_v51, 3  ;;  %v6775_v59 = vrot.slane %v11915_v51, 4  ;;  %v6906_v18 = vsel %vm6622_vm9, %v6905_v61, %v6904_v7  ;;  %v7038_v45 = vrot.slane %v11890_v38, 1 }
 0x942   :  { %v7437_v29 = vrot.slane %v11888_v54, 6  ;;  %v7438_v2 = vrot.slane %v11892_v44, 5  ;;  %v7440_v40 = vrot.slane %v11890_v38, 4  ;;  %v7444_v10 = vrot.slane %v11903_v3, 2 }
 0x943   :  { %v6629_v30 = vsel %vm6628_vm11, %v6627_v60, %v6626_v50  ;;  %v6776_v35 = vsel %vm6628_vm11, %v6775_v59, %v6774_v42  ;;  %v7039_v24 = vsel %vm6619_vm8, %v7038_v45, %v7037_v34  ;;  %v6908_v20 = vsel %vm6625_vm10, %v6907_v63, %v6906_v18  ;;  %v9664_v60 = vld [vmem:[%s12281_s12 + $0x140] ss:$8 sps:$4 sm:$0xff]   ;;  %v9672_v42 = vld [vmem:[%s12281_s12 + $0x134] ss:$8 sps:$4 sm:$0xff]  }
 0x944   :  { %v6632_v56 = vsel %vm6631_vm12, %v6630_v36, %v6629_v30  ;;  %v6778_v28 = vsel %vm6631_vm12, %v6777_v12, %v6776_v35  ;;  %v7439_v13 = vsel %vm6616_vm7, %v7438_v2, %v7437_v29  ;;  %v7442_v1 = vrot.slane %v11895_v32, 3  ;;  %v9673_v18 = vld [vmem:[%s12281_s12 + $0xc0] ss:$8 sps:$4 sm:$0xff]   ;;  %v9681_v2 = vld [vmem:[%s12281_s12 + $0x1d4] ss:$8 sps:$4 sm:$0xff]  }
 0x945   :  { %v6635_v0 = vsel %vm6634_vm13, %v6633_v49, %v6632_v56  ;;  %v6780_v23 = vsel %vm6634_vm13, %v6779_v5, %v6778_v28  ;;  %v7446_v9 = vrot.slane %v11915_v51, 1  ;;  %v6909_v58 = vrot.slane %v11915_v51, 5  ;;  %v9676_v45 = vld [vmem:[%s12281_s12 + $0x120] ss:$8 sps:$4 sm:$0xff]  }
 0x946   :  { %v6636_v4 = vpack.c.b16 %v6635_v0, %v6635_v0  ;;  %v6781_v53 = vpack.c.b16 %v6780_v23, %v6780_v23  ;;  %v7041_v41 = vrot.slane %v11903_v3, 7  ;;  %v7043_v62 = vrot.slane %v11915_v51, 6 }
 0x947   :  { %v7441_v21 = vsel %vm6619_vm8, %v7440_v40, %v7439_v13  ;;  %v7040_v59 = vsel %vm6622_vm9, %v11895_v32, %v7039_v24  ;;  %v7571_v50 = vrot.slane %v11888_v54, 7  ;;  %v7572_v36 = vrot.slane %v11892_v44, 6  ;;  %v9679_v40 = vld [vmem:[%s12281_s12 + $0x1d0] ss:$8 sps:$4 sm:$0xff]  }
 0x948   :  { %8239 = vmatmul.mubr.msk.bf16.vlgmr.msra.gmra.mxu1 %vm1001_vm2, %v6636_v4  ;;  %8264 = vmatmul.mubr.msk.bf16.vlgmr.msra.gmra.mxu0 %vm1001_vm2, %v6781_v53  ;;  %v7443_v37 = vsel %vm6622_vm9, %v7442_v1, %v7441_v21  ;;  %v7449_v30 = vrot.slane %v11913_v22, 7  ;;  %v7574_v49 = vrot.slane %v11890_v38, 5  ;;  %v7578_v35 = vrot.slane %v11903_v3, 3  ;;  %v9667_v4 = vld [vmem:[%s12281_s12 + $0xd0] ss:$8 sps:$4 sm:$0xff]  }
 0x949   :  { %6984 = vmatpush1.bf16.msra.mxu1 %v9643_v46  ;;  %7118 = vmatpush1.bf16.msra.mxu0 %v9646_v43  ;;  %v7445_v12 = vsel %vm6625_vm10, %v7444_v10, %v7443_v37  ;;  %v7573_v56 = vsel %vm6616_vm7, %v7572_v36, %v7571_v50  ;;  %v7576_v28 = vrot.slane %v11895_v32, 4  ;;  %v7580_v39 = vrot.slane %v11915_v51, 2  ;;  %v9670_v53 = vld [vmem:[%s12281_s12 + $0x130] ss:$8 sps:$4 sm:$0xff]   ;;  %v9688_v21 = vld [vmem:[%s12281_s12 + $0x220] ss:$8 sps:$4 sm:$0xff]  }
 0x94a   :  { %6985 = vmatprep.subr.bf16.mxu1 %v9651_v26  ;;  %7119 = vmatprep.subr.bf16.mxu0 %v9654_v57  ;;  %v7447_v5 = vsel %vm6628_vm11, %v7446_v9, %v7445_v12  ;;  %v6910_v46 = vsel %vm6628_vm11, %v6909_v58, %v6908_v20  ;;  %v7042_v43 = vsel %vm6625_vm10, %v7041_v41, %v7040_v59  ;;  %v9675_v26 = vld [vmem:[%s12281_s12 + $0xc4] ss:$8 sps:$4 sm:$0xff]   ;;  %v7045_v7 = vrot.slane %v11908_v47, 5  ;;  %v9682_v10 = vld [vmem:[%s12281_s12 + $0x230] ss:$8 sps:$4 sm:$0xff]  }
 0x94b   :  { %7011 = vmatprep.mubr.bf16.mxu1 %v12322_v8  ;;  %7145 = vmatprep.mubr.bf16.mxu0 %v12322_v8  ;;  %v7448_v0 = vsel %vm6631_vm12, %v11908_v47, %v7447_v5  ;;  %v7575_v23 = vsel %vm6619_vm8, %v7574_v49, %v7573_v56  ;;  %v7044_v57 = vsel %vm6628_vm11, %v7043_v62, %v7042_v43  ;;  %v7304_v20 = vrot.slane %v11892_v44, 4  ;;  %v9687_v9 = vld [vmem:[%s12281_s12 + $0x1c4] ss:$8 sps:$4 sm:$0xff]   ;;  %v9685_v62 = vld [vmem:[%s12281_s12 + $0x1c0] ss:$8 sps:$4 sm:$0xff]  }
 0x94c   :  { %v12040_v11 = vsel %vm6634_vm13, %v7449_v30, %v7448_v0  ;;  %v7577_v52 = vsel %vm6622_vm9, %v7576_v28, %v7575_v23  ;;  %v7046_v63 = vsel %vm6631_vm12, %v7045_v7, %v7044_v57  ;;  %v7170_v58 = vrot.slane %v11892_v44, 3  ;;  %v9696_v59 = vld [vmem:[%s12281_s12 + $0x214] ss:$8 sps:$4 sm:$0xff]   ;;  %v9694_v12 = vld [vmem:[%s12281_s12 + $0x210] ss:$8 sps:$4 sm:$0xff]  }
 0x94d   :  { %6986 = vmatpush1.bf16.msra.mxu1 %v9649_v16  ;;  %7120 = vmatpush1.bf16.msra.mxu0 %v9652_v15  ;;  %v9678_v16 = vld [vmem:[%s12281_s12 + $0x124] ss:$8 sps:$4 sm:$0xff]   ;;  %v6911_v15 = vrot.slane %v11908_v47, 4  ;;  %v7579_v19 = vsel %vm6625_vm10, %v7578_v35, %v7577_v52  ;;  %v7303_v41 = vrot.slane %v11888_v54, 5  ;;  %v7306_v37 = vrot.slane %v11890_v38, 3 }
 0x94e   :  { %6987 = vmatprep.subr.bf16.mxu1 %v9657_v48  ;;  %7121 = vmatprep.subr.bf16.mxu0 %v9660_v25  ;;  %v7582_v48 = vrot.slane %v11908_v47, 1  ;;  %v7581_v25 = vsel %vm6628_vm11, %v7580_v39, %v7579_v19  ;;  %v7172_v50 = vrot.slane %v11890_v38, 2  ;;  %v7308_v30 = vrot.slane %v11895_v32, 2  ;;  %v9699_v38 = vld [vmem:[%s12281_s12 + $0x1a4] ss:$8 sps:$4 sm:$0xff]  }
 0x94f   :  { %v6912_v61 = vsel %vm6631_vm12, %v6911_v15, %v6910_v46  ;;  %v7305_v44 = vsel %vm6616_vm7, %v7304_v20, %v7303_v41  ;;  %v9702_v49 = vld [vmem:[%s12281_s12 + $0x204] ss:$8 sps:$4 sm:$0xff]   ;;  %v7310_v5 = vrot.slane %v11903_v3, 1  ;;  %v7174_v56 = vrot.slane %v11895_v32, 1  ;;  %v9697_v39 = vld [vmem:[%s12281_s12 + $0x1a0] ss:$8 sps:$4 sm:$0xff]  }
 0x950   :  { %v7583_v34 = vsel %vm6631_vm12, %v7582_v48, %v7581_v25  ;;  %v7307_v36 = vsel %vm6619_vm8, %v7306_v37, %v7305_v44  ;;  %v9700_v46 = vld [vmem:[%s12281_s12 + $0x200] ss:$8 sps:$4 sm:$0xff]   ;;  %v7177_v0 = vrot.slane %v11915_v51, 7  ;;  %v9705_v32 = vld [vmem:[%s12281_s12 + $0x194] ss:$8 sps:$4 sm:$0xff]   ;;  %v7179_v7 = vrot.slane %v11908_v47, 6 }
 0x951   :  { %6988 = vmatpush1.bf16.msra.mxu1 %v9655_v14  ;;  %7122 = vmatpush1.bf16.msra.mxu0 %v9658_v31  ;;  %v6913_v14 = vrot.slane %v11913_v22, 3  ;;  %v7047_v31 = vrot.slane %v11913_v22, 4  ;;  %v12064_v29 = vsel %vm6634_vm13, %v11913_v22, %v7583_v34  ;;  %v7309_v28 = vsel %vm6622_vm9, %v7308_v30, %v7307_v36  ;;  %v9708_v23 = vld [vmem:[%s12281_s12 + $0x1f4] ss:$8 sps:$4 sm:$0xff]   ;;  %v9706_v57 = vld [vmem:[%s12281_s12 + $0x1f0] ss:$8 sps:$4 sm:$0xff]  }
 0x952   :  { %6989 = vmatprep.subr.bf16.mxu1 %v9663_v17  ;;  %7123 = vmatprep.subr.bf16.mxu0 %v9666_v33  ;;  %v9684_v17 = vld [vmem:[%s12281_s12 + $0x234] ss:$8 sps:$4 sm:$0xff]   ;;  %v9714_v15 = vld [vmem:[%s12281_s12 + $0x1e4] ss:$8 sps:$4 sm:$0xff]   ;;  %v7313_v19 = vrot.slane %v11908_v47, 7  ;;  %v7315_v34 = vrot.slane %v11913_v22, 6  ;;  %v7585_v36 = vpack.c.b16 %v12064_v29, %v12064_v29 }
 0x953   :  { %v6914_v33 = vsel %vm6634_vm13, %v6913_v14, %v6912_v61  ;;  %v7048_v24 = vsel %vm6634_vm13, %v7047_v31, %v7046_v63  ;;  %v9712_v61 = vld [vmem:[%s12281_s12 + $0x1e0] ss:$8 sps:$4 sm:$0xff]   ;;  %v7181_v63 = vrot.slane %v11913_v22, 5  ;;  %v9717_v47 = vld [vmem:[%s12281_s12 + $0x294] ss:$8 sps:$4 sm:$0xff]  }
 0x954   :  { %v6915_v13 = vpack.c.b16 %v6914_v33, %v6914_v33  ;;  %v7049_v1 = vpack.c.b16 %v7048_v24, %v7048_v24  ;;  %v9715_v22 = vld [vmem:[%s12281_s12 + $0x290] ss:$8 sps:$4 sm:$0xff]   ;;  %v9723_v33 = vld [vmem:[%s12281_s12 + $0x284] ss:$8 sps:$4 sm:$0xff]   ;;  %v9729_v20 = vld [vmem:[%s12281_s12 + $0x274] ss:$8 sps:$4 sm:$0xff]  }
 0x955   :  { %6990 = vmatpush1.bf16.msra.mxu1 %v9661_v55  ;;  %7124 = vmatpush1.bf16.msra.mxu0 %v9664_v60  ;;  %v9690_v55 = vld [vmem:[%s12281_s12 + $0x224] ss:$8 sps:$4 sm:$0xff]   ;;  %v7169_v60 = vrot.slane %v11888_v54, 4  ;;  %v9718_v31 = vld [vmem:[%s12281_s12 + $0x2f0] ss:$8 sps:$4 sm:$0xff]  }
 0x956   :  { %6991 = vmatprep.subr.bf16.mxu1 %v9669_v27  ;;  %7125 = vmatprep.subr.bf16.mxu0 %v9672_v42  ;;  %v9693_v27 = vld [vmem:[%s12281_s12 + $0x1b4] ss:$8 sps:$4 sm:$0xff]   ;;  %v9691_v42 = vld [vmem:[%s12281_s12 + $0x1b0] ss:$8 sps:$4 sm:$0xff]   ;;  %v9726_v24 = vld [vmem:[%s12281_s12 + $0x2e4] ss:$8 sps:$4 sm:$0xff]  }
 0x957   :  { %v7171_v54 = vsel %vm6616_vm7, %v7170_v58, %v7169_v60  ;;  %v9733_v58 = vld [vmem:[%s12281_s12 + $0x260] ss:$8 sps:$4 sm:$0xff]   ;;  %v9739_v60 = vld [vmem:[%s12281_s12 + $0x250] ss:$8 sps:$4 sm:$0xff]  }
 0x958   :  { %v7173_v35 = vsel %vm6619_vm8, %v7172_v50, %v7171_v54  ;;  %v9736_v41 = vld [vmem:[%s12281_s12 + $0x2c0] ss:$8 sps:$4 sm:$0xff]   ;;  %v9742_v44 = vld [vmem:[%s12281_s12 + $0x2b0] ss:$8 sps:$4 sm:$0xff]   ;;  %v7451_v50 = vpack.c.b16 %v12040_v11, %v12040_v11 }
 0x959   :  { %6992 = vmatpush1.bf16.msra.mxu1 %v9667_v4  ;;  %7126 = vmatpush1.bf16.msra.mxu0 %v9670_v53  ;;  %v7175_v43 = vsel %vm6622_vm9, %v7174_v56, %v7173_v35  ;;  %v7311_v4 = vsel %vm6625_vm10, %v7310_v5, %v7309_v28  ;;  %v9745_v37 = vld [vmem:[%s12281_s12 + $0x240] ss:$8 sps:$4 sm:$0xff]  }
 0x95a   :  { %6993 = vmatprep.subr.bf16.mxu1 %v9675_v26  ;;  %7127 = vmatprep.subr.bf16.mxu0 %v9678_v16  ;;  %v7176_v53 = vsel %vm6625_vm10, %v11903_v3, %v7175_v43  ;;  %v9703_v26 = vld [vmem:[%s12281_s12 + $0x190] ss:$8 sps:$4 sm:$0xff]   ;;  %v7312_v16 = vsel %vm6628_vm11, %v11915_v51, %v7311_v4  ;;  %v9711_v3 = vld [vmem:[%s12281_s12 + $0x184] ss:$8 sps:$4 sm:$0xff]   ;;  %v9709_v51 = vld [vmem:[%s12281_s12 + $0x180] ss:$8 sps:$4 sm:$0xff]  }
 0x95b   :  { %v7178_v52 = vsel %vm6628_vm11, %v7177_v0, %v7176_v53  ;;  %v7314_v25 = vsel %vm6631_vm12, %v7313_v19, %v7312_v16  ;;  %v9748_v54 = vld [vmem:[%s12281_s12 + $0x2a0] ss:$8 sps:$4 sm:$0xff]  }
 0x95c   :  { %v7180_v48 = vsel %vm6631_vm12, %v7179_v7, %v7178_v52  ;;  %v7316_v14 = vsel %vm6634_vm13, %v7315_v34, %v7314_v25  ;;  %v12344_v52 = vsub.s32 0, %v10786_v6  ;;  %v12345_v7 = vsub.s32 1, %v10786_v6 }
 0x95d   :  { %6994 = vmatpush1.bf16.msra.mxu1 %v9673_v18  ;;  %7128 = vmatpush1.bf16.msra.mxu0 %v9676_v45  ;;  %v9720_v18 = vld [vmem:[%s12281_s12 + $0x2f4] ss:$8 sps:$4 sm:$0xff]   ;;  %v7182_v45 = vsel %vm6634_vm13, %v7181_v63, %v7180_v48 }
 0x95e   :  { %7251 = vmatprep.subr.bf16.mxu1 %v9681_v2  ;;  %7385 = vmatprep.subr.bf16.mxu0 %v9684_v17  ;;  %v7183_v2 = vpack.c.b16 %v7182_v45, %v7182_v45  ;;  %v7317_v17 = vpack.c.b16 %v7316_v14, %v7316_v14 }
 0x960   :  { %8289 = vmatmul.mubr.msk.bf16.vlgmr.msra.gmra.mxu1 %vm1001_vm2, %v6915_v13  ;;  %8314 = vmatmul.mubr.msk.bf16.vlgmr.msra.gmra.mxu0 %vm1001_vm2, %v7049_v1  ;;  %v9732_v13 = vld [vmem:[%s12281_s12 + $0x2d4] ss:$8 sps:$4 sm:$0xff]   ;;  %v9727_v1 = vld [vmem:[%s12281_s12 + $0x270] ss:$8 sps:$4 sm:$0xff]  }
 0x961   :  { %7252 = vmatpush1.bf16.msra.mxu1 %v9679_v40  ;;  %7386 = vmatpush1.bf16.msra.mxu0 %v9682_v10  ;;  %v9721_v40 = vld [vmem:[%s12281_s12 + $0x280] ss:$8 sps:$4 sm:$0xff]  }
 0x962   :  { %7253 = vmatprep.subr.bf16.mxu1 %v9687_v9  ;;  %7387 = vmatprep.subr.bf16.mxu0 %v9690_v55  ;;  %v9724_v10 = vld [vmem:[%s12281_s12 + $0x2e0] ss:$8 sps:$4 sm:$0xff]   ;;  %v9730_v9 = vld [vmem:[%s12281_s12 + $0x2d0] ss:$8 sps:$4 sm:$0xff]   ;;  %v9735_v55 = vld [vmem:[%s12281_s12 + $0x264] ss:$8 sps:$4 sm:$0xff]  }
 0x963   :  { %7279 = vmatprep.mubr.bf16.mxu1 %v12322_v8  ;;  %7413 = vmatprep.mubr.bf16.mxu0 %v12322_v8 }
 0x965   :  { %7254 = vmatpush1.bf16.msra.mxu1 %v9685_v62  ;;  %7388 = vmatpush1.bf16.msra.mxu0 %v9688_v21  ;;  %v9741_v62 = vld [vmem:[%s12281_s12 + $0x254] ss:$8 sps:$4 sm:$0xff]  }
 0x966   :  { %7255 = vmatprep.subr.bf16.mxu1 %v9693_v27  ;;  %7389 = vmatprep.subr.bf16.mxu0 %v9696_v59  ;;  %v9744_v21 = vld [vmem:[%s12281_s12 + $0x2b4] ss:$8 sps:$4 sm:$0xff]   ;;  %v9747_v27 = vld [vmem:[%s12281_s12 + $0x244] ss:$8 sps:$4 sm:$0xff]  }
 0x967   :  { %v9750_v59 = vld [vmem:[%s12281_s12 + $0x2a4] ss:$8 sps:$4 sm:$0xff]  }
 0x969   :  { %7256 = vmatpush1.bf16.msra.mxu1 %v9691_v42  ;;  %7390 = vmatpush1.bf16.msra.mxu0 %v9694_v12 }
 0x96a   :  { %7257 = vmatprep.subr.bf16.mxu1 %v9699_v38  ;;  %7391 = vmatprep.subr.bf16.mxu0 %v9702_v49 }
 0x96d   :  { %7258 = vmatpush1.bf16.msra.mxu1 %v9697_v39  ;;  %7392 = vmatpush1.bf16.msra.mxu0 %v9700_v46 }
 0x96e   :  { %7259 = vmatprep.subr.bf16.mxu1 %v9705_v32  ;;  %7393 = vmatprep.subr.bf16.mxu0 %v9708_v23  ;;  %v6586_v23 = vld [vmem:[%s12282_s13] sm:$0x3] }
 0x96f   :  { %v6745_v16 = vrot.slane %v6586_v23, %v12344_v52  ;;  %v6749_v19 = vrot.slane %v6586_v23, %v12345_v7 }
 0x971   :  { %7260 = vmatpush1.bf16.msra.mxu1 %v9703_v26  ;;  %7394 = vmatpush1.bf16.msra.mxu0 %v9706_v57 }
 0x972   :  { %7261 = vmatprep.subr.bf16.mxu1 %v9711_v3  ;;  %7395 = vmatprep.subr.bf16.mxu0 %v9714_v15 }
 0x975   :  { %7262 = vmatpush1.bf16.msra.mxu1 %v9709_v51  ;;  %7396 = vmatpush1.bf16.msra.mxu0 %v9712_v61 }
 0x976   :  { %7519 = vmatprep.subr.bf16.mxu1 %v9717_v47  ;;  %7653 = vmatprep.subr.bf16.mxu0 %v9720_v18 }
 0x978   :  { %8339 = vmatmul.mubr.msk.bf16.vlgmr.msra.gmra.mxu1 %vm1001_vm2, %v7183_v2  ;;  %8364 = vmatmul.mubr.msk.bf16.vlgmr.msra.gmra.mxu0 %vm1001_vm2, %v7317_v17 }
 0x979   :  { %7520 = vmatpush1.bf16.msra.mxu1 %v9715_v22  ;;  %7654 = vmatpush1.bf16.msra.mxu0 %v9718_v31 }
 0x97a   :  { %7521 = vmatprep.subr.bf16.mxu1 %v9723_v33  ;;  %7655 = vmatprep.subr.bf16.mxu0 %v9726_v24 }
 0x97b   :  { %7547 = vmatprep.mubr.bf16.mxu1 %v12322_v8  ;;  %7681 = vmatprep.mubr.bf16.mxu0 %v12322_v8  ;;  %v9738_v8 = vld [vmem:[%s12281_s12 + $0x2c4] ss:$8 sps:$4 sm:$0xff]  }
 0x97d   :  { %7522 = vmatpush1.bf16.msra.mxu1 %v9721_v40  ;;  %7656 = vmatpush1.bf16.msra.mxu0 %v9724_v10 }
 0x97e   :  { %7523 = vmatprep.subr.bf16.mxu1 %v9729_v20  ;;  %7657 = vmatprep.subr.bf16.mxu0 %v9732_v13 }
 0x981   :  { %7524 = vmatpush1.bf16.msra.mxu1 %v9727_v1  ;;  %7658 = vmatpush1.bf16.msra.mxu0 %v9730_v9 }
 0x982   :  { %7525 = vmatprep.subr.bf16.mxu1 %v9735_v55  ;;  %7659 = vmatprep.subr.bf16.mxu0 %v9738_v8 }
 0x985   :  { %7526 = vmatpush1.bf16.msra.mxu1 %v9733_v58  ;;  %7660 = vmatpush1.bf16.msra.mxu0 %v9736_v41 }
 0x986   :  { %7527 = vmatprep.subr.bf16.mxu1 %v9741_v62  ;;  %7661 = vmatprep.subr.bf16.mxu0 %v9744_v21 }
 0x989   :  { %7528 = vmatpush1.bf16.msra.mxu1 %v9739_v60  ;;  %7662 = vmatpush1.bf16.msra.mxu0 %v9742_v44 }
 0x98a   :  { %7529 = vmatprep.subr.bf16.mxu1 %v9747_v27  ;;  %7663 = vmatprep.subr.bf16.mxu0 %v9750_v59 }
 0x98d   :  { %7530 = vmatpush1.bf16.msra.mxu1 %v9745_v37  ;;  %7664 = vmatpush1.bf16.msra.mxu0 %v9748_v54 }
 0x990   :  { %8389 = vmatmul.mubr.msk.bf16.vlgmr.msra.gmra.mxu1 %vm1001_vm2, %v7451_v50  ;;  %8414 = vmatmul.mubr.msk.bf16.vlgmr.msra.gmra.mxu0 %vm1001_vm2, %v7585_v36 }
 0xa08   :  { %v6734_v42 = vpop.f32.mrf.mxu1  ;;  %v6879_v12 = vpop.f32.mrf.mxu0 }
 0xa09   :  { %v6752_v51 = vadd.f32 %v6745_v16, %v6734_v42 }
 0xa0a   :  { %v6736_v30 = vpop.f32.mrf.mxu1  ;;  %v6881_v38 = vpop.f32.mrf.mxu0 }
 0xa0b   :  { %v6753_v61 = vadd.f32 %v6749_v19, %v6736_v30  ;;  %v6886_v63 = vadd.f32 %v6879_v12, %v6752_v51 }
 0xa0c   :  { %v6738_v49 = vpop.f32.mrf.mxu1  ;;  %v6883_v35 = vpop.f32.mrf.mxu0 }
 0xa0d   :  { %v6887_v34 = vadd.f32 %v6881_v38, %v6753_v61 }
 0xa0e   :  { %v6739_v5 = vpop.f32.mrf.mxu1  ;;  %v6884_v56 = vpop.f32.mrf.mxu0 }
 0xa20   :  { %v7013_v28 = vpop.f32.mrf.mxu1  ;;  %v7147_v39 = vpop.f32.mrf.mxu0 }
 0xa21   :  { %v7020_v47 = vadd.f32 %v7013_v28, %v6886_v63 }
 0xa22   :  { %v7015_v46 = vpop.f32.mrf.mxu1  ;;  %v7149_v43 = vpop.f32.mrf.mxu0 }
 0xa23   :  { %v7021_v18 = vadd.f32 %v7015_v46, %v6887_v34  ;;  %v7154_v45 = vadd.f32 %v7147_v39, %v7020_v47 }
 0xa24   :  { %v7017_v11 = vpop.f32.mrf.mxu1  ;;  %v7151_v0 = vpop.f32.mrf.mxu0 }
 0xa25   :  { %v7155_v14 = vadd.f32 %v7149_v43, %v7021_v18 }
 0xa26   :  { %v7018_v32 = vpop.f32.mrf.mxu1  ;;  %v7152_v29 = vpop.f32.mrf.mxu0 }
 0xa38   :  { %v7281_v4 = vpop.f32.mrf.mxu1  ;;  %v7415_v53 = vpop.f32.mrf.mxu0 }
 0xa39   :  { %v7288_v22 = vadd.f32 %v7281_v4, %v7154_v45 }
 0xa3a   :  { %v7283_v26 = vpop.f32.mrf.mxu1  ;;  %v7417_v57 = vpop.f32.mrf.mxu0 }
 0xa3b   :  { %v7289_v31 = vadd.f32 %v7283_v26, %v7155_v14  ;;  %v7422_v2 = vadd.f32 %v7415_v53, %v7288_v22 }
 0xa3c   :  { %v7285_v3 = vpop.f32.mrf.mxu1  ;;  %v7419_v15 = vpop.f32.mrf.mxu0 }
 0xa3d   :  { %v7423_v24 = vadd.f32 %v7417_v57, %v7289_v31 }
 0xa3e   :  { %v7286_v48 = vpop.f32.mrf.mxu1  ;;  %v7420_v25 = vpop.f32.mrf.mxu0 }
 0xa50   :  { %v7549_v17 = vpop.f32.mrf.mxu1  ;;  %v7683_v33 = vpop.f32.mrf.mxu0 }
 0xa51   :  { %v7556_v40 = vadd.f32 %v7549_v17, %v7422_v2 }
 0xa52   :  { %v7551_v10 = vpop.f32.mrf.mxu1  ;;  %v7685_v6 = vpop.f32.mrf.mxu0 }
 0xa53   :  { %v7690_v20 = vadd.f32 %v7683_v33, %v7556_v40  ;;  %v7557_v13 = vadd.f32 %v7551_v10, %v7423_v24 }
 0xa54   :  { %v7553_v1 = vpop.f32.mrf.mxu1  ;;  %v7687_v9 = vpop.f32.mrf.mxu0 }
 0xa55   :  { %7692 = vst [vmem:[%s12283_s14] sm:$0xff] %v7690_v20  ;;  %v7691_v55 = vadd.f32 %v7685_v6, %v7557_v13 }
 0xa56   :  { %v7554_v8 = vpop.f32.mrf.mxu1  ;;  %v7688_v58 = vpop.f32.mrf.mxu0 }
 0xa57   :  { %7693 = vst [vmem:[%s12283_s14 + $0x8] sm:$0xff] %v7691_v55 }
 0xa58   :  { %7698 = vsyncpa [#allocation3], 1 }
 0xa59   :  { %7699 = vsyncpa [#allocation5], 1 }
 0xa5a   :  { %7700 = vsyncpa [#allocation8], 1 }

</bundles_post_ra>
